<compile_context>
chip_gen: v7x
topology: tpu7x:2x2x1
jax: 0.10.0
libtpu: 0.0.40
codegen_flags: <defaults>
</compile_context>

<pallas_src>
import jax
import jax.numpy as jnp
from jax.experimental import pallas as pl
from jax.experimental.pallas import tpu as pltpu

B = 128        # batch (rows per call) -- fills MXU M dim, amortizes weight DMA
D_IN = 512     # encoder input dim (chosen; module does not fix it)
D_H = 2048     # encoder hidden dim (fixed by meanL/sigmaL = Linear(2048, 256))
D_Z = 256      # latent dim (fixed by the module)
D_OUT = 512    # decoder output dim (chosen)
TK = 512       # tile along D_H; grid = D_H // TK steps -> weight DMA pipelines with compute


def vae_kernel(x_ref, we_ref, be_ref, wms_ref, bms_ref, wd_ref, bd_ref, eps_ref,
               out_ref, z_ref, ms_acc):
    k = pl.program_id(0)

    @pl.when(k == 0)
    def _():
        ms_acc[...] = jnp.zeros_like(ms_acc)

    # encoder chunk k: h_k = relu(x @ We[:, k*TK:(k+1)*TK] + be[:, k*TK:(k+1)*TK])
    h = jnp.dot(x_ref[...].astype(jnp.bfloat16), we_ref[...],
                preferred_element_type=jnp.float32)
    h = jnp.maximum(h + be_ref[...], 0.0)

    # fused mean|sigma-logit head, accumulated over the D_H contraction:
    #   ms_acc += h_k @ [Wm | Ws][k*TK:(k+1)*TK, :]
    ms_acc[...] += jnp.dot(h.astype(jnp.bfloat16), wms_ref[...],
                           preferred_element_type=jnp.float32)

    @pl.when(k == pl.num_programs(0) - 1)
    def _():
        ms = ms_acc[...] + bms_ref[...]
        mean = ms[:, :D_Z]
        sigma = jnp.exp(ms[:, D_Z:])                 # exp(sigmaL(h)), as in the module
        z = mean + sigma * eps_ref[...]              # (1, 256) eps broadcasts over batch (like torch)
        z_ref[...] = z
        # decoder: r = z @ Wd + bd
        out_ref[...] = jnp.dot(z.astype(jnp.bfloat16), wd_ref[...],
                               preferred_element_type=jnp.float32) + bd_ref[...]
    # TODO(synk): original code prints mean/std/min/max of z; compute host-side on z if needed.


def vae_forward(x, params, eps):
    we, be, wms, bms, wd, bd = params
    grid = (D_H // TK,)
    in_specs = [
        pl.BlockSpec((B, D_IN),        lambda k: (0, 0)),  # x  (resident; DMA'd once)
        pl.BlockSpec((D_IN, TK),       lambda k: (0, k)),  # We column chunk
        pl.BlockSpec((1, TK),          lambda k: (0, k)),  # be chunk
        pl.BlockSpec((TK, 2 * D_Z),    lambda k: (k, 0)),  # [Wm|Ws] row chunk
        pl.BlockSpec((1, 2 * D_Z),     lambda k: (0, 0)),  # [bm|bs]
        pl.BlockSpec((D_Z, D_OUT),     lambda k: (0, 0)),  # Wd (small; resident)
        pl.BlockSpec((1, D_OUT),       lambda k: (0, 0)),  # bd
        pl.BlockSpec((1, D_Z),         lambda k: (0, 0)),  # eps
    ]
    out_specs = [
        pl.BlockSpec((B, D_OUT), lambda k: (0, 0)),
        pl.BlockSpec((B, D_Z),   lambda k: (0, 0)),
    ]
    out_shape = [jax.ShapeDtypeStruct((B, D_OUT), jnp.float32),
                 jax.ShapeDtypeStruct((B, D_Z), jnp.float32)]
    r, z = pl.pallas_call(
        vae_kernel,
        grid_spec=pltpu.PrefetchScalarGridSpec(
            num_scalar_prefetch=0,
            grid=grid,
            in_specs=in_specs,
            out_specs=out_specs,
            scratch_shapes=[pltpu.VMEM((B, 2 * D_Z), jnp.float32)],
        ),
        out_shape=out_shape,
        compiler_params=pltpu.CompilerParams(
            dimension_semantics=("arbitrary",),   # D_H is a reduction axis
            vmem_limit_bytes=32 << 20,
        ),
    )(x, we, be, wms, bms, wd, bd, eps)
    return r, z


def init_params(key):
    ks = jax.random.split(key, 8)

    def lin(kw, kb, fan_in, fan_out):
        bound = 1.0 / jnp.sqrt(fan_in)
        w = jax.random.uniform(kw, (fan_in, fan_out), jnp.float32, -bound, bound)
        b = jax.random.uniform(kb, (1, fan_out), jnp.float32, -bound, bound)
        return w, b

    we, be = lin(ks[0], ks[1], D_IN, D_H)     # encoder
    wm, bm = lin(ks[2], ks[3], D_H, D_Z)      # meanL: Linear(2048, 256)
    ws, bs = lin(ks[4], ks[5], D_H, D_Z)      # sigmaL: Linear(2048, 256)
    wd, bd = lin(ks[6], ks[7], D_Z, D_OUT)    # decoder

    # fuse the two heads: one MXU pass of h, one DMA stream; weights in bf16 (f32 accumulate)
    wms = jnp.concatenate([wm, ws], axis=1)           # (D_H, 2*D_Z)
    bms = jnp.concatenate([bm, bs], axis=1)           # (1, 2*D_Z)
    return (we.astype(jnp.bfloat16), be,
            wms.astype(jnp.bfloat16), bms,
            wd.astype(jnp.bfloat16), bd)


if __name__ == "__main__":
    key = jax.random.PRNGKey(0)
    k_x, k_eps, k_p = jax.random.split(key, 3)

    state = jax.random.normal(k_x, (B, D_IN), jnp.float32)
    # torch.Tensor(np.random.normal(0, 1, size=256)) -> one 256-vector broadcast over the batch
    eps = jax.random.normal(k_eps, (1, D_Z), jnp.float32)
    params = init_params(k_p)

    r, z = vae_forward(state, params, eps)
    jax.block_until_ready((r, z))

    # reference check in plain JAX (same bf16-weight / f32-accumulate convention)
    we, be, wms, bms, wd, bd = params
    xb = state.astype(jnp.bfloat16)
    h_ref = jnp.maximum(jnp.dot(xb, we, preferred_element_type=jnp.float32) + be, 0.0)
    ms_ref = jnp.dot(h_ref.astype(jnp.bfloat16), wms,
                     preferred_element_type=jnp.float32) + bms
    mean_ref = ms_ref[:, :D_Z]
    sigma_ref = jnp.exp(ms_ref[:, D_Z:])
    z_ref = mean_ref + sigma_ref * eps
    r_ref = jnp.dot(z_ref.astype(jnp.bfloat16), wd,
                    preferred_element_type=jnp.float32) + bd

    assert jnp.allclose(z, z_ref, atol=1e-2, rtol=1e-2)
    assert jnp.allclose(r, r_ref, atol=1e-2, rtol=1e-2)

    print("KERNEL_OK")
</pallas_src>

<mosaic_0001>
module attributes {stable_mosaic.version = 11 : i64} {
  func.func @vae_kernel(%arg0: i32, %arg1: memref<128x512xf32, #tpu.memory_space<vmem>>, %arg2: memref<512x512xbf16, #tpu.memory_space<vmem>>, %arg3: memref<1x512xf32, #tpu.memory_space<vmem>>, %arg4: memref<512x512xbf16, #tpu.memory_space<vmem>>, %arg5: memref<1x512xf32, #tpu.memory_space<vmem>>, %arg6: memref<256x512xbf16, #tpu.memory_space<vmem>>, %arg7: memref<1x512xf32, #tpu.memory_space<vmem>>, %arg8: memref<1x256xf32, #tpu.memory_space<vmem>>, %arg9: memref<128x512xf32, #tpu.memory_space<vmem>>, %arg10: memref<128x256xf32, #tpu.memory_space<vmem>>, %arg11: memref<128x512xf32, #tpu.memory_space<vmem>>) attributes {dimension_semantics = [#tpu.dimension_semantics<arbitrary>], iteration_bounds = array<i64: 4>, scalar_prefetch = 0 : i64, scratch_operands = 1 : i64, tpu.core_type = #tpu.core_type<tc>, window_params = [{pipeline_mode = #tpu.pipeline_mode<synchronous>, transform_indices = @transform_0, window_bounds = array<i64: 128, 512>}, {transform_indices = @transform_1, window_bounds = array<i64: 512, 512>}, {transform_indices = @transform_2, window_bounds = array<i64: 1, 512>}, {transform_indices = @transform_3, window_bounds = array<i64: 512, 512>}, {pipeline_mode = #tpu.pipeline_mode<synchronous>, transform_indices = @transform_4, window_bounds = array<i64: 1, 512>}, {pipeline_mode = #tpu.pipeline_mode<synchronous>, transform_indices = @transform_5, window_bounds = array<i64: 256, 512>}, {pipeline_mode = #tpu.pipeline_mode<synchronous>, transform_indices = @transform_6, window_bounds = array<i64: 1, 512>}, {pipeline_mode = #tpu.pipeline_mode<synchronous>, transform_indices = @transform_7, window_bounds = array<i64: 1, 256>}, {pipeline_mode = #tpu.pipeline_mode<synchronous>, transform_indices = @transform_8, window_bounds = array<i64: 128, 512>}, {pipeline_mode = #tpu.pipeline_mode<synchronous>, transform_indices = @transform_9, window_bounds = array<i64: 128, 256>}]} {
    %c0_i32 = arith.constant 0 : i32
    %0 = arith.cmpi eq, %arg0, %c0_i32 : i32
    %1 = arith.extui %0 : i1 to i32
    %c0_i32_0 = arith.constant 0 : i32
    %2 = arith.cmpi ne, %1, %c0_i32_0 : i32
    scf.if %2 {
      %cst_15 = arith.constant 0.000000e+00 : f32
      %21 = vector.broadcast %cst_15 : f32 to vector<128x512xf32>
      %c0_16 = arith.constant 0 : index
      %c0_17 = arith.constant 0 : index
      %22 = vector.load %arg11[%c0_16, %c0_17] : memref<128x512xf32, #tpu.memory_space<vmem>>, vector<128x512xf32>
      tpu.vector_store %arg11[%c0_16, %c0_17], %21 {strides = array<i32>} : memref<128x512xf32, #tpu.memory_space<vmem>>, vector<128x512xf32>,
    } else {
    }
    %c0 = arith.constant 0 : index
    %c0_1 = arith.constant 0 : index
    %3 = vector.load %arg1[%c0, %c0_1] : memref<128x512xf32, #tpu.memory_space<vmem>>, vector<128x512xf32>
    %4 = arith.truncf %3 : vector<128x512xf32> to vector<128x512xbf16>
    %c0_2 = arith.constant 0 : index
    %c0_3 = arith.constant 0 : index
    %5 = vector.load %arg2[%c0_2, %c0_3] : memref<512x512xbf16, #tpu.memory_space<vmem>>, vector<512x512xbf16>
    %cst = arith.constant dense<0.000000e+00> : vector<128x512xf32>
    %6 = tpu.matmul %4, %5, %cst {dimension_numbers = #tpu.dot_dimension_numbers<[1], [0], [0], [1], [0, 0, 1, 1], [], []>} : vector<128x512xbf16>, vector<512x512xbf16>, vector<128x512xf32> -> vector<128x512xf32>
    %c0_4 = arith.constant 0 : index
    %c0_5 = arith.constant 0 : index
    %7 = vector.load %arg3[%c0_4, %c0_5] : memref<1x512xf32, #tpu.memory_space<vmem>>, vector<1x512xf32>
    %8 = vector.broadcast %7 : vector<1x512xf32> to vector<128x512xf32>
    %9 = arith.addf %6, %8 : vector<128x512xf32>
    %cst_6 = arith.constant 0.000000e+00 : f32
    %10 = vector.broadcast %cst_6 : f32 to vector<128x512xf32>
    %11 = arith.maximumf %9, %10 : vector<128x512xf32>
    %c0_7 = arith.constant 0 : index
    %c0_8 = arith.constant 0 : index
    %12 = vector.load %arg11[%c0_7, %c0_8] : memref<128x512xf32, #tpu.memory_space<vmem>>, vector<128x512xf32>
    %13 = arith.truncf %11 : vector<128x512xf32> to vector<128x512xbf16>
    %c0_9 = arith.constant 0 : index
    %c0_10 = arith.constant 0 : index
    %14 = vector.load %arg4[%c0_9, %c0_10] : memref<512x512xbf16, #tpu.memory_space<vmem>>, vector<512x512xbf16>
    %cst_11 = arith.constant dense<0.000000e+00> : vector<128x512xf32>
    %15 = tpu.matmul %13, %14, %cst_11 {dimension_numbers = #tpu.dot_dimension_numbers<[1], [0], [0], [1], [0, 0, 1, 1], [], []>} : vector<128x512xbf16>, vector<512x512xbf16>, vector<128x512xf32> -> vector<128x512xf32>
    %16 = arith.addf %12, %15 : vector<128x512xf32>
    %c0_12 = arith.constant 0 : index
    %c0_13 = arith.constant 0 : index
    %17 = vector.load %arg11[%c0_12, %c0_13] : memref<128x512xf32, #tpu.memory_space<vmem>>, vector<128x512xf32>
    tpu.vector_store %arg11[%c0_12, %c0_13], %16 {strides = array<i32>} : memref<128x512xf32, #tpu.memory_space<vmem>>, vector<128x512xf32>,
    %c3_i32 = arith.constant 3 : i32
    %18 = arith.cmpi eq, %arg0, %c3_i32 : i32
    %19 = arith.extui %18 : i1 to i32
    %c0_i32_14 = arith.constant 0 : i32
    %20 = arith.cmpi ne, %19, %c0_i32_14 : i32
    scf.if %20 {
      %c0_15 = arith.constant 0 : index
      %c0_16 = arith.constant 0 : index
      %21 = vector.load %arg11[%c0_15, %c0_16] : memref<128x512xf32, #tpu.memory_space<vmem>>, vector<128x512xf32>
      %c0_17 = arith.constant 0 : index
      %c0_18 = arith.constant 0 : index
      %22 = vector.load %arg5[%c0_17, %c0_18] : memref<1x512xf32, #tpu.memory_space<vmem>>, vector<1x512xf32>
      %23 = vector.broadcast %22 : vector<1x512xf32> to vector<128x512xf32>
      %24 = arith.addf %21, %23 : vector<128x512xf32>
      %25 = vector.extract_strided_slice %24 {offsets = [0, 0], sizes = [128, 256], strides = [1, 1]} : vector<128x512xf32> to vector<128x256xf32>
      %26 = vector.extract_strided_slice %24 {offsets = [0, 256], sizes = [128, 256], strides = [1, 1]} : vector<128x512xf32> to vector<128x256xf32>
      %27 = math.exp %26 : vector<128x256xf32>
      %c0_19 = arith.constant 0 : index
      %c0_20 = arith.constant 0 : index
      %28 = vector.load %arg8[%c0_19, %c0_20] : memref<1x256xf32, #tpu.memory_space<vmem>>, vector<1x256xf32>
      %29 = vector.broadcast %28 : vector<1x256xf32> to vector<128x256xf32>
      %30 = arith.mulf %27, %29 : vector<128x256xf32>
      %31 = arith.addf %25, %30 : vector<128x256xf32>
      %c0_21 = arith.constant 0 : index
      %c0_22 = arith.constant 0 : index
      %32 = vector.load %arg10[%c0_21, %c0_22] : memref<128x256xf32, #tpu.memory_space<vmem>>, vector<128x256xf32>
      tpu.vector_store %arg10[%c0_21, %c0_22], %31 {strides = array<i32>} : memref<128x256xf32, #tpu.memory_space<vmem>>, vector<128x256xf32>,
      %33 = arith.truncf %31 : vector<128x256xf32> to vector<128x256xbf16>
      %c0_23 = arith.constant 0 : index
      %c0_24 = arith.constant 0 : index
      %34 = vector.load %arg6[%c0_23, %c0_24] : memref<256x512xbf16, #tpu.memory_space<vmem>>, vector<256x512xbf16>
      %cst_25 = arith.constant dense<0.000000e+00> : vector<128x512xf32>
      %35 = tpu.matmul %33, %34, %cst_25 {dimension_numbers = #tpu.dot_dimension_numbers<[1], [0], [0], [1], [0, 0, 1, 1], [], []>} : vector<128x256xbf16>, vector<256x512xbf16>, vector<128x512xf32> -> vector<128x512xf32>
      %c0_26 = arith.constant 0 : index
      %c0_27 = arith.constant 0 : index
      %36 = vector.load %arg7[%c0_26, %c0_27] : memref<1x512xf32, #tpu.memory_space<vmem>>, vector<1x512xf32>
      %37 = vector.broadcast %36 : vector<1x512xf32> to vector<128x512xf32>
      %38 = arith.addf %35, %37 : vector<128x512xf32>
      %c0_28 = arith.constant 0 : index
      %c0_29 = arith.constant 0 : index
      %39 = vector.load %arg9[%c0_28, %c0_29] : memref<128x512xf32, #tpu.memory_space<vmem>>, vector<128x512xf32>
      tpu.vector_store %arg9[%c0_28, %c0_29], %38 {strides = array<i32>} : memref<128x512xf32, #tpu.memory_space<vmem>>, vector<128x512xf32>,
    } else {
    }
    return
  }
  func.func @transform_0(%arg0: i32) -> (i32, i32) {
    %c0_i32 = arith.constant 0 : i32
    %c0_i32_0 = arith.constant 0 : i32
    %c0_i32_1 = arith.constant 0 : i32
    return %c0_i32, %c0_i32_0 : i32, i32
  }
  func.func @transform_1(%arg0: i32) -> (i32, i32) {
    %c0_i32 = arith.constant 0 : i32
    %c0_i32_0 = arith.constant 0 : i32
    return %c0_i32, %arg0 : i32, i32
  }
  func.func @transform_2(%arg0: i32) -> (i32, i32) {
    %c0_i32 = arith.constant 0 : i32
    %c0_i32_0 = arith.constant 0 : i32
    return %c0_i32, %arg0 : i32, i32
  }
  func.func @transform_3(%arg0: i32) -> (i32, i32) {
    %c0_i32 = arith.constant 0 : i32
    %c0_i32_0 = arith.constant 0 : i32
    return %arg0, %c0_i32 : i32, i32
  }
  func.func @transform_4(%arg0: i32) -> (i32, i32) {
    %c0_i32 = arith.constant 0 : i32
    %c0_i32_0 = arith.constant 0 : i32
    %c0_i32_1 = arith.constant 0 : i32
    return %c0_i32, %c0_i32_0 : i32, i32
  }
  func.func @transform_5(%arg0: i32) -> (i32, i32) {
    %c0_i32 = arith.constant 0 : i32
    %c0_i32_0 = arith.constant 0 : i32
    %c0_i32_1 = arith.constant 0 : i32
    return %c0_i32, %c0_i32_0 : i32, i32
  }
  func.func @transform_6(%arg0: i32) -> (i32, i32) {
    %c0_i32 = arith.constant 0 : i32
    %c0_i32_0 = arith.constant 0 : i32
    %c0_i32_1 = arith.constant 0 : i32
    return %c0_i32, %c0_i32_0 : i32, i32
  }
  func.func @transform_7(%arg0: i32) -> (i32, i32) {
    %c0_i32 = arith.constant 0 : i32
    %c0_i32_0 = arith.constant 0 : i32
    %c0_i32_1 = arith.constant 0 : i32
    return %c0_i32, %c0_i32_0 : i32, i32
  }
  func.func @transform_8(%arg0: i32) -> (i32, i32) {
    %c0_i32 = arith.constant 0 : i32
    %c0_i32_0 = arith.constant 0 : i32
    %c0_i32_1 = arith.constant 0 : i32
    return %c0_i32, %c0_i32_0 : i32, i32
  }
  func.func @transform_9(%arg0: i32) -> (i32, i32) {
    %c0_i32 = arith.constant 0 : i32
    %c0_i32_0 = arith.constant 0 : i32
    %c0_i32_1 = arith.constant 0 : i32
    return %c0_i32, %c0_i32_0 : i32, i32
  }
}

</mosaic_0001>

<bundles_post_ra>
// kernel: tpu_custom_call.1
= control target key start
LH: loop header
LB: loop body
LE: loop exit
PB: predicated region body
PF: predicated region fallthrough
CT: control target
= control target key end

     0   :  { %s7337_s0 = inlined_call_operand.hbm [shape: f32[128,512], index: 0, kind: input, shape index: {}]   ;;  %s7338_s1 = inlined_call_operand.hbm [shape: bf16[512,2048], index: 1, kind: input, shape index: {}]   ;;  %s7339_s2 = inlined_call_operand.hbm [shape: f32[1,2048], index: 2, kind: input, shape index: {}]   ;;  %s7340_s3 = inlined_call_operand.hbm [shape: bf16[2048,512], index: 3, kind: input, shape index: {}]   ;;  %s7341_s4 = inlined_call_operand.hbm [shape: f32[1,512], index: 4, kind: input, shape index: {}]   ;;  %s7342_s5 = inlined_call_operand.hbm [shape: bf16[256,512], index: 5, kind: input, shape index: {}]   ;;  %s7343_s6 = inlined_call_operand.hbm [shape: f32[1,512], index: 6, kind: input, shape index: {}]   ;;  %s7344_s7 = inlined_call_operand.hbm [shape: f32[1,256], index: 7, kind: input, shape index: {}]   ;;  %s7345_s8 = inlined_call_operand.hbm [shape: f32[128,512], index: 8, kind: output, shape index: {0}]   ;;  %s7346_s9 = inlined_call_operand.hbm [shape: f32[128,256], index: 9, kind: output, shape index: {1}]  }
   0x1   :  { %7375 = sst [smem:[#allocation34_spill]] %s7338_s1 }
   0x2   :  { %7376 = sst [smem:[#allocation35_spill]] %s7341_s4 }
   0x3   :  { %7377 = sst [smem:[#allocation36_spill]] %s7342_s5 }
   0x4   :  { %7378 = sst [smem:[#allocation37_spill]] %s7345_s8 }
   0x5   :  { %7379 = sst [smem:[#allocation38_spill]] %s7346_s9 }
   0x6   :  { %15 = vsyncpa [#allocation4], 0 }
   0x7   :  { %16 = vsyncpa [#allocation7], 0 }
   0x8   :  { %18 = vsyncpa [#allocation7 + $0x1], 0 }
   0x9   :  { %19 = vsyncpa [#allocation10], 0 }
   0xa   :  { %21 = vsyncpa [#allocation10 + $0x1], 0 }
   0xb   :  { %22 = vsyncpa [#allocation13], 0 }
   0xc   :  { %23 = vsyncpa [#allocation16], 0 }
   0xd   :  { %24 = vsyncpa [#allocation5], 0 }
   0xe   :  { %25 = vsyncpa [#allocation19], 0  ;;  %s6247_s30 = smov 0   ;;  %s6249_s10 = smov 0  }
   0xf   :  { %s6251_s11 = smov 0   ;;  %s6253_s12 = smov 0  }
  0x10 LB: > { %7380 = sst [smem:[#allocation28_spill]] %s6167_s10  ;;  %s6266_s13 = sadd.s32 4294967295, %s6175_s12   ;;  %s6175_s12 = sphi %s6253_s12, %s7422_s12   ;;  %s6171_s11 = sphi %s6251_s11, %s7426_s11   ;;  %s6167_s10 = sphi %s6249_s10, %s7425_s10   ;;  %s6163_s30 = sphi %s6247_s30, %s7423_s30  }
  0x11   : > { %7381 = sst [smem:[#allocation29_spill]] %s6266_s13  ;;  %p72_p0 = scmp.ne.s32.totalorder %s6167_s10, %s6163_s30 }
  0x12   : > { %p7347_p1 = scmp.eq.s32.totalorder %s6266_s13, 0  ;;  %p4613_p2 = scmp.ge.s32.totalorder %s6175_s12, 1 }
  0x13   : > { %p261_p3 = scmp.lt.s32.totalorder %s6175_s12, 5  ;;  %s6177_s16 = smov [#allocation11]  }
  0x14   : > { %p6275_p5 = por %p7347_p1, %p72_p0  ;;  %s287_s17 = sshll.u32 %s6177_s16, 4  ;;  %s288_s17 = int_to_ptr.vmem [resolvable:$true] %s287_s17 }
  0x15   : > { %p6279_p6 = pnand %p4613_p2, %p261_p3  ;;  %s6178_s18 = smov [#allocation12]  }
  0x16   : > { %s7382_s14 = scalar_select %p6275_p5, 1, 0 }
  0x17   : > { %s7384_s15 = scalar_select %p6279_p6, 1, 0 }
  0x18   : > { %7383 = sst [smem:[#allocation30_spill]] %s7382_s14  ;;  %p5197_p7 = pneg %p6279_p6 }
  0x19   : > { %7385 = sst [smem:[#allocation31_spill]] %s7384_s15  ;;  %s297_s19 = sshll.u32 %s6178_s18, 4  ;;  %s6291_s19 = int_to_ptr.vmem [resolvable:$true] %s297_s19 }
  0x1a   : > { %p6287_p8 = pnand %p5197_p7, %p7347_p1  ;;  %s7387_s4 = sld [smem:[#allocation35_spill]] }
  0x1c   : > { %s7386_s20 = scalar_select %p6287_p8, 1, 0 }
  0x1d   : > { %p6301_p10 = pneg %p6287_p8 }
  0x1f   : > { %s7388_s26 = scalar_select %p6301_p10, 1, 0 }
  0x20   : > { %s5831_s23 = scalar_lea.hbm %s7387_s4, 64 }
  0x21   : > { %p5832_p9 = scmp.ne.s32.totalorder %s7387_s4, %s5831_s23  ;;  %p5838_p13 = scmp.lt.u32.totalorder %s5831_s23, %s7387_s4 }
  0x23   : > { %p5834_p11 = pnand %p6301_p10, %p5832_p9 }
  0x25   : > { %p5835_p12 = pneg %p5834_p11 }
  0x27   : > { %p5840_p0 = pnand %p5838_p13, %p5835_p12 }
  0x29   : > { %5843 = shalt.err (!%p5840_p0)
}
  0x2a   : > { %s5844_s29 = scalar_lea.vmem %s288_s17, 64  ;;  %p5852_p4 = scmp.lt.s32.totalorder %s288_s17, %s288_s17 }
  0x2b   : > { %p5845_p2 = scmp.ne.s32.totalorder %s288_s17, %s5844_s29  ;;  %p5853_p1 = scmp.lt.s32.totalorder %s5844_s29, %s5844_s29 }
  0x2d   : > { %p5847_p3 = pnand %p5845_p2, %p6301_p10  ;;  %p5854_p5 = por %p5853_p1, %p5852_p4 }
  0x2f   : > { %p5848_p7 = pneg %p5847_p3 }
  0x31   : > { %p5855_p6 = pnand %p5854_p5, %p5848_p7 }
  0x33   : > { %5858 = shalt.err (!%p5855_p6)
}
  0x34   : > { %5203 = dma.hbm_to_vmem [thread:$0]  (!%p6287_p8), %s7387_s4, 64, %s288_s17, [#allocation10]  }
  0x35   : > { %s7389_s5 = sld [smem:[#allocation36_spill]] }
  0x3b   : > { %s5859_s22 = scalar_lea.hbm %s7389_s5, 8192 }
  0x3c   : > { %p5860_p9 = scmp.ne.s32.totalorder %s7389_s5, %s5859_s22  ;;  %p5866_p4 = scmp.lt.u32.totalorder %s5859_s22, %s7389_s5 }
  0x3e   : > { %p5862_p11 = pnand %p5860_p9, %p6301_p10 }
  0x40   : > { %p5863_p1 = pneg %p5862_p11 }
  0x42   : > { %p5868_p5 = pnand %p5866_p4, %p5863_p1 }
  0x44   : > { %5871 = shalt.err (!%p5868_p5)
}
  0x45   : > { %s5872_s17 = scalar_lea.vmem %s6291_s19, 8192  ;;  %p5880_p0 = scmp.lt.s32.totalorder %s6291_s19, %s6291_s19 }
  0x46   : > { %p5873_p6 = scmp.ne.s32.totalorder %s6291_s19, %s5872_s17  ;;  %p5881_p2 = scmp.lt.s32.totalorder %s5872_s17, %s5872_s17 }
  0x48   : > { %p5875_p12 = pnand %p5873_p6, %p6301_p10  ;;  %p5882_p3 = por %p5881_p2, %p5880_p0 }
  0x4a   : > { %p5876_p13 = pneg %p5875_p12 }
  0x4c   : > { %p5883_p7 = pnand %p5882_p3, %p5876_p13 }
  0x4e   : > { %5886 = shalt.err (!%p5883_p7)
}
  0x4f   : > { %s7350_s28 = smov 256   ;;  %s7353_s29 = smov 16  }
  0x50   : > { %5206 = dma.hbm_to_vmem [thread:$0]  (!%p6287_p8), %s7389_s5, 8192, %s6291_s19, [#allocation13], %s7350_s28, %s7350_s28, %s7353_s29  }
  0x51   : > { %s6344_s18 = sadd.s32 1, %s6175_s12   ;;  %s59_s21 = sadd.s32 1, %s6171_s11 }
  0x52   : > { %7390 = sst [smem:[#allocation32_spill]] %s6344_s18  ;;  %s56_s22 = ssub.s32 %s6175_s12, %s6344_s18 }
  0x53   : > { %p66_p9 = scmp.ne.s32.totalorder %s6171_s11, %s6167_s10  ;;  %p57_p11 = scmp.eq.s32.totalorder %s56_s22, 0 }
  0x54   : > { %p67_p1 = scmp.eq.s32.totalorder %s6175_s12, 0  ;;  %p5228_p4 = scmp.lt.s32.totalorder %s6175_s12, 4 }
  0x55   : > { %s7355_s23 = sand.u32 1, %s6175_s12   ;;  %s7352_s25 = sand.u32 1, %s6171_s11  }
  0x56   : > { %s6355_s24 = scalar_select %p57_p11, %s6171_s11, %s59_s21  }
  0x57   : > { %p68_p5 = por %p67_p1, %p66_p9  ;;  %s4967_s27 = sshll.u32 %s6175_s12, 8 }
  0x58   : > { %7391 = sst [smem:[#allocation33_spill]] %s6355_s24  ;;  %s6361_s17 = sshll.u32 %s7352_s25, 10 }
  0x59   : > { %s7392_s1 = sld [smem:[#allocation34_spill]]  ;;  %p6368_p6 = pnand %p5228_p4, %p68_p5 }
  0x5a   : > { %s337_s21 = scalar_lea.vmem [#allocation6], %s6361_s17  ;;  %s6377_s25 = scalar_lea.sflag [#allocation7], %s7355_s23 }
  0x5b   : > { %s7393_s22 = scalar_select %p6368_p6, 1, 0 }
  0x5c   : > { %s344_s28 = sshll.u32 %s337_s21, 4  ;;  %p6383_p13 = pneg %p6368_p6  ;;  %s6373_s28 = int_to_ptr.vmem [resolvable:$true] %s344_s28 }
  0x5f   : > { %s6366_s16 = scalar_lea.hbm %s7392_s1, %s4967_s27  ;;  %s5892_s21 = scalar_lea.hbm %s7392_s1, 65536 }
  0x60   : > { %s5887_s19 = scalar_lea.hbm %s6366_s16, 16384  ;;  %p5893_p3 = scmp.lt.u32.totalorder %s6366_s16, %s7392_s1 }
  0x61   : > { %p5888_p12 = scmp.ne.s32.totalorder %s6366_s16, %s5887_s19  ;;  %p5894_p7 = scmp.lt.u32.totalorder %s5892_s21, %s5887_s19 }
  0x62   : > { %s7394_s27 = scalar_select %p6383_p13, 1, 0 }
  0x63   : > { %p5890_p0 = pnand %p6383_p13, %p5888_p12  ;;  %p5895_p9 = por %p5894_p7, %p5893_p3 }
  0x64   : > { %p5896_p11 = scmp.lt.u32.totalorder %s5887_s19, %s6366_s16 }
  0x65   : > { %p5891_p2 = pneg %p5890_p0 }
  0x66   : > { %p5897_p1 = por %p5896_p11, %p5895_p9 }
  0x68   : > { %p5898_p4 = pnand %p5897_p1, %p5891_p2 }
  0x6a   : > { %5901 = shalt.err (!%p5898_p4)
}
  0x6b   : > { %s5902_s23 = scalar_lea.vmem %s6373_s28, 16384  ;;  %s6181_s29 = smov [#allocation6]  }
  0x6c   : > { %p5903_p5 = scmp.ne.s32.totalorder %s6373_s28, %s5902_s23  ;;  %s5907_s30 = sshll.u32 %s6181_s29, 4  ;;  %s5908_s30 = int_to_ptr.vmem [resolvable:$false] %s5907_s30 }
  0x6d   : > { %s5909_s4 = scalar_lea.vmem %s5908_s30, 32768  ;;  %p5910_p8 = scmp.lt.s32.totalorder %s6373_s28, %s5908_s30 }
  0x6e   : > { %p5905_p12 = pnand %p5903_p5, %p6383_p13  ;;  %p5911_p10 = scmp.lt.s32.totalorder %s5909_s4, %s5902_s23 }
  0x70   : > { %p5906_p0 = pneg %p5905_p12  ;;  %p5912_p3 = por %p5911_p10, %p5910_p8 }
  0x72   : > { %p5913_p7 = pnand %p5912_p3, %p5906_p0 }
  0x74   : > { %5916 = shalt.err (!%p5913_p7)
}
  0x75   : > { %s6182_s5 = smov 1024   ;;  %s7395_s19 = smov 16  }
  0x76   : > { %s7396_s21 = smov 256   ;;  %s6183_s1 = smov [#allocation3]  }
  0x77   : > { %5216 = dma.hbm_to_vmem [thread:$0]  (!%p6368_p6), %s6366_s16, 16384, %s6373_s28, %s6377_s25, %s6182_s5, %s7396_s21, %s7395_s19  }
  0x78   : > { %s273_s24 = sshll.u32 %s6183_s1, 4  ;;  %s5917_s23 = scalar_lea.hbm %s7337_s0, 8192  ;;  %s274_s24 = int_to_ptr.vmem [resolvable:$true] %s273_s24 }
  0x79   : > { %p5918_p8 = scmp.ne.s32.totalorder %s7337_s0, %s5917_s23  ;;  %p7397_p10 = scmp.ne.s32.totalorder %s7388_s26, 0 }
  0x7a   : > { %p5924_p11 = scmp.lt.u32.totalorder %s5917_s23, %s7337_s0 }
  0x7b   : > { %p5920_p2 = pnand %p5918_p8, %p7397_p10 }
  0x7d   : > { %p5921_p9 = pneg %p5920_p2 }
  0x7f   : > { %p5926_p1 = pnand %p5924_p11, %p5921_p9 }
  0x81   : > { %5929 = shalt.err (!%p5926_p1)
}
  0x82   : > { %s5930_s28 = scalar_lea.vmem %s274_s24, 8192  ;;  %p5938_p0 = scmp.lt.s32.totalorder %s274_s24, %s274_s24 }
  0x83   : > { %p5931_p4 = scmp.ne.s32.totalorder %s274_s24, %s5930_s28  ;;  %p5939_p3 = scmp.lt.s32.totalorder %s5930_s28, %s5930_s28 }
  0x85   : > { %p5933_p5 = pnand %p5931_p4, %p7397_p10  ;;  %p5940_p7 = por %p5939_p3, %p5938_p0 }
  0x87   : > { %p5934_p12 = pneg %p5933_p5 }
  0x89   : > { %p5941_p6 = pnand %p5940_p7, %p5934_p12 }
  0x8b   : > { %5944 = shalt.err (!%p5941_p6)
}
  0x8c   : > { %s6184_s1 = smov 512   ;;  %s6185_s18 = smov 32  }
  0x8d   : > { %p7398_p8 = scmp.ne.s32.totalorder %s7386_s20, 0  ;;  %s6186_s16 = smov [#allocation14]  }
  0x8e   : > { %s311_s5 = sshll.u32 %s6186_s16, 4  ;;  %s6187_s29 = smov [#allocation15]   ;;  %s312_s5 = int_to_ptr.vmem [resolvable:$true] %s311_s5 }
  0x8f   : > { %5200 = dma.hbm_to_vmem [thread:$0]  (!%p7398_p8), %s7337_s0, 8192, %s274_s24, [#allocation4], %s6184_s1, %s6184_s1, %s6185_s18  }
  0x90   : > { %s322_s23 = sshll.u32 %s6187_s29, 4  ;;  %s5945_s28 = scalar_lea.hbm %s7343_s6, 64  ;;  %s323_s23 = int_to_ptr.vmem [resolvable:$true] %s322_s23 }
  0x91   : > { %p5946_p6 = scmp.ne.s32.totalorder %s7343_s6, %s5945_s28  ;;  %p5952_p11 = scmp.lt.u32.totalorder %s5945_s28, %s7343_s6 }
  0x93   : > { %p5948_p2 = pnand %p5946_p6, %p7397_p10 }
  0x95   : > { %p5949_p9 = pneg %p5948_p2 }
  0x97   : > { %p5954_p1 = pnand %p5952_p11, %p5949_p9 }
  0x99   : > { %5957 = shalt.err (!%p5954_p1)
}
  0x9a   : > { %s5958_s24 = scalar_lea.vmem %s312_s5, 64  ;;  %p5966_p0 = scmp.lt.s32.totalorder %s312_s5, %s312_s5 }
  0x9b   : > { %p5959_p4 = scmp.ne.s32.totalorder %s312_s5, %s5958_s24  ;;  %p5967_p3 = scmp.lt.s32.totalorder %s5958_s24, %s5958_s24 }
  0x9d   : > { %p5961_p5 = pnand %p5959_p4, %p7397_p10  ;;  %p5968_p7 = por %p5967_p3, %p5966_p0 }
  0x9f   : > { %p5962_p12 = pneg %p5961_p5 }
  0xa1   : > { %p5969_p13 = pnand %p5968_p7, %p5962_p12 }
  0xa3   : > { %5972 = shalt.err (!%p5969_p13)
}
  0xa4   : > { %5209 = dma.hbm_to_vmem [thread:$0]  (!%p7398_p8), %s7343_s6, 64, %s312_s5, [#allocation13]  }
  0xa5   : > { %s7399_s13 = sand.u32 1, %s6171_s11   ;;  %s5973_s8 = scalar_lea.hbm %s7344_s7, 32 }
  0xa6   : > { %s4623_s15 = sshll.u32 %s7399_s13, 2  ;;  %p5974_p6 = scmp.ne.s32.totalorder %s7344_s7, %s5973_s8 }
  0xa7   : > { %p5980_p9 = scmp.lt.u32.totalorder %s5973_s8, %s7344_s7 }
  0xa8   : > { %p5976_p13 = pnand %p5974_p6, %p7397_p10 }
  0xaa   : > { %p5977_p2 = pneg %p5976_p13 }
  0xac   : > { %p5982_p11 = pnand %p5980_p9, %p5977_p2 }
  0xae   : > { %5985 = shalt.err (!%p5982_p11)
}
  0xaf   : > { %s5986_s5 = scalar_lea.vmem %s323_s23, 32  ;;  %p5994_p12 = scmp.lt.s32.totalorder %s323_s23, %s323_s23 }
  0xb0   : > { %p5987_p1 = scmp.ne.s32.totalorder %s323_s23, %s5986_s5  ;;  %p5995_p0 = scmp.lt.s32.totalorder %s5986_s5, %s5986_s5 }
  0xb2   : > { %p5989_p4 = pnand %p5987_p1, %p7397_p10  ;;  %p5996_p3 = por %p5995_p0, %p5994_p12 }
  0xb4   : > { %p5990_p5 = pneg %p5989_p4 }
  0xb6   : > { %p5997_p7 = pnand %p5996_p3, %p5990_p5 }
  0xb8   : > { %6000 = shalt.err (!%p5997_p7)
}
  0xb9   : > { %5212 = dma.hbm_to_vmem [thread:$0]  (!%p7398_p8), %s7344_s7, 32, %s323_s23, [#allocation16]  }
  0xba   : > { %s4968_s24 = sshll.u32 %s6175_s12, 6  ;;  %s358_s13 = scalar_lea.vmem [#allocation8], %s4623_s15 }
  0xbb   : > { %s6469_s26 = scalar_lea.hbm %s7339_s2, %s4968_s24  ;;  %s366_s1 = sshll.u32 %s358_s13, 4  ;;  %s367_s1 = int_to_ptr.vmem [resolvable:$true] %s366_s1 }
  0xbc   : > { %s6001_s20 = scalar_lea.hbm %s6469_s26, 64  ;;  %p7400_p6 = scmp.ne.s32.totalorder %s7394_s27, 0 }
  0xbd   : > { %p6002_p10 = scmp.ne.s32.totalorder %s6469_s26, %s6001_s20  ;;  %s6006_s8 = scalar_lea.hbm %s7339_s2, 256 }
  0xbe   : > { %p6007_p8 = scmp.lt.u32.totalorder %s6469_s26, %s7339_s2  ;;  %p6008_p9 = scmp.lt.u32.totalorder %s6006_s8, %s6001_s20 }
  0xbf   : > { %p6004_p13 = pnand %p6002_p10, %p7400_p6  ;;  %p6010_p1 = scmp.lt.u32.totalorder %s6001_s20, %s6469_s26 }
  0xc0   : > { %p6009_p11 = por %p6008_p9, %p6007_p8 }
  0xc1   : > { %p6005_p2 = pneg %p6004_p13 }
  0xc2   : > { %p6011_p4 = por %p6010_p1, %p6009_p11 }
  0xc4   : > { %p6012_p5 = pnand %p6011_p4, %p6005_p2 }
  0xc6   : > { %6015 = shalt.err (!%p6012_p5)
}
  0xc7   : > { %s6016_s15 = scalar_lea.vmem %s367_s1, 64  ;;  %s6188_s29 = smov [#allocation8]  }
  0xc8   : > { %p6017_p12 = scmp.ne.s32.totalorder %s367_s1, %s6016_s15  ;;  %s6021_s30 = sshll.u32 %s6188_s29, 4  ;;  %s6022_s30 = int_to_ptr.vmem [resolvable:$false] %s6021_s30 }
  0xc9   : > { %s6023_s5 = scalar_lea.vmem %s6022_s30, 128  ;;  %p6024_p7 = scmp.lt.s32.totalorder %s367_s1, %s6022_s30 }
  0xca   : > { %p6019_p0 = pnand %p6017_p12, %p7400_p6  ;;  %p6025_p10 = scmp.lt.s32.totalorder %s6023_s5, %s6016_s15 }
  0xcc   : > { %p6020_p3 = pneg %p6019_p0  ;;  %p6026_p13 = por %p6025_p10, %p6024_p7 }
  0xce   : > { %p6027_p8 = pnand %p6026_p13, %p6020_p3 }
  0xd0   : > { %6030 = shalt.err (!%p6027_p8)
}
  0xd1   : > { %p7401_p9 = scmp.ne.s32.totalorder %s7393_s22, 0  ;;  %s4970_s4 = sshll.u32 %s6175_s12, 14 }
  0xd2   : > { %s6493_s10 = scalar_lea.hbm %s7340_s3, %s4970_s4  ;;  %s377_s14 = scalar_lea.vmem [#allocation9], %s6361_s17 }
  0xd3   : > { %5219 = dma.hbm_to_vmem [thread:$0]  (!%p7401_p9), %s6469_s26, 64, %s367_s1, %s6377_s25  }
  0xd4   : > { %s385_s13 = sshll.u32 %s377_s14, 4  ;;  %s7402_s20 = sand.u32 1, %s6175_s12   ;;  %s6496_s13 = int_to_ptr.vmem [resolvable:$true] %s385_s13 }
  0xd5   : > { %s6500_s18 = scalar_lea.sflag [#allocation10], %s7402_s20  ;;  %s6031_s23 = scalar_lea.hbm %s6493_s10, 16384 }
  0xd6   : > { %p6032_p2 = scmp.ne.s32.totalorder %s6493_s10, %s6031_s23  ;;  %s6036_s1 = scalar_lea.hbm %s7340_s3, 65536 }
  0xd7   : > { %p6037_p4 = scmp.lt.u32.totalorder %s6493_s10, %s7340_s3  ;;  %p6038_p5 = scmp.lt.u32.totalorder %s6036_s1, %s6031_s23 }
  0xd8   : > { %p6034_p11 = pnand %p6032_p2, %p7400_p6  ;;  %p6040_p0 = scmp.lt.u32.totalorder %s6031_s23, %s6493_s10 }
  0xd9   : > { %p6039_p12 = por %p6038_p5, %p6037_p4 }
  0xda   : > { %p6035_p1 = pneg %p6034_p11 }
  0xdb   : > { %p6041_p3 = por %p6040_p0, %p6039_p12 }
  0xdd   : > { %p6042_p7 = pnand %p6041_p3, %p6035_p1 }
  0xdf   : > { %6045 = shalt.err (!%p6042_p7)
}
  0xe0   : > { %s6046_s12 = scalar_lea.vmem %s6496_s13, 16384  ;;  %s6189_s17 = smov [#allocation9]  }
  0xe1   : > { %p6047_p10 = scmp.ne.s32.totalorder %s6496_s13, %s6046_s12  ;;  %s6051_s16 = sshll.u32 %s6189_s17, 4  ;;  %s6052_s16 = int_to_ptr.vmem [resolvable:$false] %s6051_s16 }
  0xe2   : > { %s6053_s15 = scalar_lea.vmem %s6052_s16, 32768  ;;  %p6054_p2 = scmp.lt.s32.totalorder %s6496_s13, %s6052_s16 }
  0xe3   : > { %p6049_p13 = pnand %p6047_p10, %p7400_p6  ;;  %p6055_p11 = scmp.lt.s32.totalorder %s6053_s15, %s6046_s12 }
  0xe5   : > { %p6050_p8 = pneg %p6049_p13  ;;  %p6056_p4 = por %p6055_p11, %p6054_p2 }
  0xe7   : > { %p6057_p5 = pnand %p6056_p4, %p6050_p8 }
  0xe9   : > { %6060 = shalt.err (!%p6057_p5)
}
  0xea   : > { %5222 = dma.hbm_to_vmem [thread:$0]  (!%p7401_p9), %s6493_s10, 16384, %s6496_s13, %s6500_s18, %s7396_s21, %s7396_s21, %s7395_s19  }
  0xeb   : > { %s7403_s27 = sld [smem:[#allocation31_spill]] }
  0xf1   : > { %p7404_p6 = scmp.ne.s32.totalorder %s7403_s27, 0 }
  0xf2   : > { %s7405_s29 = sld [smem:[#allocation29_spill]] (!%p7404_p6) }
  0xf3   : > { %397 = sbr.rel (%p7404_p6) target bundleno = 1383 (0x567), region = 52 }
  0xf8   : > { %p7406_p1 = scmp.eq.s32.totalorder (!%p7404_p6), %s7405_s29, 0 }
  0xfa   : > { %6130 = dma.done.wait (%p7406_p1), [#allocation4], 8192   ;;  %p7407_p12 = pmov %p7406_p1 }
  0xfb   : > { %s7408_s30 = sld [smem:[#allocation28_spill]]  ;;  %s7409_s5 = sld [smem:[#allocation30_spill]] }
  0xfc   : > { %6132 = vsyncadd (%p7407_p12), [#allocation4], 4294959104  ;;  %s403_s22 = sand.u32 1, %s7405_s29  }
  0xfd   : > { %s404_s24 = scalar_lea.sflag [#allocation7], %s403_s22 }
 0x101   : > { %s405_s4 = sand.u32 1, %s7408_s30   ;;  %p7410_p0 = scmp.ne.s32.totalorder %s7409_s5, 0 }
 0x102   : > { %s4632_s28 = sshll.u32 %s405_s4, 10 }
 0x103   : > { %s6535_s14 = scalar_lea.vmem [#allocation6], %s4632_s28 }
 0x104   : > { %6134 = dma.done.wait (%p7410_p0), %s404_s24, 16448  }
 0x105   : > { %6136 = vsyncadd (%p7410_p0), %s404_s24, 4294950848  ;;  %s6541_s19 = sshll.u32 %s405_s4, 2  ;;  %s422_s10 = scalar_lea.sflag [#allocation10], %s403_s22 }
 0x106   : > { %s416_s21 = scalar_lea.vmem [#allocation8], %s6541_s19  ;;  %s6544_s13 = scalar_lea.vmem [#allocation9], %s4632_s28 }
 0x107   : > { %6138 = dma.done.wait (%p7410_p0), %s422_s10, 16384  }
 0x108   : > { %6140 = vsyncadd (%p7410_p0), %s422_s10, 4294950912  ;;  %p7411_p9 = pmov %p7406_p1 }
 0x109   : > { %p7412_p3 = pmov %p7406_p1 }
 0x10a   : > { %6142 = dma.done.wait (%p7411_p9), [#allocation10], 64  }
 0x10b   : > { %6144 = vsyncadd (%p7412_p3), [#allocation10], 4294967232  ;;  %p7413_p7 = pmov %p7406_p1 }
 0x10c   : > { %p7414_p10 = pmov %p7406_p1 }
 0x10d   : > { %6146 = dma.done.wait (%p7413_p7), [#allocation13], 8256  }
 0x10e   : > { %6148 = vsyncadd (%p7414_p10), [#allocation13], 4294959040  ;;  %p7415_p13 = pmov %p7406_p1 }
 0x10f   : > { %p7416_p8 = pmov %p7406_p1 }
 0x110   : > { %6150 = dma.done.wait (%p7415_p13), [#allocation16], 32  }
 0x111   : > { %6152 = vsyncadd (%p7416_p8), [#allocation16], 4294967264  ;;  %p7417_p2 = scmp.ne.s32.totalorder %s7405_s29, 0 }
 0x112   : > { %v6190_v0 = vmov (!%p7417_p2), 0.0  }
 0x113   : > { %487 = sbr.rel (%p7417_p2) target bundleno = 307 (0x133), region = 88  ;;  %488 = vst [vmem:[#allocation2] sm:$0xff] (!%p7417_p2), %v6190_v0  ;;  %489 = vst [vmem:[#allocation2 + $0x8] sm:$0xff] (!%p7417_p2), %v6190_v0 }
 0x114   : > { %490 = vst [vmem:[#allocation2 + $0x10] sm:$0xff] (!%p7417_p2), %v6190_v0  ;;  %491 = vst [vmem:[#allocation2 + $0x18] sm:$0xff] (!%p7417_p2), %v6190_v0 }
 0x115   : > { %492 = vst [vmem:[#allocation2 + $0x20] sm:$0xff] (!%p7417_p2), %v6190_v0  ;;  %493 = vst [vmem:[#allocation2 + $0x28] sm:$0xff] (!%p7417_p2), %v6190_v0 }
 0x116   : > { %494 = vst [vmem:[#allocation2 + $0x30] sm:$0xff] (!%p7417_p2), %v6190_v0  ;;  %495 = vst [vmem:[#allocation2 + $0x38] sm:$0xff] (!%p7417_p2), %v6190_v0 }
 0x117   : > { %496 = vst [vmem:[#allocation2 + $0x40] sm:$0xff] (!%p7417_p2), %v6190_v0  ;;  %497 = vst [vmem:[#allocation2 + $0x48] sm:$0xff] (!%p7417_p2), %v6190_v0 }
 0x118   : > { %498 = vst [vmem:[#allocation2 + $0x50] sm:$0xff] (!%p7417_p2), %v6190_v0  ;;  %499 = vst [vmem:[#allocation2 + $0x58] sm:$0xff] (!%p7417_p2), %v6190_v0 }
 0x119   : > { %500 = vst [vmem:[#allocation2 + $0x60] sm:$0xff] (!%p7417_p2), %v6190_v0  ;;  %501 = vst [vmem:[#allocation2 + $0x68] sm:$0xff] (!%p7417_p2), %v6190_v0 }
 0x11a   : > { %502 = vst [vmem:[#allocation2 + $0x70] sm:$0xff] %v6190_v0  ;;  %503 = vst [vmem:[#allocation2 + $0x78] sm:$0xff] %v6190_v0 }
 0x11b   : > { %504 = vst [vmem:[#allocation2 + $0x80] sm:$0xff] %v6190_v0  ;;  %505 = vst [vmem:[#allocation2 + $0x88] sm:$0xff] %v6190_v0 }
 0x11c   : > { %506 = vst [vmem:[#allocation2 + $0x90] sm:$0xff] %v6190_v0  ;;  %507 = vst [vmem:[#allocation2 + $0x98] sm:$0xff] %v6190_v0 }
 0x11d   : > { %508 = vst [vmem:[#allocation2 + $0xa0] sm:$0xff] %v6190_v0  ;;  %509 = vst [vmem:[#allocation2 + $0xa8] sm:$0xff] %v6190_v0 }
 0x11e   : > { %510 = vst [vmem:[#allocation2 + $0xb0] sm:$0xff] %v6190_v0  ;;  %511 = vst [vmem:[#allocation2 + $0xb8] sm:$0xff] %v6190_v0 }
 0x11f   : > { %512 = vst [vmem:[#allocation2 + $0xc0] sm:$0xff] %v6190_v0  ;;  %513 = vst [vmem:[#allocation2 + $0xc8] sm:$0xff] %v6190_v0 }
 0x120   : > { %514 = vst [vmem:[#allocation2 + $0xd0] sm:$0xff] %v6190_v0  ;;  %515 = vst [vmem:[#allocation2 + $0xd8] sm:$0xff] %v6190_v0 }
 0x121   : > { %516 = vst [vmem:[#allocation2 + $0xe0] sm:$0xff] %v6190_v0  ;;  %517 = vst [vmem:[#allocation2 + $0xe8] sm:$0xff] %v6190_v0 }
 0x122   : > { %518 = vst [vmem:[#allocation2 + $0xf0] sm:$0xff] %v6190_v0  ;;  %519 = vst [vmem:[#allocation2 + $0xf8] sm:$0xff] %v6190_v0 }
 0x123   : > { %520 = vst [vmem:[#allocation2 + $0x100] sm:$0xff] %v6190_v0  ;;  %521 = vst [vmem:[#allocation2 + $0x108] sm:$0xff] %v6190_v0 }
 0x124   : > { %522 = vst [vmem:[#allocation2 + $0x110] sm:$0xff] %v6190_v0  ;;  %523 = vst [vmem:[#allocation2 + $0x118] sm:$0xff] %v6190_v0 }
 0x125   : > { %524 = vst [vmem:[#allocation2 + $0x120] sm:$0xff] %v6190_v0  ;;  %525 = vst [vmem:[#allocation2 + $0x128] sm:$0xff] %v6190_v0 }
 0x126   : > { %526 = vst [vmem:[#allocation2 + $0x130] sm:$0xff] %v6190_v0  ;;  %527 = vst [vmem:[#allocation2 + $0x138] sm:$0xff] %v6190_v0 }
 0x127   : > { %528 = vst [vmem:[#allocation2 + $0x140] sm:$0xff] %v6190_v0  ;;  %529 = vst [vmem:[#allocation2 + $0x148] sm:$0xff] %v6190_v0 }
 0x128   : > { %530 = vst [vmem:[#allocation2 + $0x150] sm:$0xff] %v6190_v0  ;;  %531 = vst [vmem:[#allocation2 + $0x158] sm:$0xff] %v6190_v0 }
 0x129   : > { %532 = vst [vmem:[#allocation2 + $0x160] sm:$0xff] %v6190_v0  ;;  %533 = vst [vmem:[#allocation2 + $0x168] sm:$0xff] %v6190_v0 }
 0x12a   : > { %534 = vst [vmem:[#allocation2 + $0x170] sm:$0xff] %v6190_v0  ;;  %535 = vst [vmem:[#allocation2 + $0x178] sm:$0xff] %v6190_v0 }
 0x12b   : > { %536 = vst [vmem:[#allocation2 + $0x180] sm:$0xff] %v6190_v0  ;;  %537 = vst [vmem:[#allocation2 + $0x188] sm:$0xff] %v6190_v0 }
 0x12c   : > { %538 = vst [vmem:[#allocation2 + $0x190] sm:$0xff] %v6190_v0  ;;  %539 = vst [vmem:[#allocation2 + $0x198] sm:$0xff] %v6190_v0 }
 0x12d   : > { %540 = vst [vmem:[#allocation2 + $0x1a0] sm:$0xff] %v6190_v0  ;;  %541 = vst [vmem:[#allocation2 + $0x1a8] sm:$0xff] %v6190_v0 }
 0x12e   : > { %542 = vst [vmem:[#allocation2 + $0x1b0] sm:$0xff] %v6190_v0  ;;  %543 = vst [vmem:[#allocation2 + $0x1b8] sm:$0xff] %v6190_v0 }
 0x12f   : > { %544 = vst [vmem:[#allocation2 + $0x1c0] sm:$0xff] %v6190_v0  ;;  %545 = vst [vmem:[#allocation2 + $0x1c8] sm:$0xff] %v6190_v0 }
 0x130   : > { %546 = vst [vmem:[#allocation2 + $0x1d0] sm:$0xff] %v6190_v0  ;;  %547 = vst [vmem:[#allocation2 + $0x1d8] sm:$0xff] %v6190_v0 }
 0x131   : > { %548 = vst [vmem:[#allocation2 + $0x1e0] sm:$0xff] %v6190_v0  ;;  %549 = vst [vmem:[#allocation2 + $0x1e8] sm:$0xff] %v6190_v0 }
 0x132   : > { %550 = vst [vmem:[#allocation2 + $0x1f0] sm:$0xff] %v6190_v0  ;;  %551 = vst [vmem:[#allocation2 + $0x1f8] sm:$0xff] %v6190_v0 }
 0x133 PF: > { %v5287_v1 = vld [vmem:[%s6535_s14 + $0x4] ss:$16 sps:$4 sm:$0xff]   ;;  %v5289_v2 = vld [vmem:[%s6535_s14 + $0xc] ss:$16 sps:$4 sm:$0xff]   ;;  %v5291_v3 = vld [vmem:[%s6535_s14] ss:$16 sps:$4 sm:$0xff]  }
 0x134   : > { %1438 = vmatprep.subr.bf16.mxu0 %v5287_v1  ;;  %v5292_v4 = vld [vmem:[%s6535_s14 + $0x8] ss:$16 sps:$4 sm:$0xff]   ;;  %1664 = vmatprep.subr.bf16.mxu1 %v5289_v2  ;;  %v5293_v5 = vld [vmem:[%s6535_s14 + $0x24] ss:$16 sps:$4 sm:$0xff]   ;;  %v5295_v6 = vld [vmem:[%s6535_s14 + $0x2c] ss:$16 sps:$4 sm:$0xff]  }
 0x135   : > { %1439 = vmatpush1.bf16.msra.mxu0 %v5291_v3  ;;  %1665 = vmatpush1.bf16.msra.mxu1 %v5292_v4  ;;  %v5297_v7 = vld [vmem:[%s6535_s14 + $0x20] ss:$16 sps:$4 sm:$0xff]   ;;  %v5298_v8 = vld [vmem:[%s6535_s14 + $0x28] ss:$16 sps:$4 sm:$0xff]   ;;  %v5299_v9 = vld [vmem:[%s6535_s14 + $0x44] ss:$16 sps:$4 sm:$0xff]  }
 0x136   : > { %1440 = vmatprep.subr.bf16.mxu0 %v5293_v5  ;;  %1666 = vmatprep.subr.bf16.mxu1 %v5295_v6  ;;  %v5301_v10 = vld [vmem:[%s6535_s14 + $0x4c] ss:$16 sps:$4 sm:$0xff]   ;;  %v5303_v11 = vld [vmem:[%s6535_s14 + $0x40] ss:$16 sps:$4 sm:$0xff]   ;;  %v5304_v12 = vld [vmem:[%s6535_s14 + $0x48] ss:$16 sps:$4 sm:$0xff]  }
 0x137   : > { %v5305_v13 = vld [vmem:[%s6535_s14 + $0x64] ss:$16 sps:$4 sm:$0xff]   ;;  %v5307_v14 = vld [vmem:[%s6535_s14 + $0x6c] ss:$16 sps:$4 sm:$0xff]   ;;  %v5309_v15 = vld [vmem:[%s6535_s14 + $0x60] ss:$16 sps:$4 sm:$0xff]  }
 0x138   : > { %v5310_v16 = vld [vmem:[%s6535_s14 + $0x68] ss:$16 sps:$4 sm:$0xff]   ;;  %v5311_v17 = vld [vmem:[%s6535_s14 + $0x84] ss:$16 sps:$4 sm:$0xff]   ;;  %v5313_v18 = vld [vmem:[%s6535_s14 + $0x8c] ss:$16 sps:$4 sm:$0xff]  }
 0x139   : > { %1441 = vmatpush1.bf16.msra.mxu0 %v5297_v7  ;;  %1667 = vmatpush1.bf16.msra.mxu1 %v5298_v8  ;;  %v5315_v19 = vld [vmem:[%s6535_s14 + $0x80] ss:$16 sps:$4 sm:$0xff]   ;;  %v5316_v20 = vld [vmem:[%s6535_s14 + $0x88] ss:$16 sps:$4 sm:$0xff]   ;;  %v5317_v21 = vld [vmem:[%s6535_s14 + $0xa4] ss:$16 sps:$4 sm:$0xff]  }
 0x13a   : > { %1442 = vmatprep.subr.bf16.mxu0 %v5299_v9  ;;  %1668 = vmatprep.subr.bf16.mxu1 %v5301_v10  ;;  %v5319_v22 = vld [vmem:[%s6535_s14 + $0xac] ss:$16 sps:$4 sm:$0xff]   ;;  %v5321_v23 = vld [vmem:[%s6535_s14 + $0xa0] ss:$16 sps:$4 sm:$0xff]   ;;  %v5322_v24 = vld [vmem:[%s6535_s14 + $0xa8] ss:$16 sps:$4 sm:$0xff]  }
 0x13b   : > { %v5323_v25 = vld [vmem:[%s6535_s14 + $0xc4] ss:$16 sps:$4 sm:$0xff]   ;;  %v5325_v26 = vld [vmem:[%s6535_s14 + $0xcc] ss:$16 sps:$4 sm:$0xff]   ;;  %v5327_v27 = vld [vmem:[%s6535_s14 + $0xc0] ss:$16 sps:$4 sm:$0xff]  }
 0x13c   : > { %v5328_v28 = vld [vmem:[%s6535_s14 + $0xc8] ss:$16 sps:$4 sm:$0xff]   ;;  %v5329_v29 = vld [vmem:[%s6535_s14 + $0xe4] ss:$16 sps:$4 sm:$0xff]   ;;  %v5331_v30 = vld [vmem:[%s6535_s14 + $0xec] ss:$16 sps:$4 sm:$0xff]  }
 0x13d   : > { %1443 = vmatpush1.bf16.msra.mxu0 %v5303_v11  ;;  %1669 = vmatpush1.bf16.msra.mxu1 %v5304_v12  ;;  %v5333_v31 = vld [vmem:[%s6535_s14 + $0xe0] ss:$16 sps:$4 sm:$0xff]   ;;  %v5334_v32 = vld [vmem:[%s6535_s14 + $0xe8] ss:$16 sps:$4 sm:$0xff]   ;;  %v5335_v33 = vld [vmem:[%s6535_s14 + $0x104] ss:$16 sps:$4 sm:$0xff]  }
 0x13e   : > { %1444 = vmatprep.subr.bf16.mxu0 %v5305_v13  ;;  %1670 = vmatprep.subr.bf16.mxu1 %v5307_v14  ;;  %v5337_v34 = vld [vmem:[%s6535_s14 + $0x10c] ss:$16 sps:$4 sm:$0xff]   ;;  %v5339_v35 = vld [vmem:[%s6535_s14 + $0x100] ss:$16 sps:$4 sm:$0xff]   ;;  %v5340_v36 = vld [vmem:[%s6535_s14 + $0x108] ss:$16 sps:$4 sm:$0xff]  }
 0x13f   : > { %v5341_v37 = vld [vmem:[%s6535_s14 + $0x124] ss:$16 sps:$4 sm:$0xff]   ;;  %v5343_v38 = vld [vmem:[%s6535_s14 + $0x12c] ss:$16 sps:$4 sm:$0xff]   ;;  %v5345_v39 = vld [vmem:[%s6535_s14 + $0x120] ss:$16 sps:$4 sm:$0xff]  }
 0x140   : > { %v5346_v40 = vld [vmem:[%s6535_s14 + $0x128] ss:$16 sps:$4 sm:$0xff]   ;;  %v5347_v41 = vld [vmem:[%s6535_s14 + $0x144] ss:$16 sps:$4 sm:$0xff]   ;;  %v5349_v42 = vld [vmem:[%s6535_s14 + $0x14c] ss:$16 sps:$4 sm:$0xff]  }
 0x141   : > { %1445 = vmatpush1.bf16.msra.mxu0 %v5309_v15  ;;  %1671 = vmatpush1.bf16.msra.mxu1 %v5310_v16  ;;  %v5351_v43 = vld [vmem:[%s6535_s14 + $0x140] ss:$16 sps:$4 sm:$0xff]   ;;  %v5352_v44 = vld [vmem:[%s6535_s14 + $0x148] ss:$16 sps:$4 sm:$0xff]   ;;  %v5353_v45 = vld [vmem:[%s6535_s14 + $0x164] ss:$16 sps:$4 sm:$0xff]  }
 0x142   : > { %1446 = vmatprep.subr.bf16.mxu0 %v5311_v17  ;;  %1672 = vmatprep.subr.bf16.mxu1 %v5313_v18  ;;  %v5355_v46 = vld [vmem:[%s6535_s14 + $0x16c] ss:$16 sps:$4 sm:$0xff]   ;;  %v5357_v48 = vld [vmem:[%s6535_s14 + $0x160] ss:$16 sps:$4 sm:$0xff]   ;;  %v5358_v49 = vld [vmem:[%s6535_s14 + $0x168] ss:$16 sps:$4 sm:$0xff]  }
 0x143   : > { %v553_v47 = vld [vmem:[#allocation3 + $0x8] sm:$0xff]  ;;  %v5359_v51 = vld [vmem:[%s6535_s14 + $0x184] ss:$16 sps:$4 sm:$0xff]   ;;  %v5363_v54 = vld [vmem:[%s6535_s14 + $0x180] ss:$16 sps:$4 sm:$0xff]   ;;  %s7418_s20 = sld [smem:[#allocation29_spill]] }
 0x144   : > { %v557_v50 = vld [vmem:[#allocation3 + $0x28] sm:$0xff]  ;;  %v5365_v56 = vld [vmem:[%s6535_s14 + $0x1a4] ss:$16 sps:$4 sm:$0xff]   ;;  %v5369_v58 = vld [vmem:[%s6535_s14 + $0x1a0] ss:$16 sps:$4 sm:$0xff]  }
 0x145   : > { %1447 = vmatpush1.bf16.msra.mxu0 %v5315_v19  ;;  %1673 = vmatpush1.bf16.msra.mxu1 %v5316_v20  ;;  %v617_v52 = vpack.c.bf16 %v557_v50, %v553_v47  ;;  %v5361_v53 = vld [vmem:[%s6535_s14 + $0x18c] ss:$16 sps:$4 sm:$0xff]   ;;  %v5364_v55 = vld [vmem:[%s6535_s14 + $0x188] ss:$16 sps:$4 sm:$0xff]   ;;  %v5371_v60 = vld [vmem:[%s6535_s14 + $0x1c4] ss:$16 sps:$4 sm:$0xff]  }
 0x146   : > { %1448 = vmatprep.subr.bf16.mxu0 %v5317_v21  ;;  %1674 = vmatprep.subr.bf16.mxu1 %v5319_v22  ;;  %v5367_v57 = vld [vmem:[%s6535_s14 + $0x1ac] ss:$16 sps:$4 sm:$0xff]   ;;  %v5370_v59 = vld [vmem:[%s6535_s14 + $0x1a8] ss:$16 sps:$4 sm:$0xff]   ;;  %v5375_v62 = vld [vmem:[%s6535_s14 + $0x1c0] ss:$16 sps:$4 sm:$0xff]  }
 0x147   : > { %1470 = vmatprep.mubr.bf16.mxu0 %v617_v52  ;;  %1696 = vmatprep.mubr.bf16.mxu1 %v617_v52  ;;  %v5373_v61 = vld [vmem:[%s6535_s14 + $0x1cc] ss:$16 sps:$4 sm:$0xff]   ;;  %v5376_v63 = vld [vmem:[%s6535_s14 + $0x1c8] ss:$16 sps:$4 sm:$0xff]   ;;  %v5377_v0 = vld [vmem:[%s6535_s14 + $0x1e4] ss:$16 sps:$4 sm:$0xff]  }
 0x148   : > { %v5379_v1 = vld [vmem:[%s6535_s14 + $0x1ec] ss:$16 sps:$4 sm:$0xff]   ;;  %v5381_v2 = vld [vmem:[%s6535_s14 + $0x1e0] ss:$16 sps:$4 sm:$0xff]   ;;  %v5382_v3 = vld [vmem:[%s6535_s14 + $0x1e8] ss:$16 sps:$4 sm:$0xff]  }
 0x149   : > { %1449 = vmatpush1.bf16.msra.mxu0 %v5321_v23  ;;  %1675 = vmatpush1.bf16.msra.mxu1 %v5322_v24  ;;  %v552_v4 = vld [vmem:[#allocation3] sm:$0xff]  ;;  %v5388_v7 = vld [vmem:[%s6535_s14 + $0x20c] ss:$16 sps:$4 sm:$0xff]   ;;  %v5386_v10 = vld [vmem:[%s6535_s14 + $0x208] ss:$16 sps:$4 sm:$0xff]   ;;  %p4896_p11 = scmp.ne.s32.totalorder %s7418_s20, 3 }
 0x14a   : > { %1450 = vmatprep.subr.bf16.mxu0 %v5323_v25  ;;  %1676 = vmatprep.subr.bf16.mxu1 %v5325_v26  ;;  %v556_v5 = vld [vmem:[#allocation3 + $0x20] sm:$0xff]  ;;  %v561_v11 = vld [vmem:[#allocation3 + $0x48] sm:$0xff] }
 0x14b   : > { %v5385_v6 = vld [vmem:[%s6535_s14 + $0x204] ss:$16 sps:$4 sm:$0xff]   ;;  %v5383_v8 = vld [vmem:[%s6535_s14 + $0x200] ss:$16 sps:$4 sm:$0xff]   ;;  %v616_v9 = vpack.c.bf16 %v556_v5, %v552_v4  ;;  %v565_v12 = vld [vmem:[#allocation3 + $0x68] sm:$0xff] }
 0x14c   : > { %v5391_v13 = vld [vmem:[%s6535_s14 + $0x224] ss:$16 sps:$4 sm:$0xff]   ;;  %v5394_v14 = vld [vmem:[%s6535_s14 + $0x22c] ss:$16 sps:$4 sm:$0xff]   ;;  %v5389_v15 = vld [vmem:[%s6535_s14 + $0x220] ss:$16 sps:$4 sm:$0xff]   ;;  %v621_v16 = vpack.c.bf16 %v565_v12, %v561_v11 }
 0x14d   : > { %1451 = vmatpush1.bf16.msra.mxu0 %v5327_v27  ;;  %1677 = vmatpush1.bf16.msra.mxu1 %v5328_v28  ;;  %v5392_v17 = vld [vmem:[%s6535_s14 + $0x228] ss:$16 sps:$4 sm:$0xff]   ;;  %v560_v18 = vld [vmem:[#allocation3 + $0x40] sm:$0xff]  ;;  %v5400_v21 = vld [vmem:[%s6535_s14 + $0x24c] ss:$16 sps:$4 sm:$0xff]  }
 0x14e   : > { %1452 = vmatprep.subr.bf16.mxu0 %v5329_v29  ;;  %1678 = vmatprep.subr.bf16.mxu1 %v5331_v30  ;;  %v564_v19 = vld [vmem:[#allocation3 + $0x60] sm:$0xff]  ;;  %v5398_v23 = vld [vmem:[%s6535_s14 + $0x248] ss:$16 sps:$4 sm:$0xff]   ;;  %v5406_v28 = vld [vmem:[%s6535_s14 + $0x26c] ss:$16 sps:$4 sm:$0xff]  }
 0x14f   : > { %v5397_v20 = vld [vmem:[%s6535_s14 + $0x244] ss:$16 sps:$4 sm:$0xff]   ;;  %v5395_v22 = vld [vmem:[%s6535_s14 + $0x240] ss:$16 sps:$4 sm:$0xff]   ;;  %v620_v24 = vpack.c.bf16 %v564_v19, %v560_v18  ;;  %v569_v25 = vld [vmem:[#allocation3 + $0x88] sm:$0xff] }
 0x150   : > { %v573_v26 = vld [vmem:[#allocation3 + $0xa8] sm:$0xff]  ;;  %v5403_v27 = vld [vmem:[%s6535_s14 + $0x264] ss:$16 sps:$4 sm:$0xff]   ;;  %v5401_v30 = vld [vmem:[%s6535_s14 + $0x260] ss:$16 sps:$4 sm:$0xff]  }
 0x151   : > { %1453 = vmatpush1.bf16.msra.mxu0 %v5333_v31  ;;  %1679 = vmatpush1.bf16.msra.mxu1 %v5334_v32  ;;  %v625_v29 = vpack.c.bf16 %v573_v26, %v569_v25  ;;  %v5404_v31 = vld [vmem:[%s6535_s14 + $0x268] ss:$16 sps:$4 sm:$0xff]   ;;  %v568_v32 = vld [vmem:[#allocation3 + $0x80] sm:$0xff] }
 0x152   : > { %1454 = vmatprep.subr.bf16.mxu0 %v5335_v33  ;;  %1680 = vmatprep.subr.bf16.mxu1 %v5337_v34  ;;  %v572_v33 = vld [vmem:[#allocation3 + $0xa0] sm:$0xff]  ;;  %v585_v52 = vld [vmem:[#allocation3 + $0x108] sm:$0xff] }
 0x153   : > { %v5409_v34 = vld [vmem:[%s6535_s14 + $0x284] ss:$16 sps:$4 sm:$0xff]   ;;  %v5419_v50 = vld [vmem:[%s6535_s14 + $0x2c0] ss:$16 sps:$4 sm:$0xff]   ;;  %v5434_v4 = vld [vmem:[%s6535_s14 + $0x308] ss:$16 sps:$4 sm:$0xff]  }
 0x154   : > { %v580_v47 = vld [vmem:[#allocation3 + $0xe0] sm:$0xff]  ;;  %v5446_v18 = vld [vmem:[%s6535_s14 + $0x348] ss:$16 sps:$4 sm:$0xff]  }
 0x155   : > { %1455 = vmatpush1.bf16.msra.mxu0 %v5339_v35  ;;  %1681 = vmatpush1.bf16.msra.mxu1 %v5340_v36  ;;  %v5412_v35 = vld [vmem:[%s6535_s14 + $0x28c] ss:$16 sps:$4 sm:$0xff]   ;;  %v5407_v36 = vld [vmem:[%s6535_s14 + $0x280] ss:$16 sps:$4 sm:$0xff]   ;;  %v5439_v5 = vld [vmem:[%s6535_s14 + $0x324] ss:$16 sps:$4 sm:$0xff]  }
 0x156   : > { %1456 = vmatprep.subr.bf16.mxu0 %v5341_v37  ;;  %1682 = vmatprep.subr.bf16.mxu1 %v5343_v38  ;;  %v5410_v37 = vld [vmem:[%s6535_s14 + $0x288] ss:$16 sps:$4 sm:$0xff]   ;;  %v624_v38 = vpack.c.bf16 %v572_v33, %v568_v32  ;;  %v596_v11 = vld [vmem:[#allocation3 + $0x160] sm:$0xff] }
 0x157   : > { %v5445_v12 = vld [vmem:[%s6535_s14 + $0x344] ss:$16 sps:$4 sm:$0xff]   ;;  %v613_v32 = vld [vmem:[#allocation3 + $0x1e8] sm:$0xff] }
 0x158   : > { %v5451_v19 = vld [vmem:[%s6535_s14 + $0x364] ss:$16 sps:$4 sm:$0xff]  }
 0x159   : > { %1457 = vmatpush1.bf16.msra.mxu0 %v5345_v39  ;;  %1683 = vmatpush1.bf16.msra.mxu1 %v5346_v40  ;;  %v577_v39 = vld [vmem:[#allocation3 + $0xc8] sm:$0xff]  ;;  %v604_v25 = vld [vmem:[#allocation3 + $0x1a0] sm:$0xff] }
 0x15a   : > { %1458 = vmatprep.subr.bf16.mxu0 %v5347_v41  ;;  %1684 = vmatprep.subr.bf16.mxu1 %v5349_v42  ;;  %v581_v40 = vld [vmem:[#allocation3 + $0xe8] sm:$0xff]  ;;  %v5415_v41 = vld [vmem:[%s6535_s14 + $0x2a4] ss:$16 sps:$4 sm:$0xff]  }
 0x15b   : > { %v5418_v42 = vld [vmem:[%s6535_s14 + $0x2ac] ss:$16 sps:$4 sm:$0xff]   ;;  %v5457_v26 = vld [vmem:[%s6535_s14 + $0x384] ss:$16 sps:$4 sm:$0xff]  }
 0x15c   : > { %v5463_v33 = vld [vmem:[%s6535_s14 + $0x3a4] ss:$16 sps:$4 sm:$0xff]  }
 0x15d   : > { %1459 = vmatpush1.bf16.msra.mxu0 %v5351_v43  ;;  %1685 = vmatpush1.bf16.msra.mxu1 %v5352_v44  ;;  %v5413_v43 = vld [vmem:[%s6535_s14 + $0x2a0] ss:$16 sps:$4 sm:$0xff]   ;;  %v629_v44 = vpack.c.bf16 %v581_v40, %v577_v39  ;;  %v5469_v40 = vld [vmem:[%s6535_s14 + $0x3c4] ss:$16 sps:$4 sm:$0xff]  }
 0x15e   : > { %1460 = vmatprep.subr.bf16.mxu0 %v5353_v45  ;;  %1686 = vmatprep.subr.bf16.mxu1 %v5355_v46  ;;  %v5416_v45 = vld [vmem:[%s6535_s14 + $0x2a8] ss:$16 sps:$4 sm:$0xff]   ;;  %v576_v46 = vld [vmem:[#allocation3 + $0xc0] sm:$0xff] }
 0x15f   : > { %v612_v39 = vld [vmem:[#allocation3 + $0x1e0] sm:$0xff] }
 0x161   : > { %1461 = vmatpush1.bf16.msra.mxu0 %v5357_v48  ;;  %1687 = vmatpush1.bf16.msra.mxu1 %v5358_v49  ;;  %v5421_v48 = vld [vmem:[%s6535_s14 + $0x2c4] ss:$16 sps:$4 sm:$0xff]   ;;  %v5424_v49 = vld [vmem:[%s6535_s14 + $0x2cc] ss:$16 sps:$4 sm:$0xff]  }
 0x162   : > { %1462 = vmatprep.subr.bf16.mxu0 %v5359_v51  ;;  %1688 = vmatprep.subr.bf16.mxu1 %v5361_v53  ;;  %v628_v51 = vpack.c.bf16 %v580_v47, %v576_v46  ;;  %v589_v53 = vld [vmem:[#allocation3 + $0x128] sm:$0xff]  ;;  %v559_v46 = vld [vmem:[#allocation3 + $0x38] sm:$0xff]  ;;  %v5475_v47 = vld [vmem:[%s6535_s14 + $0x3e4] ss:$16 sps:$4 sm:$0xff]  }
 0x165   : > { %1463 = vmatpush1.bf16.msra.mxu0 %v5363_v54  ;;  %1689 = vmatpush1.bf16.msra.mxu1 %v5364_v55  ;;  %v5422_v54 = vld [vmem:[%s6535_s14 + $0x2c8] ss:$16 sps:$4 sm:$0xff]   ;;  %v5427_v55 = vld [vmem:[%s6535_s14 + $0x2e4] ss:$16 sps:$4 sm:$0xff]  }
 0x166   : > { %1464 = vmatprep.subr.bf16.mxu0 %v5365_v56  ;;  %1690 = vmatprep.subr.bf16.mxu1 %v5367_v57  ;;  %v5430_v56 = vld [vmem:[%s6535_s14 + $0x2ec] ss:$16 sps:$4 sm:$0xff]   ;;  %v5425_v57 = vld [vmem:[%s6535_s14 + $0x2e0] ss:$16 sps:$4 sm:$0xff]  }
 0x169   : > { %1465 = vmatpush1.bf16.msra.mxu0 %v5369_v58  ;;  %1691 = vmatpush1.bf16.msra.mxu1 %v5370_v59  ;;  %v5428_v58 = vld [vmem:[%s6535_s14 + $0x2e8] ss:$16 sps:$4 sm:$0xff]   ;;  %v633_v59 = vpack.c.bf16 %v589_v53, %v585_v52  ;;  %v554_v52 = vld [vmem:[#allocation3 + $0x10] sm:$0xff] }
 0x16a   : > { %1466 = vmatprep.subr.bf16.mxu0 %v5371_v60  ;;  %1692 = vmatprep.subr.bf16.mxu1 %v5373_v61  ;;  %v584_v60 = vld [vmem:[#allocation3 + $0x100] sm:$0xff]  ;;  %v558_v53 = vld [vmem:[#allocation3 + $0x30] sm:$0xff] }
 0x16b   : > { %v588_v61 = vld [vmem:[#allocation3 + $0x120] sm:$0xff] }
 0x16d   : > { %1467 = vmatpush1.bf16.msra.mxu0 %v5375_v62  ;;  %1693 = vmatpush1.bf16.msra.mxu1 %v5376_v63  ;;  %v5433_v62 = vld [vmem:[%s6535_s14 + $0x304] ss:$16 sps:$4 sm:$0xff]   ;;  %v5436_v63 = vld [vmem:[%s6535_s14 + $0x30c] ss:$16 sps:$4 sm:$0xff]  }
 0x16e   : > { %1468 = vmatprep.subr.bf16.mxu0 %v5377_v0  ;;  %1694 = vmatprep.subr.bf16.mxu1 %v5379_v1  ;;  %v632_v0 = vpack.c.bf16 %v588_v61, %v584_v60  ;;  %v593_v1 = vld [vmem:[#allocation3 + $0x148] sm:$0xff]  ;;  %v5482_v61 = vld [vmem:[%s6544_s13 + $0x8] ss:$16 sps:$4 sm:$0xff]  }
 0x16f   : > { %v5479_v60 = vld [vmem:[%s6544_s13] ss:$16 sps:$4 sm:$0xff]  }
 0x171   : > { %1469 = vmatpush1.bf16.msra.mxu0 %v5381_v2  ;;  %1695 = vmatpush1.bf16.msra.mxu1 %v5382_v3  ;;  %v597_v2 = vld [vmem:[#allocation3 + $0x168] sm:$0xff]  ;;  %v5431_v3 = vld [vmem:[%s6535_s14 + $0x300] ss:$16 sps:$4 sm:$0xff]  }
 0x172   : > { %1551 = vmatprep.subr.bf16.mxu0 %v5385_v6  ;;  %1777 = vmatprep.subr.bf16.mxu1 %v5388_v7  ;;  %v5442_v6 = vld [vmem:[%s6535_s14 + $0x32c] ss:$16 sps:$4 sm:$0xff]   ;;  %v637_v7 = vpack.c.bf16 %v597_v2, %v593_v1  ;;  %v5490_v1 = vld [vmem:[%s6544_s13 + $0x2c] ss:$16 sps:$4 sm:$0xff]  }
 0x173   : > { %v571_v2 = vld [vmem:[#allocation3 + $0x98] sm:$0xff] }
 0x174   : > { %1471 = vmatmul.mubr.bf16.vlgmr.msra.gmra.mrb[0].mxu0 %v616_v9  ;;  %1697 = vmatmul.mubr.bf16.vlgmr.msra.gmra.mrb[0].mxu1 %v616_v9  ;;  %v5440_v9 = vld [vmem:[%s6535_s14 + $0x328] ss:$16 sps:$4 sm:$0xff]  }
 0x175   : > { %1552 = vmatpush1.bf16.msra.mxu0 %v5383_v8  ;;  %1778 = vmatpush1.bf16.msra.mxu1 %v5386_v10  ;;  %v5437_v8 = vld [vmem:[%s6535_s14 + $0x320] ss:$16 sps:$4 sm:$0xff]  }
 0x176   : > { %1553 = vmatprep.subr.bf16.mxu0 %v5391_v13  ;;  %1779 = vmatprep.subr.bf16.mxu1 %v5394_v14  ;;  %v592_v10 = vld [vmem:[#allocation3 + $0x140] sm:$0xff]  ;;  %v5448_v13 = vld [vmem:[%s6535_s14 + $0x34c] ss:$16 sps:$4 sm:$0xff]  }
 0x177   : > { %1480 = vmatprep.mubr.bf16.mxu0 %v621_v16  ;;  %1706 = vmatprep.mubr.bf16.mxu1 %v621_v16  ;;  %v636_v14 = vpack.c.bf16 %v596_v11, %v592_v10  ;;  %v605_v16 = vld [vmem:[#allocation3 + $0x1a8] sm:$0xff]  ;;  %v5494_v11 = vld [vmem:[%s6544_s13 + $0x48] ss:$16 sps:$4 sm:$0xff]  }
 0x178   : > { %v5491_v10 = vld [vmem:[%s6544_s13 + $0x40] ss:$16 sps:$4 sm:$0xff]  }
 0x179   : > { %1554 = vmatpush1.bf16.msra.mxu0 %v5389_v15  ;;  %1780 = vmatpush1.bf16.msra.mxu1 %v5392_v17  ;;  %v601_v15 = vld [vmem:[#allocation3 + $0x188] sm:$0xff]  ;;  %v5443_v17 = vld [vmem:[%s6535_s14 + $0x340] ss:$16 sps:$4 sm:$0xff]  }
 0x17a   : > { %1555 = vmatprep.subr.bf16.mxu0 %v5397_v20  ;;  %1781 = vmatprep.subr.bf16.mxu1 %v5400_v21  ;;  %v5454_v20 = vld [vmem:[%s6535_s14 + $0x36c] ss:$16 sps:$4 sm:$0xff]   ;;  %v5449_v21 = vld [vmem:[%s6535_s14 + $0x360] ss:$16 sps:$4 sm:$0xff]  }
 0x17c   : > { %1481 = vmatmul.mubr.bf16.gmra.mrb[4].mxu0 %v620_v24  ;;  %1707 = vmatmul.mubr.bf16.gmra.mrb[4].mxu1 %v620_v24  ;;  %v600_v24 = vld [vmem:[#allocation3 + $0x180] sm:$0xff] }
 0x17d   : > { %1556 = vmatpush1.bf16.msra.mxu0 %v5395_v22  ;;  %1782 = vmatpush1.bf16.msra.mxu1 %v5398_v23  ;;  %v5452_v22 = vld [vmem:[%s6535_s14 + $0x368] ss:$16 sps:$4 sm:$0xff]   ;;  %v641_v23 = vpack.c.bf16 %v605_v16, %v601_v15  ;;  %v5502_v15 = vld [vmem:[%s6544_s13 + $0x6c] ss:$16 sps:$4 sm:$0xff]  }
 0x17e   : > { %1557 = vmatprep.subr.bf16.mxu0 %v5403_v27  ;;  %1783 = vmatprep.subr.bf16.mxu1 %v5406_v28  ;;  %v5460_v27 = vld [vmem:[%s6535_s14 + $0x38c] ss:$16 sps:$4 sm:$0xff]   ;;  %v5455_v28 = vld [vmem:[%s6535_s14 + $0x380] ss:$16 sps:$4 sm:$0xff]  }
 0x17f   : > { %1490 = vmatprep.mubr.bf16.mxu0 %v625_v29  ;;  %1716 = vmatprep.mubr.bf16.mxu1 %v625_v29  ;;  %v5458_v29 = vld [vmem:[%s6535_s14 + $0x388] ss:$16 sps:$4 sm:$0xff]  }
 0x180   : > { %v579_v16 = vld [vmem:[#allocation3 + $0xd8] sm:$0xff] }
 0x181   : > { %1558 = vmatpush1.bf16.msra.mxu0 %v5401_v30  ;;  %1784 = vmatpush1.bf16.msra.mxu1 %v5404_v31  ;;  %v640_v30 = vpack.c.bf16 %v604_v25, %v600_v24  ;;  %v609_v31 = vld [vmem:[#allocation3 + $0x1c8] sm:$0xff]  ;;  %v5506_v24 = vld [vmem:[%s6544_s13 + $0x88] ss:$16 sps:$4 sm:$0xff]  }
 0x182   : > { %1559 = vmatprep.subr.bf16.mxu0 %v5409_v34  ;;  %1785 = vmatprep.subr.bf16.mxu1 %v5412_v35  ;;  %v5466_v34 = vld [vmem:[%s6535_s14 + $0x3ac] ss:$16 sps:$4 sm:$0xff]   ;;  %v5461_v35 = vld [vmem:[%s6535_s14 + $0x3a0] ss:$16 sps:$4 sm:$0xff]  }
 0x184   : > { %1491 = vmatmul.mubr.bf16.gmra.mrb[8].mxu0 %v624_v38  ;;  %1717 = vmatmul.mubr.bf16.gmra.mrb[8].mxu1 %v624_v38  ;;  %v608_v38 = vld [vmem:[#allocation3 + $0x1c0] sm:$0xff] }
 0x185   : > { %1560 = vmatpush1.bf16.msra.mxu0 %v5407_v36  ;;  %1786 = vmatpush1.bf16.msra.mxu1 %v5410_v37  ;;  %v5464_v36 = vld [vmem:[%s6535_s14 + $0x3a8] ss:$16 sps:$4 sm:$0xff]   ;;  %v645_v37 = vpack.c.bf16 %v613_v32, %v609_v31 }
 0x186   : > { %1561 = vmatprep.subr.bf16.mxu0 %v5415_v41  ;;  %1787 = vmatprep.subr.bf16.mxu1 %v5418_v42  ;;  %v5472_v41 = vld [vmem:[%s6535_s14 + $0x3cc] ss:$16 sps:$4 sm:$0xff]   ;;  %v5467_v42 = vld [vmem:[%s6535_s14 + $0x3c0] ss:$16 sps:$4 sm:$0xff]   ;;  %v5509_v32 = vld [vmem:[%s6544_s13 + $0xa0] ss:$16 sps:$4 sm:$0xff]  }
 0x187   : > { %1500 = vmatprep.mubr.bf16.mxu0 %v629_v44  ;;  %1726 = vmatprep.mubr.bf16.mxu1 %v629_v44  ;;  %v644_v44 = vpack.c.bf16 %v612_v39, %v608_v38  ;;  %v591_v31 = vld [vmem:[#allocation3 + $0x138] sm:$0xff]  ;;  %v5518_v38 = vld [vmem:[%s6544_s13 + $0xc8] ss:$16 sps:$4 sm:$0xff]  }
 0x189   : > { %1562 = vmatpush1.bf16.msra.mxu0 %v5413_v43  ;;  %1788 = vmatpush1.bf16.msra.mxu1 %v5416_v45  ;;  %v5470_v43 = vld [vmem:[%s6535_s14 + $0x3c8] ss:$16 sps:$4 sm:$0xff]  }
 0x18a   : > { %1563 = vmatprep.subr.bf16.mxu0 %v5421_v48  ;;  %1789 = vmatprep.subr.bf16.mxu1 %v5424_v49  ;;  %v555_v45 = vld [vmem:[#allocation3 + $0x18] sm:$0xff]  ;;  %v5473_v49 = vld [vmem:[%s6535_s14 + $0x3e0] ss:$16 sps:$4 sm:$0xff]  }
 0x18b   : > { %v5478_v48 = vld [vmem:[%s6535_s14 + $0x3ec] ss:$16 sps:$4 sm:$0xff]  }
 0x18c   : > { %1501 = vmatmul.mubr.bf16.gmra.mrb[12].mxu0 %v628_v51  ;;  %1727 = vmatmul.mubr.bf16.gmra.mrb[12].mxu1 %v628_v51  ;;  %v619_v51 = vpack.c.bf16 %v559_v46, %v555_v45  ;;  %v599_v45 = vld [vmem:[#allocation3 + $0x178] sm:$0xff] }
 0x18d   : > { %1564 = vmatpush1.bf16.msra.mxu0 %v5419_v50  ;;  %1790 = vmatpush1.bf16.msra.mxu1 %v5422_v54  ;;  %v5476_v50 = vld [vmem:[%s6535_s14 + $0x3e8] ss:$16 sps:$4 sm:$0xff]  }
 0x18e   : > { %1565 = vmatprep.subr.bf16.mxu0 %v5427_v55  ;;  %1791 = vmatprep.subr.bf16.mxu1 %v5430_v56  ;;  %v563_v54 = vld [vmem:[#allocation3 + $0x58] sm:$0xff] }
 0x18f   : > { %1510 = vmatprep.mubr.bf16.mxu0 %v633_v59  ;;  %1736 = vmatprep.mubr.bf16.mxu1 %v633_v59  ;;  %v567_v55 = vld [vmem:[#allocation3 + $0x78] sm:$0xff] }
 0x190   : > { %v5481_v56 = vld [vmem:[%s6544_s13 + $0x4] ss:$16 sps:$4 sm:$0xff]   ;;  %v623_v59 = vpack.c.bf16 %v567_v55, %v563_v54  ;;  %v5521_v46 = vld [vmem:[%s6544_s13 + $0xe0] ss:$16 sps:$4 sm:$0xff]   ;;  %v5538_v55 = vld [vmem:[%s6544_s13 + $0x12c] ss:$16 sps:$4 sm:$0xff]  }
 0x191   : > { %1566 = vmatpush1.bf16.msra.mxu0 %v5425_v57  ;;  %1792 = vmatpush1.bf16.msra.mxu1 %v5428_v58  ;;  %v5484_v57 = vld [vmem:[%s6544_s13 + $0xc] ss:$16 sps:$4 sm:$0xff]   ;;  %v618_v58 = vpack.c.bf16 %v558_v53, %v554_v52  ;;  %v5530_v52 = vld [vmem:[%s6544_s13 + $0x108] ss:$16 sps:$4 sm:$0xff]   ;;  %v5535_v54 = vld [vmem:[%s6544_s13 + $0x124] ss:$16 sps:$4 sm:$0xff]  }
 0x192   : > { %1567 = vmatprep.subr.bf16.mxu0 %v5433_v62  ;;  %1793 = vmatprep.subr.bf16.mxu1 %v5436_v63  ;;  %v562_v62 = vld [vmem:[#allocation3 + $0x50] sm:$0xff] }
 0x193   : > { %v566_v63 = vld [vmem:[#allocation3 + $0x70] sm:$0xff] }
 0x194   : > { %1511 = vmatmul.mubr.bf16.gmra.mrb[16].mxu0 %v632_v0  ;;  %1737 = vmatmul.mubr.bf16.gmra.mrb[16].mxu1 %v632_v0  ;;  %v5487_v0 = vld [vmem:[%s6544_s13 + $0x24] ss:$16 sps:$4 sm:$0xff]  }
 0x195   : > { %1568 = vmatpush1.bf16.msra.mxu0 %v5431_v3  ;;  %1794 = vmatpush1.bf16.msra.mxu1 %v5434_v4  ;;  %v575_v3 = vld [vmem:[#allocation3 + $0xb8] sm:$0xff] }
 0x196   : > { %1569 = vmatprep.subr.bf16.mxu0 %v5439_v5  ;;  %1795 = vmatprep.subr.bf16.mxu1 %v5442_v6  ;;  %v5485_v4 = vld [vmem:[%s6544_s13 + $0x20] ss:$16 sps:$4 sm:$0xff]   ;;  %v5488_v5 = vld [vmem:[%s6544_s13 + $0x28] ss:$16 sps:$4 sm:$0xff]   ;;  %v5493_v6 = vld [vmem:[%s6544_s13 + $0x44] ss:$16 sps:$4 sm:$0xff]  }
 0x197   : > { %1520 = vmatprep.mubr.bf16.mxu0 %v637_v7  ;;  %1746 = vmatprep.mubr.bf16.mxu1 %v637_v7  ;;  %v5496_v7 = vld [vmem:[%s6544_s13 + $0x4c] ss:$16 sps:$4 sm:$0xff]  }
 0x199   : > { %1570 = vmatpush1.bf16.msra.mxu0 %v5437_v8  ;;  %1796 = vmatpush1.bf16.msra.mxu1 %v5440_v9  ;;  %v622_v8 = vpack.c.bf16 %v566_v63, %v562_v62  ;;  %v627_v9 = vpack.c.bf16 %v575_v3, %v571_v2  ;;  %v5541_v62 = vld [vmem:[%s6544_s13 + $0x144] ss:$16 sps:$4 sm:$0xff]   ;;  %v5544_v63 = vld [vmem:[%s6544_s13 + $0x14c] ss:$16 sps:$4 sm:$0xff]   ;;  %v5539_v2 = vld [vmem:[%s6544_s13 + $0x140] ss:$16 sps:$4 sm:$0xff]  }
 0x19a   : > { %1571 = vmatprep.subr.bf16.mxu0 %v5445_v12  ;;  %1797 = vmatprep.subr.bf16.mxu1 %v5448_v13  ;;  %v570_v12 = vld [vmem:[#allocation3 + $0x90] sm:$0xff] }
 0x19b   : > { %v574_v13 = vld [vmem:[#allocation3 + $0xb0] sm:$0xff] }
 0x19c   : > { %1521 = vmatmul.mubr.bf16.gmra.mrb[20].mxu0 %v636_v14  ;;  %1747 = vmatmul.mubr.bf16.gmra.mrb[20].mxu1 %v636_v14  ;;  %v5499_v14 = vld [vmem:[%s6544_s13 + $0x64] ss:$16 sps:$4 sm:$0xff]   ;;  %v5542_v3 = vld [vmem:[%s6544_s13 + $0x148] ss:$16 sps:$4 sm:$0xff]  }
 0x19d   : > { %1572 = vmatpush1.bf16.msra.mxu0 %v5443_v17  ;;  %1798 = vmatpush1.bf16.msra.mxu1 %v5446_v18  ;;  %v583_v17 = vld [vmem:[#allocation3 + $0xf8] sm:$0xff] }
 0x19e   : > { %1573 = vmatprep.subr.bf16.mxu0 %v5451_v19  ;;  %1799 = vmatprep.subr.bf16.mxu1 %v5454_v20  ;;  %v5497_v18 = vld [vmem:[%s6544_s13 + $0x60] ss:$16 sps:$4 sm:$0xff]   ;;  %v5500_v19 = vld [vmem:[%s6544_s13 + $0x68] ss:$16 sps:$4 sm:$0xff]   ;;  %v5505_v20 = vld [vmem:[%s6544_s13 + $0x84] ss:$16 sps:$4 sm:$0xff]   ;;  %v631_v25 = vpack.c.bf16 %v583_v17, %v579_v16 }
 0x19f   : > { %1530 = vmatprep.mubr.bf16.mxu0 %v641_v23  ;;  %1756 = vmatprep.mubr.bf16.mxu1 %v641_v23  ;;  %v5503_v23 = vld [vmem:[%s6544_s13 + $0x80] ss:$16 sps:$4 sm:$0xff]   ;;  %v5554_v17 = vld [vmem:[%s6544_s13 + $0x188] ss:$16 sps:$4 sm:$0xff]  }
 0x1a0   : > { %v5551_v16 = vld [vmem:[%s6544_s13 + $0x180] ss:$16 sps:$4 sm:$0xff]  }
 0x1a1   : > { %1574 = vmatpush1.bf16.msra.mxu0 %v5449_v21  ;;  %1800 = vmatpush1.bf16.msra.mxu1 %v5452_v22  ;;  %v5508_v21 = vld [vmem:[%s6544_s13 + $0x8c] ss:$16 sps:$4 sm:$0xff]   ;;  %v626_v22 = vpack.c.bf16 %v574_v13, %v570_v12  ;;  %v5553_v12 = vld [vmem:[%s6544_s13 + $0x184] ss:$16 sps:$4 sm:$0xff]  }
 0x1a2   : > { %1575 = vmatprep.subr.bf16.mxu0 %v5457_v26  ;;  %1801 = vmatprep.subr.bf16.mxu1 %v5460_v27  ;;  %v5511_v26 = vld [vmem:[%s6544_s13 + $0xa4] ss:$16 sps:$4 sm:$0xff]   ;;  %v5514_v27 = vld [vmem:[%s6544_s13 + $0xac] ss:$16 sps:$4 sm:$0xff]  }
 0x1a3   : > { %v5556_v13 = vld [vmem:[%s6544_s13 + $0x18c] ss:$16 sps:$4 sm:$0xff]  }
 0x1a4   : > { %1531 = vmatmul.mubr.bf16.gmra.mrb[24].mxu0 %v640_v30  ;;  %1757 = vmatmul.mubr.bf16.gmra.mrb[24].mxu1 %v640_v30  ;;  %v587_v30 = vld [vmem:[#allocation3 + $0x118] sm:$0xff] }
 0x1a5   : > { %1576 = vmatpush1.bf16.msra.mxu0 %v5455_v28  ;;  %1802 = vmatpush1.bf16.msra.mxu1 %v5458_v29  ;;  %v578_v28 = vld [vmem:[#allocation3 + $0xd0] sm:$0xff]  ;;  %v635_v39 = vpack.c.bf16 %v591_v31, %v587_v30  ;;  %v5569_v31 = vld [vmem:[%s6544_s13 + $0x1e0] ss:$16 sps:$4 sm:$0xff]  }
 0x1a6   : > { %1577 = vmatprep.subr.bf16.mxu0 %v5463_v33  ;;  %1803 = vmatprep.subr.bf16.mxu1 %v5466_v34  ;;  %v582_v29 = vld [vmem:[#allocation3 + $0xf0] sm:$0xff]  ;;  %v5517_v34 = vld [vmem:[%s6544_s13 + $0xc4] ss:$16 sps:$4 sm:$0xff]  }
 0x1a7   : > { %1540 = vmatprep.mubr.bf16.mxu0 %v645_v37  ;;  %1766 = vmatprep.mubr.bf16.mxu1 %v645_v37  ;;  %v5512_v33 = vld [vmem:[%s6544_s13 + $0xa8] ss:$16 sps:$4 sm:$0xff]   ;;  %v5515_v37 = vld [vmem:[%s6544_s13 + $0xc0] ss:$16 sps:$4 sm:$0xff]   ;;  %v5574_v30 = vld [vmem:[%s6544_s13 + $0x1ec] ss:$16 sps:$4 sm:$0xff]  }
 0x1a9   : > { %1578 = vmatpush1.bf16.msra.mxu0 %v5461_v35  ;;  %1804 = vmatpush1.bf16.msra.mxu1 %v5464_v36  ;;  %v5520_v35 = vld [vmem:[%s6544_s13 + $0xcc] ss:$16 sps:$4 sm:$0xff]   ;;  %v630_v36 = vpack.c.bf16 %v582_v29, %v578_v28  ;;  %v5566_v28 = vld [vmem:[%s6544_s13 + $0x1c8] ss:$16 sps:$4 sm:$0xff]   ;;  %v5571_v29 = vld [vmem:[%s6544_s13 + $0x1e4] ss:$16 sps:$4 sm:$0xff]  }
 0x1aa   : > { %1579 = vmatprep.subr.bf16.mxu0 %v5469_v40  ;;  %1805 = vmatprep.subr.bf16.mxu1 %v5472_v41  ;;  %v5523_v40 = vld [vmem:[%s6544_s13 + $0xe4] ss:$16 sps:$4 sm:$0xff]   ;;  %v5526_v41 = vld [vmem:[%s6544_s13 + $0xec] ss:$16 sps:$4 sm:$0xff]  }
 0x1ac   : > { %1541 = vmatmul.mubr.bf16.gmra.mrb[28].mxu0 %v644_v44  ;;  %1767 = vmatmul.mubr.bf16.gmra.mrb[28].mxu1 %v644_v44  ;;  %v595_v44 = vld [vmem:[#allocation3 + $0x158] sm:$0xff] }
 0x1ad   : > { %1580 = vmatpush1.bf16.msra.mxu0 %v5467_v42  ;;  %1806 = vmatpush1.bf16.msra.mxu1 %v5470_v43  ;;  %v586_v42 = vld [vmem:[#allocation3 + $0x110] sm:$0xff]  ;;  %v639_v53 = vpack.c.bf16 %v599_v45, %v595_v44 }
 0x1ae   : > { %1581 = vmatprep.subr.bf16.mxu0 %v5475_v47  ;;  %1807 = vmatprep.subr.bf16.mxu1 %v5478_v48  ;;  %v590_v43 = vld [vmem:[#allocation3 + $0x130] sm:$0xff]  ;;  %v5529_v48 = vld [vmem:[%s6544_s13 + $0x104] ss:$16 sps:$4 sm:$0xff]  }
 0x1af   : > { %1583 = vmatprep.mubr.bf16.mxu0 %v619_v51  ;;  %1809 = vmatprep.mubr.bf16.mxu1 %v619_v51  ;;  %v5524_v47 = vld [vmem:[%s6544_s13 + $0xe8] ss:$16 sps:$4 sm:$0xff]   ;;  %v5527_v51 = vld [vmem:[%s6544_s13 + $0x100] ss:$16 sps:$4 sm:$0xff]  }
 0x1b1   : > { %1582 = vmatpush1.bf16.msra.mxu0 %v5473_v49  ;;  %1808 = vmatpush1.bf16.msra.mxu1 %v5476_v50  ;;  %v5532_v49 = vld [vmem:[%s6544_s13 + $0x10c] ss:$16 sps:$4 sm:$0xff]   ;;  %v634_v50 = vpack.c.bf16 %v590_v43, %v586_v42 }
 0x1b2   : > { %2818 = vmatprep.subr.bf16.mxu0 %v5481_v56  ;;  %3044 = vmatprep.subr.bf16.mxu1 %v5484_v57  ;;  %v594_v56 = vld [vmem:[#allocation3 + $0x150] sm:$0xff] }
 0x1b3   : > { %v598_v57 = vld [vmem:[#allocation3 + $0x170] sm:$0xff] }
 0x1b4   : > { %1584 = vmatmul.mubr.bf16.vlgmr.msra.gmra.mrb[0].mxu0 %v618_v58  ;;  %1810 = vmatmul.mubr.bf16.vlgmr.msra.gmra.mrb[0].mxu1 %v618_v58  ;;  %v603_v58 = vld [vmem:[#allocation3 + $0x198] sm:$0xff] }
 0x1b5   : > { %1593 = vmatprep.mubr.bf16.mxu0 %v623_v59  ;;  %1819 = vmatprep.mubr.bf16.mxu1 %v623_v59  ;;  %v607_v59 = vld [vmem:[#allocation3 + $0x1b8] sm:$0xff] }
 0x1b6   : > { %2819 = vmatpush1.bf16.msra.mxu0 %v5479_v60  ;;  %3045 = vmatpush1.bf16.msra.mxu1 %v5482_v61  ;;  %v5533_v60 = vld [vmem:[%s6544_s13 + $0x120] ss:$16 sps:$4 sm:$0xff]   ;;  %v5536_v61 = vld [vmem:[%s6544_s13 + $0x128] ss:$16 sps:$4 sm:$0xff]  }
 0x1b7   : > { %2820 = vmatprep.subr.bf16.mxu0 %v5487_v0  ;;  %3046 = vmatprep.subr.bf16.mxu1 %v5490_v1  ;;  %v638_v0 = vpack.c.bf16 %v598_v57, %v594_v56  ;;  %v643_v1 = vpack.c.bf16 %v607_v59, %v603_v58 }
 0x1ba   : > { %2821 = vmatpush1.bf16.msra.mxu0 %v5485_v4  ;;  %3047 = vmatpush1.bf16.msra.mxu1 %v5488_v5  ;;  %v5547_v4 = vld [vmem:[%s6544_s13 + $0x164] ss:$16 sps:$4 sm:$0xff]   ;;  %v5550_v5 = vld [vmem:[%s6544_s13 + $0x16c] ss:$16 sps:$4 sm:$0xff]  }
 0x1bb   : > { %2822 = vmatprep.subr.bf16.mxu0 %v5493_v6  ;;  %3048 = vmatprep.subr.bf16.mxu1 %v5496_v7  ;;  %v602_v6 = vld [vmem:[#allocation3 + $0x190] sm:$0xff] }
 0x1bc   : > { %1594 = vmatmul.mubr.bf16.gmra.mrb[4].mxu0 %v622_v8  ;;  %1820 = vmatmul.mubr.bf16.gmra.mrb[4].mxu1 %v622_v8  ;;  %v606_v7 = vld [vmem:[#allocation3 + $0x1b0] sm:$0xff]  ;;  %v611_v8 = vld [vmem:[#allocation3 + $0x1d8] sm:$0xff] }
 0x1bd   : > { %1603 = vmatprep.mubr.bf16.mxu0 %v627_v9  ;;  %1829 = vmatprep.mubr.bf16.mxu1 %v627_v9  ;;  %v615_v9 = vld [vmem:[#allocation3 + $0x1f8] sm:$0xff] }
 0x1be   : > { %2823 = vmatpush1.bf16.msra.mxu0 %v5491_v10  ;;  %3049 = vmatpush1.bf16.msra.mxu1 %v5494_v11  ;;  %v5545_v10 = vld [vmem:[%s6544_s13 + $0x160] ss:$16 sps:$4 sm:$0xff]   ;;  %v5548_v11 = vld [vmem:[%s6544_s13 + $0x168] ss:$16 sps:$4 sm:$0xff]  }
 0x1bf   : > { %2824 = vmatprep.subr.bf16.mxu0 %v5499_v14  ;;  %3050 = vmatprep.subr.bf16.mxu1 %v5502_v15  ;;  %v642_v14 = vpack.c.bf16 %v606_v7, %v602_v6  ;;  %v647_v15 = vpack.c.bf16 %v615_v9, %v611_v8 }
 0x1c2   : > { %2825 = vmatpush1.bf16.msra.mxu0 %v5497_v18  ;;  %3051 = vmatpush1.bf16.msra.mxu1 %v5500_v19  ;;  %v5559_v18 = vld [vmem:[%s6544_s13 + $0x1a4] ss:$16 sps:$4 sm:$0xff]   ;;  %v5562_v19 = vld [vmem:[%s6544_s13 + $0x1ac] ss:$16 sps:$4 sm:$0xff]  }
 0x1c3   : > { %2826 = vmatprep.subr.bf16.mxu0 %v5505_v20  ;;  %3052 = vmatprep.subr.bf16.mxu1 %v5508_v21  ;;  %v610_v20 = vld [vmem:[#allocation3 + $0x1d0] sm:$0xff] }
 0x1c4   : > { %1604 = vmatmul.mubr.bf16.gmra.mrb[8].mxu0 %v626_v22  ;;  %1830 = vmatmul.mubr.bf16.gmra.mrb[8].mxu1 %v626_v22  ;;  %v614_v21 = vld [vmem:[#allocation3 + $0x1f0] sm:$0xff]  ;;  %v5557_v22 = vld [vmem:[%s6544_s13 + $0x1a0] ss:$16 sps:$4 sm:$0xff]  }
 0x1c5   : > { %1613 = vmatprep.mubr.bf16.mxu0 %v631_v25  ;;  %1839 = vmatprep.mubr.bf16.mxu1 %v631_v25  ;;  %v5565_v25 = vld [vmem:[%s6544_s13 + $0x1c4] ss:$16 sps:$4 sm:$0xff]  }
 0x1c6   : > { %2827 = vmatpush1.bf16.msra.mxu0 %v5503_v23  ;;  %3053 = vmatpush1.bf16.msra.mxu1 %v5506_v24  ;;  %v5560_v23 = vld [vmem:[%s6544_s13 + $0x1a8] ss:$16 sps:$4 sm:$0xff]   ;;  %v646_v24 = vpack.c.bf16 %v614_v21, %v610_v20 }
 0x1c7   : > { %2828 = vmatprep.subr.bf16.mxu0 %v5511_v26  ;;  %3054 = vmatprep.subr.bf16.mxu1 %v5514_v27  ;;  %v5568_v26 = vld [vmem:[%s6544_s13 + $0x1cc] ss:$16 sps:$4 sm:$0xff]   ;;  %v5563_v27 = vld [vmem:[%s6544_s13 + $0x1c0] ss:$16 sps:$4 sm:$0xff]  }
 0x1ca   : > { %2829 = vmatpush1.bf16.msra.mxu0 %v5509_v32  ;;  %3055 = vmatpush1.bf16.msra.mxu1 %v5512_v33  ;;  %v5572_v32 = vld [vmem:[%s6544_s13 + $0x1e8] ss:$16 sps:$4 sm:$0xff]   ;;  %v5577_v33 = vld [vmem:[%s6544_s13 + $0x204] ss:$16 sps:$4 sm:$0xff]  }
 0x1cb   : > { %2830 = vmatprep.subr.bf16.mxu0 %v5517_v34  ;;  %3056 = vmatprep.subr.bf16.mxu1 %v5520_v35  ;;  %v5580_v34 = vld [vmem:[%s6544_s13 + $0x20c] ss:$16 sps:$4 sm:$0xff]   ;;  %v778_v35 = vlaneseq }
 0x1cc   : > { %1614 = vmatmul.mubr.bf16.gmra.mrb[12].mxu0 %v630_v36  ;;  %1840 = vmatmul.mubr.bf16.gmra.mrb[12].mxu1 %v630_v36 }
 0x1cd   : > { %1623 = vmatprep.mubr.bf16.mxu0 %v635_v39  ;;  %1849 = vmatprep.mubr.bf16.mxu1 %v635_v39  ;;  %v779_v36 = vshrl.u32 %v778_v35, 7  ;;  %v776_v39 = vld [vmem:[%s416_s21] sm:$0xf] }
 0x1ce   : > { %2831 = vmatpush1.bf16.msra.mxu0 %v5515_v37  ;;  %3057 = vmatpush1.bf16.msra.mxu1 %v5518_v38 }
 0x1cf   : > { %2832 = vmatprep.subr.bf16.mxu0 %v5523_v40  ;;  %3058 = vmatprep.subr.bf16.mxu1 %v5526_v41  ;;  %v6822_v37 = vsub.s32 0, %v779_v36  ;;  %v6824_v38 = vsub.s32 2, %v779_v36  ;;  %v6828_v40 = vsub.s32 1, %v779_v36  ;;  %v6830_v41 = vsub.s32 3, %v779_v36 }
 0x1d1   : > { %v6833_v42 = vrot.slane %v776_v39, %v6822_v37  ;;  %v6836_v43 = vrot.slane %v776_v39, %v6824_v38  ;;  %v6839_v44 = vrot.slane %v776_v39, %v6828_v40  ;;  %v6842_v45 = vrot.slane %v776_v39, %v6830_v41  ;;  %v5592_v39 = vld [vmem:[%s6544_s13 + $0x24c] ss:$16 sps:$4 sm:$0xff]  }
 0x1d2   : > { %2833 = vmatpush1.bf16.msra.mxu0 %v5521_v46  ;;  %3059 = vmatpush1.bf16.msra.mxu1 %v5524_v47 }
 0x1d3   : > { %2834 = vmatprep.subr.bf16.mxu0 %v5529_v48  ;;  %3060 = vmatprep.subr.bf16.mxu1 %v5532_v49 }
 0x1d4   : > { %1624 = vmatmul.mubr.bf16.gmra.mrb[16].mxu0 %v634_v50  ;;  %1850 = vmatmul.mubr.bf16.gmra.mrb[16].mxu1 %v634_v50 }
 0x1d5   : > { %1633 = vmatprep.mubr.bf16.mxu0 %v639_v53  ;;  %1859 = vmatprep.mubr.bf16.mxu1 %v639_v53 }
 0x1d6   : > { %2835 = vmatpush1.bf16.msra.mxu0 %v5527_v51  ;;  %3061 = vmatpush1.bf16.msra.mxu1 %v5530_v52 }
 0x1d7   : > { %2836 = vmatprep.subr.bf16.mxu0 %v5535_v54  ;;  %3062 = vmatprep.subr.bf16.mxu1 %v5538_v55 }
 0x1da   : > { %2837 = vmatpush1.bf16.msra.mxu0 %v5533_v60  ;;  %3063 = vmatpush1.bf16.msra.mxu1 %v5536_v61 }
 0x1db   : > { %2838 = vmatprep.subr.bf16.mxu0 %v5541_v62  ;;  %3064 = vmatprep.subr.bf16.mxu1 %v5544_v63 }
 0x1dc   : > { %1634 = vmatmul.mubr.bf16.gmra.mrb[20].mxu0 %v638_v0  ;;  %1860 = vmatmul.mubr.bf16.gmra.mrb[20].mxu1 %v638_v0 }
 0x1dd   : > { %1643 = vmatprep.mubr.bf16.mxu0 %v643_v1  ;;  %1869 = vmatprep.mubr.bf16.mxu1 %v643_v1 }
 0x1de   : > { %2839 = vmatpush1.bf16.msra.mxu0 %v5539_v2  ;;  %3065 = vmatpush1.bf16.msra.mxu1 %v5542_v3 }
 0x1df   : > { %2840 = vmatprep.subr.bf16.mxu0 %v5547_v4  ;;  %3066 = vmatprep.subr.bf16.mxu1 %v5550_v5 }
 0x1e2   : > { %2841 = vmatpush1.bf16.msra.mxu0 %v5545_v10  ;;  %3067 = vmatpush1.bf16.msra.mxu1 %v5548_v11 }
 0x1e3   : > { %2842 = vmatprep.subr.bf16.mxu0 %v5553_v12  ;;  %3068 = vmatprep.subr.bf16.mxu1 %v5556_v13  ;;  %v5575_v12 = vld [vmem:[%s6544_s13 + $0x200] ss:$16 sps:$4 sm:$0xff]   ;;  %v5578_v13 = vld [vmem:[%s6544_s13 + $0x208] ss:$16 sps:$4 sm:$0xff]  }
 0x1e4   : > { %1644 = vmatmul.mubr.bf16.gmra.mrb[24].mxu0 %v642_v14  ;;  %1870 = vmatmul.mubr.bf16.gmra.mrb[24].mxu1 %v642_v14 }
 0x1e5   : > { %1653 = vmatprep.mubr.bf16.mxu0 %v647_v15  ;;  %1879 = vmatprep.mubr.bf16.mxu1 %v647_v15 }
 0x1e6   : > { %2843 = vmatpush1.bf16.msra.mxu0 %v5551_v16  ;;  %3069 = vmatpush1.bf16.msra.mxu1 %v5554_v17 }
 0x1e7   : > { %2844 = vmatprep.subr.bf16.mxu0 %v5559_v18  ;;  %3070 = vmatprep.subr.bf16.mxu1 %v5562_v19  ;;  %v5583_v18 = vld [vmem:[%s6544_s13 + $0x224] ss:$16 sps:$4 sm:$0xff]   ;;  %v5586_v19 = vld [vmem:[%s6544_s13 + $0x22c] ss:$16 sps:$4 sm:$0xff]  }
 0x1ea   : > { %2845 = vmatpush1.bf16.msra.mxu0 %v5557_v22  ;;  %3071 = vmatpush1.bf16.msra.mxu1 %v5560_v23 }
 0x1eb   : > { %2846 = vmatprep.subr.bf16.mxu0 %v5565_v25  ;;  %3072 = vmatprep.subr.bf16.mxu1 %v5568_v26 }
 0x1ec   : > { %1654 = vmatmul.mubr.bf16.gmra.mrb[28].mxu0 %v646_v24  ;;  %1880 = vmatmul.mubr.bf16.gmra.mrb[28].mxu1 %v646_v24 }
 0x1ee   : > { %2847 = vmatpush1.bf16.msra.mxu0 %v5563_v27  ;;  %3073 = vmatpush1.bf16.msra.mxu1 %v5566_v28 }
 0x1ef   : > { %2848 = vmatprep.subr.bf16.mxu0 %v5571_v29  ;;  %3074 = vmatprep.subr.bf16.mxu1 %v5574_v30  ;;  %v5581_v30 = vld [vmem:[%s6544_s13 + $0x220] ss:$16 sps:$4 sm:$0xff]  }
 0x1f2   : > { %2849 = vmatpush1.bf16.msra.mxu0 %v5569_v31  ;;  %3075 = vmatpush1.bf16.msra.mxu1 %v5572_v32  ;;  %v5584_v31 = vld [vmem:[%s6544_s13 + $0x228] ss:$16 sps:$4 sm:$0xff]   ;;  %v5589_v32 = vld [vmem:[%s6544_s13 + $0x244] ss:$16 sps:$4 sm:$0xff]  }
 0x1f3   : > { %2931 = vmatprep.subr.bf16.mxu0 %v5577_v33  ;;  %3157 = vmatprep.subr.bf16.mxu1 %v5580_v34 }
 0x287   : > { %v1585_v46 = vpop.f32.mrb[0].mxu0  ;;  %v1811_v47 = vpop.f32.mrb[0].mxu1 }
 0x288   : > { %v4971_v48 = vadd.f32 %v1585_v46, %v6833_v42  ;;  %v5003_v49 = vadd.f32 %v1811_v47, %v6836_v43  ;;  %v1587_v50 = vpop.f32.mrb[1].mxu0  ;;  %v1813_v51 = vpop.f32.mrb[1].mxu1 }
 0x289   : > { %v4972_v52 = vadd.f32 %v1587_v50, %v6839_v44  ;;  %v5004_v53 = vadd.f32 %v1813_v51, %v6842_v45  ;;  %v1589_v54 = vpop.f32.mrb[2].mxu0  ;;  %v1815_v55 = vpop.f32.mrb[2].mxu1 }
 0x28a   : > { %v4973_v56 = vadd.f32 %v1589_v54, %v6833_v42  ;;  %v5005_v57 = vadd.f32 %v1815_v55, %v6836_v43  ;;  %v1591_v58 = vpop.f32.mrb[3].mxu0  ;;  %v1817_v59 = vpop.f32.mrb[3].mxu1  ;;  %v1890_v62 = vmax.f32 %v4971_v48, 0.0  ;;  %v1892_v63 = vmax.f32 %v5003_v49, 0.0 }
 0x28b   : > { %v4974_v60 = vadd.f32 %v1591_v58, %v6839_v44  ;;  %v5006_v61 = vadd.f32 %v1817_v59, %v6842_v45  ;;  %v1891_v2 = vmax.f32 %v4972_v52, 0.0  ;;  %v1893_v3 = vmax.f32 %v5004_v53, 0.0 }
 0x28c   : > { %v1894_v0 = vmax.f32 %v4973_v56, 0.0  ;;  %v1896_v1 = vmax.f32 %v5005_v57, 0.0  ;;  %v5587_v56 = vld [vmem:[%s6544_s13 + $0x240] ss:$16 sps:$4 sm:$0xff]   ;;  %v5590_v57 = vld [vmem:[%s6544_s13 + $0x248] ss:$16 sps:$4 sm:$0xff]  }
 0x28d   : > { %v1895_v4 = vmax.f32 %v4974_v60, 0.0  ;;  %v1897_v5 = vmax.f32 %v5006_v61, 0.0 }
 0x28e   : > { %v2018_v6 = vpack.c.bf16 %v1894_v0, %v1890_v62  ;;  %v6852_v7 = vpack.c.bf16 %v1896_v1, %v1892_v63  ;;  %v5595_v62 = vld [vmem:[%s6544_s13 + $0x264] ss:$16 sps:$4 sm:$0xff]   ;;  %v5598_v63 = vld [vmem:[%s6544_s13 + $0x26c] ss:$16 sps:$4 sm:$0xff]  }
 0x28f   : > { %v2019_v8 = vpack.c.bf16 %v1895_v4, %v1891_v2  ;;  %v6854_v9 = vpack.c.bf16 %v1897_v5, %v1893_v3  ;;  %v1595_v10 = vpop.f32.mrb[4].mxu0  ;;  %v1821_v11 = vpop.f32.mrb[4].mxu1 }
 0x290   : > { %v4975_v14 = vadd.f32 %v1595_v10, %v6833_v42  ;;  %v5007_v15 = vadd.f32 %v1821_v11, %v6836_v43  ;;  %v1597_v16 = vpop.f32.mrb[5].mxu0  ;;  %v1823_v17 = vpop.f32.mrb[5].mxu1 }
 0x291   : > { %v4976_v20 = vadd.f32 %v1597_v16, %v6839_v44  ;;  %v5008_v21 = vadd.f32 %v1823_v17, %v6842_v45  ;;  %v1599_v22 = vpop.f32.mrb[6].mxu0  ;;  %v1825_v23 = vpop.f32.mrb[6].mxu1  ;;  %2850 = vmatprep.mubr.bf16.mxu0 %v2019_v8  ;;  %3076 = vmatprep.mubr.bf16.mxu1 %v2019_v8 }
 0x292   : > { %v4977_v24 = vadd.f32 %v1599_v22, %v6833_v42  ;;  %v5009_v25 = vadd.f32 %v1825_v23, %v6836_v43  ;;  %v1601_v26 = vpop.f32.mrb[7].mxu0  ;;  %v1827_v27 = vpop.f32.mrb[7].mxu1  ;;  %2851 = vmatmul.mubr.bf16.vlgmr.msra.gmra.mrb[32].mxu0 %v2018_v6  ;;  %3077 = vmatmul.mubr.bf16.vlgmr.msra.gmra.mrb[32].mxu1 %v2018_v6  ;;  %v1898_v33 = vmax.f32 %v4975_v14, 0.0  ;;  %v1900_v34 = vmax.f32 %v5007_v15, 0.0  ;;  %v5601_v14 = vld [vmem:[%s6544_s13 + $0x284] ss:$16 sps:$4 sm:$0xff]  }
 0x293   : > { %v4978_v28 = vadd.f32 %v1601_v26, %v6839_v44  ;;  %v5010_v29 = vadd.f32 %v1827_v27, %v6842_v45  ;;  %2932 = vmatpush1.bf16.msra.mxu0 %v5575_v12  ;;  %3158 = vmatpush1.bf16.msra.mxu1 %v5578_v13  ;;  %v1899_v46 = vmax.f32 %v4976_v20, 0.0  ;;  %v1901_v47 = vmax.f32 %v5008_v21, 0.0  ;;  %v5593_v12 = vld [vmem:[%s6544_s13 + $0x260] ss:$16 sps:$4 sm:$0xff]   ;;  %v5596_v13 = vld [vmem:[%s6544_s13 + $0x268] ss:$16 sps:$4 sm:$0xff]  }
 0x294   : > { %v1902_v35 = vmax.f32 %v4977_v24, 0.0  ;;  %v1904_v36 = vmax.f32 %v5009_v25, 0.0  ;;  %2933 = vmatprep.subr.bf16.mxu0 %v5583_v18  ;;  %3159 = vmatprep.subr.bf16.mxu1 %v5586_v19  ;;  %v5604_v19 = vld [vmem:[%s6544_s13 + $0x28c] ss:$16 sps:$4 sm:$0xff]  }
 0x295   : > { %v1903_v48 = vmax.f32 %v4978_v28, 0.0  ;;  %v1905_v49 = vmax.f32 %v5010_v29, 0.0 }
 0x296   : > { %v2022_v50 = vpack.c.bf16 %v1902_v35, %v1898_v33  ;;  %v6872_v51 = vpack.c.bf16 %v1904_v36, %v1900_v34  ;;  %v5607_v36 = vld [vmem:[%s6544_s13 + $0x2a4] ss:$16 sps:$4 sm:$0xff]  }
 0x297   : > { %v2023_v52 = vpack.c.bf16 %v1903_v48, %v1899_v46  ;;  %v6874_v53 = vpack.c.bf16 %v1905_v49, %v1901_v47  ;;  %v1605_v54 = vpop.f32.mrb[8].mxu0  ;;  %v1831_v55 = vpop.f32.mrb[8].mxu1  ;;  %2934 = vmatpush1.bf16.msra.mxu0 %v5581_v30  ;;  %3160 = vmatpush1.bf16.msra.mxu1 %v5584_v31  ;;  %v5599_v30 = vld [vmem:[%s6544_s13 + $0x280] ss:$16 sps:$4 sm:$0xff]   ;;  %v5602_v31 = vld [vmem:[%s6544_s13 + $0x288] ss:$16 sps:$4 sm:$0xff]  }
 0x298   : > { %v4979_v58 = vadd.f32 %v1605_v54, %v6833_v42  ;;  %v5011_v59 = vadd.f32 %v1831_v55, %v6836_v43  ;;  %v1607_v60 = vpop.f32.mrb[9].mxu0  ;;  %v1833_v61 = vpop.f32.mrb[9].mxu1  ;;  %2935 = vmatprep.subr.bf16.mxu0 %v5589_v32  ;;  %3161 = vmatprep.subr.bf16.mxu1 %v5592_v39  ;;  %v5610_v39 = vld [vmem:[%s6544_s13 + $0x2ac] ss:$16 sps:$4 sm:$0xff]  }
 0x299   : > { %v4980_v0 = vadd.f32 %v1607_v60, %v6839_v44  ;;  %v5012_v1 = vadd.f32 %v1833_v61, %v6842_v45  ;;  %v1609_v2 = vpop.f32.mrb[10].mxu0  ;;  %v1835_v3 = vpop.f32.mrb[10].mxu1  ;;  %2860 = vmatprep.mubr.bf16.mxu0 %v2023_v52  ;;  %3086 = vmatprep.mubr.bf16.mxu1 %v2023_v52  ;;  %v5613_v60 = vld [vmem:[%s6544_s13 + $0x2c4] ss:$16 sps:$4 sm:$0xff]  }
 0x29a   : > { %v4981_v4 = vadd.f32 %v1609_v2, %v6833_v42  ;;  %v5013_v5 = vadd.f32 %v1835_v3, %v6836_v43  ;;  %v1611_v6 = vpop.f32.mrb[11].mxu0  ;;  %v1837_v8 = vpop.f32.mrb[11].mxu1  ;;  %2861 = vmatmul.mubr.bf16.gmra.mrb[36].mxu0 %v2022_v50  ;;  %3087 = vmatmul.mubr.bf16.gmra.mrb[36].mxu1 %v2022_v50  ;;  %v1906_v15 = vmax.f32 %v4979_v58, 0.0  ;;  %v1908_v16 = vmax.f32 %v5011_v59, 0.0  ;;  %v5605_v58 = vld [vmem:[%s6544_s13 + $0x2a0] ss:$16 sps:$4 sm:$0xff]  }
 0x29b   : > { %v4982_v10 = vadd.f32 %v1611_v6, %v6839_v44  ;;  %v5014_v11 = vadd.f32 %v1837_v8, %v6842_v45  ;;  %2936 = vmatpush1.bf16.msra.mxu0 %v5587_v56  ;;  %3162 = vmatpush1.bf16.msra.mxu1 %v5590_v57  ;;  %v1907_v20 = vmax.f32 %v4980_v0, 0.0  ;;  %v1909_v21 = vmax.f32 %v5012_v1, 0.0  ;;  %v5608_v59 = vld [vmem:[%s6544_s13 + $0x2a8] ss:$16 sps:$4 sm:$0xff]   ;;  %v5616_v1 = vld [vmem:[%s6544_s13 + $0x2cc] ss:$16 sps:$4 sm:$0xff]  }
 0x29c   : > { %v1910_v17 = vmax.f32 %v4981_v4, 0.0  ;;  %v1912_v18 = vmax.f32 %v5013_v5, 0.0  ;;  %2937 = vmatprep.subr.bf16.mxu0 %v5595_v62  ;;  %3163 = vmatprep.subr.bf16.mxu1 %v5598_v63 }
 0x29d   : > { %v1911_v22 = vmax.f32 %v4982_v10, 0.0  ;;  %v1913_v23 = vmax.f32 %v5014_v11, 0.0 }
 0x29e   : > { %v2026_v24 = vpack.c.bf16 %v1910_v17, %v1906_v15  ;;  %v6892_v25 = vpack.c.bf16 %v1912_v18, %v1908_v16  ;;  %v5614_v15 = vld [vmem:[%s6544_s13 + $0x2c8] ss:$16 sps:$4 sm:$0xff]  }
 0x29f   : > { %v2027_v26 = vpack.c.bf16 %v1911_v22, %v1907_v20  ;;  %v6894_v27 = vpack.c.bf16 %v1913_v23, %v1909_v21  ;;  %v1615_v28 = vpop.f32.mrb[12].mxu0  ;;  %v1841_v29 = vpop.f32.mrb[12].mxu1  ;;  %2938 = vmatpush1.bf16.msra.mxu0 %v5593_v12  ;;  %3164 = vmatpush1.bf16.msra.mxu1 %v5596_v13  ;;  %v5619_v20 = vld [vmem:[%s6544_s13 + $0x2e4] ss:$16 sps:$4 sm:$0xff]   ;;  %v5622_v21 = vld [vmem:[%s6544_s13 + $0x2ec] ss:$16 sps:$4 sm:$0xff]  }
 0x2a0   : > { %v4983_v32 = vadd.f32 %v1615_v28, %v6833_v42  ;;  %v5015_v33 = vadd.f32 %v1841_v29, %v6836_v43  ;;  %v1617_v34 = vpop.f32.mrb[13].mxu0  ;;  %v1843_v35 = vpop.f32.mrb[13].mxu1  ;;  %2939 = vmatprep.subr.bf16.mxu0 %v5601_v14  ;;  %3165 = vmatprep.subr.bf16.mxu1 %v5604_v19  ;;  %v5611_v14 = vld [vmem:[%s6544_s13 + $0x2c0] ss:$16 sps:$4 sm:$0xff]  }
 0x2a1   : > { %v4984_v46 = vadd.f32 %v1617_v34, %v6839_v44  ;;  %v5016_v47 = vadd.f32 %v1843_v35, %v6842_v45  ;;  %v1619_v48 = vpop.f32.mrb[14].mxu0  ;;  %v1845_v49 = vpop.f32.mrb[14].mxu1  ;;  %2870 = vmatprep.mubr.bf16.mxu0 %v2027_v26  ;;  %3096 = vmatprep.mubr.bf16.mxu1 %v2027_v26  ;;  %v5617_v34 = vld [vmem:[%s6544_s13 + $0x2e0] ss:$16 sps:$4 sm:$0xff]   ;;  %v5620_v35 = vld [vmem:[%s6544_s13 + $0x2e8] ss:$16 sps:$4 sm:$0xff]  }
 0x2a2   : > { %v4985_v50 = vadd.f32 %v1619_v48, %v6833_v42  ;;  %v5017_v52 = vadd.f32 %v1845_v49, %v6836_v43  ;;  %v1621_v54 = vpop.f32.mrb[15].mxu0  ;;  %v1847_v55 = vpop.f32.mrb[15].mxu1  ;;  %2871 = vmatmul.mubr.bf16.gmra.mrb[40].mxu0 %v2026_v24  ;;  %3097 = vmatmul.mubr.bf16.gmra.mrb[40].mxu1 %v2026_v24  ;;  %v1914_v61 = vmax.f32 %v4983_v32, 0.0  ;;  %v1916_v62 = vmax.f32 %v5015_v33, 0.0  ;;  %v5628_v49 = vld [vmem:[%s6544_s13 + $0x30c] ss:$16 sps:$4 sm:$0xff]  }
 0x2a3   : > { %v4986_v56 = vadd.f32 %v1621_v54, %v6839_v44  ;;  %v5018_v57 = vadd.f32 %v1847_v55, %v6842_v45  ;;  %2940 = vmatpush1.bf16.msra.mxu0 %v5599_v30  ;;  %3166 = vmatpush1.bf16.msra.mxu1 %v5602_v31  ;;  %v1915_v2 = vmax.f32 %v4984_v46, 0.0  ;;  %v1917_v3 = vmax.f32 %v5016_v47, 0.0 }
 0x2a4   : > { %v1918_v63 = vmax.f32 %v4985_v50, 0.0  ;;  %v1920_v0 = vmax.f32 %v5017_v52, 0.0  ;;  %2941 = vmatprep.subr.bf16.mxu0 %v5607_v36  ;;  %3167 = vmatprep.subr.bf16.mxu1 %v5610_v39  ;;  %v5625_v36 = vld [vmem:[%s6544_s13 + $0x304] ss:$16 sps:$4 sm:$0xff]  }
 0x2a5   : > { %v1919_v4 = vmax.f32 %v4986_v56, 0.0  ;;  %v1921_v5 = vmax.f32 %v5018_v57, 0.0 }
 0x2a6   : > { %v2030_v6 = vpack.c.bf16 %v1918_v63, %v1914_v61  ;;  %v6912_v8 = vpack.c.bf16 %v1920_v0, %v1916_v62  ;;  %v5623_v62 = vld [vmem:[%s6544_s13 + $0x300] ss:$16 sps:$4 sm:$0xff]   ;;  %v5626_v63 = vld [vmem:[%s6544_s13 + $0x308] ss:$16 sps:$4 sm:$0xff]  }
 0x2a7   : > { %v2031_v10 = vpack.c.bf16 %v1919_v4, %v1915_v2  ;;  %v6914_v11 = vpack.c.bf16 %v1921_v5, %v1917_v3  ;;  %v1625_v12 = vpop.f32.mrb[16].mxu0  ;;  %v1851_v13 = vpop.f32.mrb[16].mxu1  ;;  %2942 = vmatpush1.bf16.msra.mxu0 %v5605_v58  ;;  %3168 = vmatpush1.bf16.msra.mxu1 %v5608_v59  ;;  %v5631_v4 = vld [vmem:[%s6544_s13 + $0x324] ss:$16 sps:$4 sm:$0xff]   ;;  %v5634_v5 = vld [vmem:[%s6544_s13 + $0x32c] ss:$16 sps:$4 sm:$0xff]  }
 0x2a8   : > { %v4987_v16 = vadd.f32 %v1625_v12, %v6833_v42  ;;  %v5019_v17 = vadd.f32 %v1851_v13, %v6836_v43  ;;  %v1627_v18 = vpop.f32.mrb[17].mxu0  ;;  %v1853_v19 = vpop.f32.mrb[17].mxu1  ;;  %2943 = vmatprep.subr.bf16.mxu0 %v5613_v60  ;;  %3169 = vmatprep.subr.bf16.mxu1 %v5616_v1 }
 0x2a9   : > { %v4988_v22 = vadd.f32 %v1627_v18, %v6839_v44  ;;  %v5020_v23 = vadd.f32 %v1853_v19, %v6842_v45  ;;  %v1629_v24 = vpop.f32.mrb[18].mxu0  ;;  %v1855_v26 = vpop.f32.mrb[18].mxu1  ;;  %2880 = vmatprep.mubr.bf16.mxu0 %v2031_v10  ;;  %3106 = vmatprep.mubr.bf16.mxu1 %v2031_v10 }
 0x2aa   : > { %v4989_v28 = vadd.f32 %v1629_v24, %v6833_v42  ;;  %v5021_v29 = vadd.f32 %v1855_v26, %v6836_v43  ;;  %v1631_v30 = vpop.f32.mrb[19].mxu0  ;;  %v1857_v31 = vpop.f32.mrb[19].mxu1  ;;  %2881 = vmatmul.mubr.bf16.gmra.mrb[44].mxu0 %v2030_v6  ;;  %3107 = vmatmul.mubr.bf16.gmra.mrb[44].mxu1 %v2030_v6  ;;  %v1922_v39 = vmax.f32 %v4987_v16, 0.0  ;;  %v1924_v46 = vmax.f32 %v5019_v17, 0.0 }
 0x2ab   : > { %v4990_v32 = vadd.f32 %v1631_v30, %v6839_v44  ;;  %v5022_v33 = vadd.f32 %v1857_v31, %v6842_v45  ;;  %2944 = vmatpush1.bf16.msra.mxu0 %v5611_v14  ;;  %3170 = vmatpush1.bf16.msra.mxu1 %v5614_v15  ;;  %v1923_v50 = vmax.f32 %v4988_v22, 0.0  ;;  %v1925_v52 = vmax.f32 %v5020_v23, 0.0  ;;  %v5637_v22 = vld [vmem:[%s6544_s13 + $0x344] ss:$16 sps:$4 sm:$0xff]  }
 0x2ac   : > { %v1926_v47 = vmax.f32 %v4989_v28, 0.0  ;;  %v1928_v48 = vmax.f32 %v5021_v29, 0.0  ;;  %2945 = vmatprep.subr.bf16.mxu0 %v5619_v20  ;;  %3171 = vmatprep.subr.bf16.mxu1 %v5622_v21  ;;  %v5629_v20 = vld [vmem:[%s6544_s13 + $0x320] ss:$16 sps:$4 sm:$0xff]   ;;  %v5632_v21 = vld [vmem:[%s6544_s13 + $0x328] ss:$16 sps:$4 sm:$0xff]  }
 0x2ad   : > { %v1927_v54 = vmax.f32 %v4990_v32, 0.0  ;;  %v1929_v55 = vmax.f32 %v5022_v33, 0.0  ;;  %v5640_v29 = vld [vmem:[%s6544_s13 + $0x34c] ss:$16 sps:$4 sm:$0xff]  }
 0x2ae   : > { %v2034_v56 = vpack.c.bf16 %v1926_v47, %v1922_v39  ;;  %v6932_v57 = vpack.c.bf16 %v1928_v48, %v1924_v46  ;;  %v5635_v48 = vld [vmem:[%s6544_s13 + $0x340] ss:$16 sps:$4 sm:$0xff]  }
 0x2af   : > { %v2035_v58 = vpack.c.bf16 %v1927_v54, %v1923_v50  ;;  %v6934_v59 = vpack.c.bf16 %v1929_v55, %v1925_v52  ;;  %v1635_v60 = vpop.f32.mrb[20].mxu0  ;;  %v1861_v61 = vpop.f32.mrb[20].mxu1  ;;  %2946 = vmatpush1.bf16.msra.mxu0 %v5617_v34  ;;  %3172 = vmatpush1.bf16.msra.mxu1 %v5620_v35 }
 0x2b0   : > { %v4991_v0 = vadd.f32 %v1635_v60, %v6833_v42  ;;  %v5023_v1 = vadd.f32 %v1861_v61, %v6836_v43  ;;  %v1637_v2 = vpop.f32.mrb[21].mxu0  ;;  %v1863_v3 = vpop.f32.mrb[21].mxu1  ;;  %2947 = vmatprep.subr.bf16.mxu0 %v5625_v36  ;;  %3173 = vmatprep.subr.bf16.mxu1 %v5628_v49  ;;  %v5638_v49 = vld [vmem:[%s6544_s13 + $0x348] ss:$16 sps:$4 sm:$0xff]  }
 0x2b1   : > { %v4992_v6 = vadd.f32 %v1637_v2, %v6839_v44  ;;  %v5024_v10 = vadd.f32 %v1863_v3, %v6842_v45  ;;  %v1639_v12 = vpop.f32.mrb[22].mxu0  ;;  %v1865_v13 = vpop.f32.mrb[22].mxu1  ;;  %2890 = vmatprep.mubr.bf16.mxu0 %v2035_v58  ;;  %3116 = vmatprep.mubr.bf16.mxu1 %v2035_v58  ;;  %v5646_v58 = vld [vmem:[%s6544_s13 + $0x36c] ss:$16 sps:$4 sm:$0xff]  }
 0x2b2   : > { %v4993_v14 = vadd.f32 %v1639_v12, %v6833_v42  ;;  %v5025_v15 = vadd.f32 %v1865_v13, %v6836_v43  ;;  %v1641_v16 = vpop.f32.mrb[23].mxu0  ;;  %v1867_v17 = vpop.f32.mrb[23].mxu1  ;;  %2891 = vmatmul.mubr.bf16.gmra.mrb[48].mxu0 %v2034_v56  ;;  %3117 = vmatmul.mubr.bf16.gmra.mrb[48].mxu1 %v2034_v56  ;;  %v1930_v23 = vmax.f32 %v4991_v0, 0.0  ;;  %v1932_v24 = vmax.f32 %v5023_v1, 0.0  ;;  %v5643_v56 = vld [vmem:[%s6544_s13 + $0x364] ss:$16 sps:$4 sm:$0xff]  }
 0x2b3   : > { %v4994_v18 = vadd.f32 %v1641_v16, %v6839_v44  ;;  %v5026_v19 = vadd.f32 %v1867_v17, %v6842_v45  ;;  %2948 = vmatpush1.bf16.msra.mxu0 %v5623_v62  ;;  %3174 = vmatpush1.bf16.msra.mxu1 %v5626_v63  ;;  %v1931_v30 = vmax.f32 %v4992_v6, 0.0  ;;  %v1933_v31 = vmax.f32 %v5024_v10, 0.0  ;;  %v5641_v6 = vld [vmem:[%s6544_s13 + $0x360] ss:$16 sps:$4 sm:$0xff]   ;;  %v5644_v10 = vld [vmem:[%s6544_s13 + $0x368] ss:$16 sps:$4 sm:$0xff]  }
 0x2b4   : > { %v1934_v26 = vmax.f32 %v4993_v14, 0.0  ;;  %v1936_v28 = vmax.f32 %v5025_v15, 0.0  ;;  %2949 = vmatprep.subr.bf16.mxu0 %v5631_v4  ;;  %3175 = vmatprep.subr.bf16.mxu1 %v5634_v5  ;;  %v5649_v12 = vld [vmem:[%s6544_s13 + $0x384] ss:$16 sps:$4 sm:$0xff]   ;;  %v5652_v17 = vld [vmem:[%s6544_s13 + $0x38c] ss:$16 sps:$4 sm:$0xff]  }
 0x2b5   : > { %v1935_v32 = vmax.f32 %v4994_v18, 0.0  ;;  %v1937_v33 = vmax.f32 %v5026_v19, 0.0 }
 0x2b6   : > { %v2038_v34 = vpack.c.bf16 %v1934_v26, %v1930_v23  ;;  %v6952_v35 = vpack.c.bf16 %v1936_v28, %v1932_v24 }
 0x2b7   : > { %v2039_v36 = vpack.c.bf16 %v1935_v32, %v1931_v30  ;;  %v6954_v39 = vpack.c.bf16 %v1937_v33, %v1933_v31  ;;  %v1645_v46 = vpop.f32.mrb[24].mxu0  ;;  %v1871_v47 = vpop.f32.mrb[24].mxu1  ;;  %2950 = vmatpush1.bf16.msra.mxu0 %v5629_v20  ;;  %3176 = vmatpush1.bf16.msra.mxu1 %v5632_v21  ;;  %v5647_v30 = vld [vmem:[%s6544_s13 + $0x380] ss:$16 sps:$4 sm:$0xff]   ;;  %v5650_v31 = vld [vmem:[%s6544_s13 + $0x388] ss:$16 sps:$4 sm:$0xff]  }
 0x2b8   : > { %v4995_v50 = vadd.f32 %v1645_v46, %v6833_v42  ;;  %v5027_v52 = vadd.f32 %v1871_v47, %v6836_v43  ;;  %v1647_v54 = vpop.f32.mrb[25].mxu0  ;;  %v1873_v55 = vpop.f32.mrb[25].mxu1  ;;  %2951 = vmatprep.subr.bf16.mxu0 %v5637_v22  ;;  %3177 = vmatprep.subr.bf16.mxu1 %v5640_v29  ;;  %v5655_v46 = vld [vmem:[%s6544_s13 + $0x3a4] ss:$16 sps:$4 sm:$0xff]   ;;  %v5658_v47 = vld [vmem:[%s6544_s13 + $0x3ac] ss:$16 sps:$4 sm:$0xff]  }
 0x2b9   : > { %v4996_v60 = vadd.f32 %v1647_v54, %v6839_v44  ;;  %v5028_v61 = vadd.f32 %v1873_v55, %v6842_v45  ;;  %v1649_v62 = vpop.f32.mrb[26].mxu0  ;;  %v1875_v63 = vpop.f32.mrb[26].mxu1  ;;  %2900 = vmatprep.mubr.bf16.mxu0 %v2039_v36  ;;  %3126 = vmatprep.mubr.bf16.mxu1 %v2039_v36 }
 0x2ba   : > { %v4997_v0 = vadd.f32 %v1649_v62, %v6833_v42  ;;  %v5029_v1 = vadd.f32 %v1875_v63, %v6836_v43  ;;  %v1651_v2 = vpop.f32.mrb[27].mxu0  ;;  %v1877_v3 = vpop.f32.mrb[27].mxu1  ;;  %2901 = vmatmul.mubr.bf16.gmra.mrb[52].mxu0 %v2038_v34  ;;  %3127 = vmatmul.mubr.bf16.gmra.mrb[52].mxu1 %v2038_v34  ;;  %v1938_v13 = vmax.f32 %v4995_v50, 0.0  ;;  %v1940_v14 = vmax.f32 %v5027_v52, 0.0  ;;  %v5653_v62 = vld [vmem:[%s6544_s13 + $0x3a0] ss:$16 sps:$4 sm:$0xff]  }
 0x2bb   : > { %v4998_v4 = vadd.f32 %v1651_v2, %v6839_v44  ;;  %v5030_v5 = vadd.f32 %v1877_v3, %v6842_v45  ;;  %2952 = vmatpush1.bf16.msra.mxu0 %v5635_v48  ;;  %3178 = vmatpush1.bf16.msra.mxu1 %v5638_v49  ;;  %v1939_v18 = vmax.f32 %v4996_v60, 0.0  ;;  %v1941_v19 = vmax.f32 %v5028_v61, 0.0  ;;  %v5656_v63 = vld [vmem:[%s6544_s13 + $0x3a8] ss:$16 sps:$4 sm:$0xff]  }
 0x2bc   : > { %v1942_v15 = vmax.f32 %v4997_v0, 0.0  ;;  %v1944_v16 = vmax.f32 %v5029_v1, 0.0  ;;  %2953 = vmatprep.subr.bf16.mxu0 %v5643_v56  ;;  %3179 = vmatprep.subr.bf16.mxu1 %v5646_v58  ;;  %v5661_v0 = vld [vmem:[%s6544_s13 + $0x3c4] ss:$16 sps:$4 sm:$0xff]  }
 0x2bd   : > { %v1943_v20 = vmax.f32 %v4998_v4, 0.0  ;;  %v1945_v21 = vmax.f32 %v5030_v5, 0.0 }
 0x2be   : > { %v2042_v22 = vpack.c.bf16 %v1942_v15, %v1938_v13  ;;  %v6972_v23 = vpack.c.bf16 %v1944_v16, %v1940_v14  ;;  %v5659_v14 = vld [vmem:[%s6544_s13 + $0x3c0] ss:$16 sps:$4 sm:$0xff]   ;;  %v5662_v15 = vld [vmem:[%s6544_s13 + $0x3c8] ss:$16 sps:$4 sm:$0xff]   ;;  %v5667_v16 = vld [vmem:[%s6544_s13 + $0x3e4] ss:$16 sps:$4 sm:$0xff]  }
 0x2bf   : > { %v2043_v24 = vpack.c.bf16 %v1943_v20, %v1939_v18  ;;  %v6974_v26 = vpack.c.bf16 %v1945_v21, %v1941_v19  ;;  %v1655_v28 = vpop.f32.mrb[28].mxu0  ;;  %v1881_v29 = vpop.f32.mrb[28].mxu1  ;;  %2954 = vmatpush1.bf16.msra.mxu0 %v5641_v6  ;;  %3180 = vmatpush1.bf16.msra.mxu1 %v5644_v10  ;;  %v5665_v18 = vld [vmem:[%s6544_s13 + $0x3e0] ss:$16 sps:$4 sm:$0xff]   ;;  %v5668_v19 = vld [vmem:[%s6544_s13 + $0x3e8] ss:$16 sps:$4 sm:$0xff]  }
 0x2c0   : > { %v4999_v32 = vadd.f32 %v1655_v28, %v6833_v42  ;;  %v5031_v33 = vadd.f32 %v1881_v29, %v6836_v43  ;;  %v1657_v34 = vpop.f32.mrb[29].mxu0  ;;  %v1883_v36 = vpop.f32.mrb[29].mxu1  ;;  %2955 = vmatprep.subr.bf16.mxu0 %v5649_v12  ;;  %3181 = vmatprep.subr.bf16.mxu1 %v5652_v17  ;;  %v5670_v17 = vld [vmem:[%s6544_s13 + $0x3ec] ss:$16 sps:$4 sm:$0xff]  }
 0x2c1   : > { %v5000_v48 = vadd.f32 %v1657_v34, %v6839_v44  ;;  %v5032_v49 = vadd.f32 %v1883_v36, %v6842_v45  ;;  %v1659_v50 = vpop.f32.mrb[30].mxu0  ;;  %v1885_v52 = vpop.f32.mrb[30].mxu1  ;;  %2910 = vmatprep.mubr.bf16.mxu0 %v2043_v24  ;;  %3136 = vmatprep.mubr.bf16.mxu1 %v2043_v24  ;;  %v1962_v34 = vld [vmem:[#allocation2 + $0x40] sm:$0xff]  ;;  %v1964_v36 = vld [vmem:[#allocation2 + $0x50] sm:$0xff] }
 0x2c2   : > { %v5001_v54 = vadd.f32 %v1659_v50, %v6833_v42  ;;  %v5033_v55 = vadd.f32 %v1885_v52, %v6836_v43  ;;  %v1661_v56 = vpop.f32.mrb[31].mxu0  ;;  %v1887_v58 = vpop.f32.mrb[31].mxu1  ;;  %2911 = vmatmul.mubr.bf16.gmra.mrb[56].mxu0 %v2042_v22  ;;  %3137 = vmatmul.mubr.bf16.gmra.mrb[56].mxu1 %v2042_v22  ;;  %v1946_v1 = vmax.f32 %v4999_v32, 0.0  ;;  %v1948_v2 = vmax.f32 %v5031_v33, 0.0  ;;  %v5664_v43 = vld [vmem:[%s6544_s13 + $0x3cc] ss:$16 sps:$4 sm:$0xff]  }
 0x2c3   : > { %v5002_v60 = vadd.f32 %v1661_v56, %v6839_v44  ;;  %v5034_v61 = vadd.f32 %v1887_v58, %v6842_v45  ;;  %2956 = vmatpush1.bf16.msra.mxu0 %v5647_v30  ;;  %3182 = vmatpush1.bf16.msra.mxu1 %v5650_v31  ;;  %v1947_v4 = vmax.f32 %v5000_v48, 0.0  ;;  %v1949_v5 = vmax.f32 %v5032_v49, 0.0  ;;  %v1965_v48 = vld [vmem:[#allocation2 + $0x58] sm:$0xff]  ;;  %v1966_v49 = vld [vmem:[#allocation2 + $0x60] sm:$0xff]  ;;  %v1967_v56 = vld [vmem:[#allocation2 + $0x68] sm:$0xff] }
 0x2c4   : > { %v1950_v42 = vmax.f32 %v5001_v54, 0.0  ;;  %v1952_v3 = vmax.f32 %v5033_v55, 0.0  ;;  %2957 = vmatprep.subr.bf16.mxu0 %v5655_v46  ;;  %3183 = vmatprep.subr.bf16.mxu1 %v5658_v47  ;;  %v1963_v46 = vld [vmem:[#allocation2 + $0x48] sm:$0xff]  ;;  %v1968_v55 = vld [vmem:[#allocation2 + $0x70] sm:$0xff] }
 0x2c5   : > { %v1951_v44 = vmax.f32 %v5002_v60, 0.0  ;;  %v1953_v45 = vmax.f32 %v5034_v61, 0.0 }
 0x2c6   : > { %v2046_v6 = vpack.c.bf16 %v1950_v42, %v1946_v1  ;;  %v2048_v10 = vpack.c.bf16 %v1952_v3, %v1948_v2 }
 0x2c7   : > { %v2047_v12 = vpack.c.bf16 %v1951_v44, %v1947_v4  ;;  %v2049_v13 = vpack.c.bf16 %v1953_v45, %v1949_v5  ;;  %2958 = vmatpush1.bf16.msra.mxu0 %v5653_v62  ;;  %3184 = vmatpush1.bf16.msra.mxu1 %v5656_v63  ;;  %v1969_v63 = vld [vmem:[#allocation2 + $0x78] sm:$0xff]  ;;  %v1970_v44 = vld [vmem:[#allocation2 + $0x80] sm:$0xff]  ;;  %v1972_v45 = vld [vmem:[#allocation2 + $0x90] sm:$0xff] }
 0x2c8   : > { %2959 = vmatprep.subr.bf16.mxu0 %v5661_v0  ;;  %3185 = vmatprep.subr.bf16.mxu1 %v5664_v43 }
 0x2c9   : > { %2920 = vmatprep.mubr.bf16.mxu0 %v2047_v12  ;;  %3146 = vmatprep.mubr.bf16.mxu1 %v2047_v12  ;;  %v1973_v12 = vld [vmem:[#allocation2 + $0x98] sm:$0xff] }
 0x2ca   : > { %2921 = vmatmul.mubr.bf16.gmra.mrb[60].mxu0 %v2046_v6  ;;  %3147 = vmatmul.mubr.bf16.gmra.mrb[60].mxu1 %v2046_v6  ;;  %v1971_v6 = vld [vmem:[#allocation2 + $0x88] sm:$0xff] }
 0x2cb   : > { %2960 = vmatpush1.bf16.msra.mxu0 %v5659_v14  ;;  %2963 = vmatprep.mubr.bf16.mxu0 %v6854_v9 }
 0x2cc   : > { %3186 = vmatpush1.bf16.msra.mxu1 %v5662_v15  ;;  %3189 = vmatprep.mubr.bf16.mxu1 %v6854_v9  ;;  %v1956_v9 = vld [vmem:[#allocation2 + $0x10] sm:$0xff] }
 0x2cd   : > { %2961 = vmatprep.subr.bf16.mxu0 %v5667_v16  ;;  %3187 = vmatprep.subr.bf16.mxu1 %v5670_v17  ;;  %v1976_v17 = vld [vmem:[#allocation2 + $0xb0] sm:$0xff] }
 0x2cf   : > { %2962 = vmatpush1.bf16.msra.mxu0 %v5665_v18  ;;  %v1975_v18 = vld [vmem:[#allocation2 + $0xa8] sm:$0xff] }
 0x2d0   : > { %3188 = vmatpush1.bf16.msra.mxu1 %v5668_v19 }
 0x2d2   : > { %2964 = vmatmul.mubr.bf16.vlgmr.msra.gmra.mrb[32].mxu0 %v6852_v7 }
 0x2d3   : > { %3190 = vmatmul.mubr.bf16.vlgmr.msra.gmra.mrb[32].mxu1 %v6852_v7  ;;  %2973 = vmatprep.mubr.bf16.mxu0 %v6874_v53  ;;  %v1954_v7 = vld [vmem:[#allocation2] sm:$0xff] }
 0x2d4   : > { %3199 = vmatprep.mubr.bf16.mxu1 %v6874_v53 }
 0x2da   : > { %2974 = vmatmul.mubr.bf16.gmra.mrb[36].mxu0 %v6872_v51 }
 0x2db   : > { %3200 = vmatmul.mubr.bf16.gmra.mrb[36].mxu1 %v6872_v51  ;;  %2983 = vmatprep.mubr.bf16.mxu0 %v6894_v27  ;;  %v1955_v51 = vld [vmem:[#allocation2 + $0x8] sm:$0xff] }
 0x2dc   : > { %3209 = vmatprep.mubr.bf16.mxu1 %v6894_v27  ;;  %v1958_v27 = vld [vmem:[#allocation2 + $0x20] sm:$0xff] }
 0x2e2   : > { %2984 = vmatmul.mubr.bf16.gmra.mrb[40].mxu0 %v6892_v25 }
 0x2e3   : > { %3210 = vmatmul.mubr.bf16.gmra.mrb[40].mxu1 %v6892_v25  ;;  %2993 = vmatprep.mubr.bf16.mxu0 %v6914_v11  ;;  %v1957_v25 = vld [vmem:[#allocation2 + $0x18] sm:$0xff] }
 0x2e4   : > { %3219 = vmatprep.mubr.bf16.mxu1 %v6914_v11 }
 0x2ea   : > { %2994 = vmatmul.mubr.bf16.gmra.mrb[44].mxu0 %v6912_v8 }
 0x2eb   : > { %3220 = vmatmul.mubr.bf16.gmra.mrb[44].mxu1 %v6912_v8  ;;  %3003 = vmatprep.mubr.bf16.mxu0 %v6934_v59 }
 0x2ec   : > { %3229 = vmatprep.mubr.bf16.mxu1 %v6934_v59  ;;  %v1960_v59 = vld [vmem:[#allocation2 + $0x30] sm:$0xff] }
 0x2f2   : > { %3004 = vmatmul.mubr.bf16.gmra.mrb[48].mxu0 %v6932_v57 }
 0x2f3   : > { %3230 = vmatmul.mubr.bf16.gmra.mrb[48].mxu1 %v6932_v57  ;;  %3013 = vmatprep.mubr.bf16.mxu0 %v6954_v39 }
 0x2f4   : > { %3239 = vmatprep.mubr.bf16.mxu1 %v6954_v39 }
 0x2fa   : > { %3014 = vmatmul.mubr.bf16.gmra.mrb[52].mxu0 %v6952_v35 }
 0x2fb   : > { %3240 = vmatmul.mubr.bf16.gmra.mrb[52].mxu1 %v6952_v35  ;;  %3023 = vmatprep.mubr.bf16.mxu0 %v6974_v26  ;;  %v1959_v35 = vld [vmem:[#allocation2 + $0x28] sm:$0xff] }
 0x2fc   : > { %3249 = vmatprep.mubr.bf16.mxu1 %v6974_v26 }
 0x302   : > { %3024 = vmatmul.mubr.bf16.gmra.mrb[56].mxu0 %v6972_v23 }
 0x303   : > { %3250 = vmatmul.mubr.bf16.gmra.mrb[56].mxu1 %v6972_v23  ;;  %3033 = vmatprep.mubr.bf16.mxu0 %v2049_v13  ;;  %v1961_v23 = vld [vmem:[#allocation2 + $0x38] sm:$0xff] }
 0x304   : > { %3259 = vmatprep.mubr.bf16.mxu1 %v2049_v13  ;;  %v1974_v13 = vld [vmem:[#allocation2 + $0xa0] sm:$0xff] }
 0x30a   : > { %3034 = vmatmul.mubr.bf16.gmra.mrb[60].mxu0 %v2048_v10 }
 0x30b   : > { %3260 = vmatmul.mubr.bf16.gmra.mrb[60].mxu1 %v2048_v10 }
 0x3a5   : > { %v2965_v53 = vpop.f32.mrb[32].mxu0 }
 0x3a6   : > { %v3270_v8 = vadd.f32 %v2965_v53, %v1954_v7  ;;  %v3191_v11 = vpop.f32.mrb[32].mxu1  ;;  %v2967_v57 = vpop.f32.mrb[33].mxu0  ;;  %v1977_v53 = vld [vmem:[#allocation2 + $0xb8] sm:$0xff] }
 0x3a7   : > { %v3272_v39 = vadd.f32 %v3191_v11, %v1956_v9  ;;  %v3271_v20 = vadd.f32 %v2967_v57, %v1955_v51  ;;  %v3193_v21 = vpop.f32.mrb[33].mxu1  ;;  %v2969_v22 = vpop.f32.mrb[34].mxu0 }
 0x3a8   : > { %3334 = vst [vmem:[#allocation2] sm:$0xff] %v3270_v8  ;;  %v3273_v24 = vadd.f32 %v3193_v21, %v1957_v25  ;;  %v3274_v26 = vadd.f32 %v2969_v22, %v1958_v27  ;;  %v3195_v28 = vpop.f32.mrb[34].mxu1  ;;  %v2971_v29 = vpop.f32.mrb[35].mxu0  ;;  %v1980_v21 = vld [vmem:[#allocation2 + $0xd0] sm:$0xff]  ;;  %v1979_v22 = vld [vmem:[#allocation2 + $0xc8] sm:$0xff] }
 0x3a9   : > { %3336 = vst [vmem:[#allocation2 + $0x10] sm:$0xff] %v3272_v39  ;;  %3335 = vst [vmem:[#allocation2 + $0x8] sm:$0xff] %v3271_v20  ;;  %v3276_v30 = vadd.f32 %v3195_v28, %v1960_v59  ;;  %v3275_v31 = vadd.f32 %v2971_v29, %v1959_v35  ;;  %v3197_v32 = vpop.f32.mrb[35].mxu1  ;;  %v1978_v20 = vld [vmem:[#allocation2 + $0xc0] sm:$0xff] }
 0x3aa   : > { %3337 = vst [vmem:[#allocation2 + $0x18] sm:$0xff] %v3273_v24  ;;  %3338 = vst [vmem:[#allocation2 + $0x20] sm:$0xff] %v3274_v26  ;;  %v3277_v33 = vadd.f32 %v3197_v32, %v1961_v23  ;;  %v1981_v24 = vld [vmem:[#allocation2 + $0xd8] sm:$0xff]  ;;  %v1982_v26 = vld [vmem:[#allocation2 + $0xe0] sm:$0xff] }
 0x3ab   : > { %3340 = vst [vmem:[#allocation2 + $0x30] sm:$0xff] %v3276_v30  ;;  %3339 = vst [vmem:[#allocation2 + $0x28] sm:$0xff] %v3275_v31  ;;  %v1984_v31 = vld [vmem:[#allocation2 + $0xf0] sm:$0xff]  ;;  %v1983_v32 = vld [vmem:[#allocation2 + $0xe8] sm:$0xff] }
 0x3ac   : > { %3341 = vst [vmem:[#allocation2 + $0x38] sm:$0xff] %v3277_v33 }
 0x3ad   : > { %v2975_v47 = vpop.f32.mrb[36].mxu0 }
 0x3ae   : > { %v3278_v50 = vadd.f32 %v2975_v47, %v1962_v34  ;;  %v3201_v52 = vpop.f32.mrb[36].mxu1  ;;  %v2977_v54 = vpop.f32.mrb[37].mxu0  ;;  %v1985_v47 = vld [vmem:[#allocation2 + $0xf8] sm:$0xff] }
 0x3af   : > { %v3280_v58 = vadd.f32 %v3201_v52, %v1964_v36  ;;  %v3279_v60 = vadd.f32 %v2977_v54, %v1963_v46  ;;  %v3203_v61 = vpop.f32.mrb[37].mxu1  ;;  %v2979_v62 = vpop.f32.mrb[38].mxu0 }
 0x3b0   : > { %3342 = vst [vmem:[#allocation2 + $0x40] sm:$0xff] %v3278_v50  ;;  %v3281_v0 = vadd.f32 %v3203_v61, %v1965_v48  ;;  %v3282_v1 = vadd.f32 %v2979_v62, %v1966_v49  ;;  %v3205_v2 = vpop.f32.mrb[38].mxu1  ;;  %v2981_v42 = vpop.f32.mrb[39].mxu0  ;;  %v1988_v61 = vld [vmem:[#allocation2 + $0x110] sm:$0xff]  ;;  %v1987_v62 = vld [vmem:[#allocation2 + $0x108] sm:$0xff] }
 0x3b1   : > { %3344 = vst [vmem:[#allocation2 + $0x50] sm:$0xff] %v3280_v58  ;;  %3343 = vst [vmem:[#allocation2 + $0x48] sm:$0xff] %v3279_v60  ;;  %v3284_v3 = vadd.f32 %v3205_v2, %v1968_v55  ;;  %v3283_v43 = vadd.f32 %v2981_v42, %v1967_v56  ;;  %v3207_v4 = vpop.f32.mrb[39].mxu1  ;;  %v1986_v60 = vld [vmem:[#allocation2 + $0x100] sm:$0xff] }
 0x3b2   : > { %3345 = vst [vmem:[#allocation2 + $0x58] sm:$0xff] %v3281_v0  ;;  %3346 = vst [vmem:[#allocation2 + $0x60] sm:$0xff] %v3282_v1  ;;  %v3285_v5 = vadd.f32 %v3207_v4, %v1969_v63  ;;  %v1989_v0 = vld [vmem:[#allocation2 + $0x118] sm:$0xff]  ;;  %v1990_v1 = vld [vmem:[#allocation2 + $0x120] sm:$0xff] }
 0x3b3   : > { %3348 = vst [vmem:[#allocation2 + $0x70] sm:$0xff] %v3284_v3  ;;  %3347 = vst [vmem:[#allocation2 + $0x68] sm:$0xff] %v3283_v43  ;;  %v1992_v43 = vld [vmem:[#allocation2 + $0x130] sm:$0xff]  ;;  %v1991_v4 = vld [vmem:[#allocation2 + $0x128] sm:$0xff] }
 0x3b4   : > { %3349 = vst [vmem:[#allocation2 + $0x78] sm:$0xff] %v3285_v5 }
 0x3b5   : > { %v2985_v10 = vpop.f32.mrb[40].mxu0 }
 0x3b6   : > { %v3286_v14 = vadd.f32 %v2985_v10, %v1970_v44  ;;  %v3211_v15 = vpop.f32.mrb[40].mxu1  ;;  %v2987_v16 = vpop.f32.mrb[41].mxu0  ;;  %v1993_v10 = vld [vmem:[#allocation2 + $0x138] sm:$0xff] }
 0x3b7   : > { %v3288_v19 = vadd.f32 %v3211_v15, %v1972_v45  ;;  %v3287_v7 = vadd.f32 %v2987_v16, %v1971_v6  ;;  %v3213_v9 = vpop.f32.mrb[41].mxu1  ;;  %v2989_v51 = vpop.f32.mrb[42].mxu0 }
 0x3b8   : > { %3350 = vst [vmem:[#allocation2 + $0x80] sm:$0xff] %v3286_v14  ;;  %v3289_v25 = vadd.f32 %v3213_v9, %v1973_v12  ;;  %v3290_v27 = vadd.f32 %v2989_v51, %v1974_v13  ;;  %v3215_v8 = vpop.f32.mrb[42].mxu1  ;;  %v2991_v11 = vpop.f32.mrb[43].mxu0  ;;  %v1996_v9 = vld [vmem:[#allocation2 + $0x150] sm:$0xff]  ;;  %v1995_v51 = vld [vmem:[#allocation2 + $0x148] sm:$0xff] }
 0x3b9   : > { %3352 = vst [vmem:[#allocation2 + $0x90] sm:$0xff] %v3288_v19  ;;  %3351 = vst [vmem:[#allocation2 + $0x88] sm:$0xff] %v3287_v7  ;;  %v3292_v57 = vadd.f32 %v3215_v8, %v1976_v17  ;;  %v3291_v59 = vadd.f32 %v2991_v11, %v1975_v18  ;;  %v3217_v35 = vpop.f32.mrb[43].mxu1  ;;  %v1994_v7 = vld [vmem:[#allocation2 + $0x140] sm:$0xff] }
 0x3ba   : > { %3353 = vst [vmem:[#allocation2 + $0x98] sm:$0xff] %v3289_v25  ;;  %3354 = vst [vmem:[#allocation2 + $0xa0] sm:$0xff] %v3290_v27  ;;  %v3293_v39 = vadd.f32 %v3217_v35, %v1977_v53  ;;  %v1997_v25 = vld [vmem:[#allocation2 + $0x158] sm:$0xff]  ;;  %v1998_v27 = vld [vmem:[#allocation2 + $0x160] sm:$0xff] }
 0x3bb   : > { %3356 = vst [vmem:[#allocation2 + $0xb0] sm:$0xff] %v3292_v57  ;;  %3355 = vst [vmem:[#allocation2 + $0xa8] sm:$0xff] %v3291_v59  ;;  %v2000_v59 = vld [vmem:[#allocation2 + $0x170] sm:$0xff]  ;;  %v1999_v35 = vld [vmem:[#allocation2 + $0x168] sm:$0xff] }
 0x3bc   : > { %3357 = vst [vmem:[#allocation2 + $0xb8] sm:$0xff] %v3293_v39 }
 0x3bd   : > { %v2995_v23 = vpop.f32.mrb[44].mxu0 }
 0x3be   : > { %v3294_v28 = vadd.f32 %v2995_v23, %v1978_v20  ;;  %v3221_v29 = vpop.f32.mrb[44].mxu1  ;;  %v2997_v30 = vpop.f32.mrb[45].mxu0  ;;  %v2001_v23 = vld [vmem:[#allocation2 + $0x178] sm:$0xff] }
 0x3bf   : > { %v3296_v33 = vadd.f32 %v3221_v29, %v1980_v21  ;;  %v3295_v34 = vadd.f32 %v2997_v30, %v1979_v22  ;;  %v3223_v36 = vpop.f32.mrb[45].mxu1  ;;  %v2999_v46 = vpop.f32.mrb[46].mxu0 }
 0x3c0   : > { %3358 = vst [vmem:[#allocation2 + $0xc0] sm:$0xff] %v3294_v28  ;;  %v3297_v48 = vadd.f32 %v3223_v36, %v1981_v24  ;;  %v3298_v49 = vadd.f32 %v2999_v46, %v1982_v26  ;;  %v3225_v50 = vpop.f32.mrb[46].mxu1  ;;  %v3001_v52 = vpop.f32.mrb[47].mxu0  ;;  %v2004_v36 = vld [vmem:[#allocation2 + $0x190] sm:$0xff]  ;;  %v2003_v46 = vld [vmem:[#allocation2 + $0x188] sm:$0xff] }
 0x3c1   : > { %3360 = vst [vmem:[#allocation2 + $0xd0] sm:$0xff] %v3296_v33  ;;  %3359 = vst [vmem:[#allocation2 + $0xc8] sm:$0xff] %v3295_v34  ;;  %v3300_v54 = vadd.f32 %v3225_v50, %v1984_v31  ;;  %v3299_v55 = vadd.f32 %v3001_v52, %v1983_v32  ;;  %v3227_v56 = vpop.f32.mrb[47].mxu1  ;;  %v2002_v34 = vld [vmem:[#allocation2 + $0x180] sm:$0xff] }
 0x3c2   : > { %3361 = vst [vmem:[#allocation2 + $0xd8] sm:$0xff] %v3297_v48  ;;  %3362 = vst [vmem:[#allocation2 + $0xe0] sm:$0xff] %v3298_v49  ;;  %v3301_v58 = vadd.f32 %v3227_v56, %v1985_v47  ;;  %v2005_v48 = vld [vmem:[#allocation2 + $0x198] sm:$0xff]  ;;  %v2006_v49 = vld [vmem:[#allocation2 + $0x1a0] sm:$0xff] }
 0x3c3   : > { %3364 = vst [vmem:[#allocation2 + $0xf0] sm:$0xff] %v3300_v54  ;;  %3363 = vst [vmem:[#allocation2 + $0xe8] sm:$0xff] %v3299_v55  ;;  %v2008_v55 = vld [vmem:[#allocation2 + $0x1b0] sm:$0xff]  ;;  %v2007_v56 = vld [vmem:[#allocation2 + $0x1a8] sm:$0xff] }
 0x3c4   : > { %3365 = vst [vmem:[#allocation2 + $0xf8] sm:$0xff] %v3301_v58 }
 0x3c5   : > { %v3005_v63 = vpop.f32.mrb[48].mxu0 }
 0x3c6   : > { %v3302_v2 = vadd.f32 %v3005_v63, %v1986_v60  ;;  %v3231_v42 = vpop.f32.mrb[48].mxu1  ;;  %v3007_v3 = vpop.f32.mrb[49].mxu0  ;;  %v2009_v63 = vld [vmem:[#allocation2 + $0x1b8] sm:$0xff] }
 0x3c7   : > { %v3304_v5 = vadd.f32 %v3231_v42, %v1988_v61  ;;  %v3303_v44 = vadd.f32 %v3007_v3, %v1987_v62  ;;  %v3233_v45 = vpop.f32.mrb[49].mxu1  ;;  %v3009_v6 = vpop.f32.mrb[50].mxu0 }
 0x3c8   : > { %3366 = vst [vmem:[#allocation2 + $0x100] sm:$0xff] %v3302_v2  ;;  %v3305_v12 = vadd.f32 %v3233_v45, %v1989_v0  ;;  %v3306_v13 = vadd.f32 %v3009_v6, %v1990_v1  ;;  %v3235_v14 = vpop.f32.mrb[50].mxu1  ;;  %v3011_v15 = vpop.f32.mrb[51].mxu0  ;;  %v2012_v45 = vld [vmem:[#allocation2 + $0x1d0] sm:$0xff]  ;;  %v2011_v6 = vld [vmem:[#allocation2 + $0x1c8] sm:$0xff] }
 0x3c9   : > { %3368 = vst [vmem:[#allocation2 + $0x110] sm:$0xff] %v3304_v5  ;;  %3367 = vst [vmem:[#allocation2 + $0x108] sm:$0xff] %v3303_v44  ;;  %v3308_v16 = vadd.f32 %v3235_v14, %v1992_v43  ;;  %v3307_v17 = vadd.f32 %v3011_v15, %v1991_v4  ;;  %v3237_v18 = vpop.f32.mrb[51].mxu1  ;;  %v2010_v44 = vld [vmem:[#allocation2 + $0x1c0] sm:$0xff] }
 0x3ca   : > { %3369 = vst [vmem:[#allocation2 + $0x118] sm:$0xff] %v3305_v12  ;;  %3370 = vst [vmem:[#allocation2 + $0x120] sm:$0xff] %v3306_v13  ;;  %v3309_v19 = vadd.f32 %v3237_v18, %v1993_v10  ;;  %v2013_v12 = vld [vmem:[#allocation2 + $0x1d8] sm:$0xff]  ;;  %v2014_v13 = vld [vmem:[#allocation2 + $0x1e0] sm:$0xff] }
 0x3cb   : > { %3372 = vst [vmem:[#allocation2 + $0x130] sm:$0xff] %v3308_v16  ;;  %3371 = vst [vmem:[#allocation2 + $0x128] sm:$0xff] %v3307_v17  ;;  %v2016_v17 = vld [vmem:[#allocation2 + $0x1f0] sm:$0xff]  ;;  %v2015_v18 = vld [vmem:[#allocation2 + $0x1e8] sm:$0xff] }
 0x3cc   : > { %3373 = vst [vmem:[#allocation2 + $0x138] sm:$0xff] %v3309_v19 }
 0x3cd   : > { %v3015_v53 = vpop.f32.mrb[52].mxu0 }
 0x3ce   : > { %v3310_v8 = vadd.f32 %v3015_v53, %v1994_v7  ;;  %v3241_v11 = vpop.f32.mrb[52].mxu1  ;;  %v3017_v57 = vpop.f32.mrb[53].mxu0  ;;  %v2017_v53 = vld [vmem:[#allocation2 + $0x1f8] sm:$0xff] }
 0x3cf   : > { %v3312_v39 = vadd.f32 %v3241_v11, %v1996_v9  ;;  %v3311_v20 = vadd.f32 %v3017_v57, %v1995_v51  ;;  %v3243_v21 = vpop.f32.mrb[53].mxu1  ;;  %v3019_v22 = vpop.f32.mrb[54].mxu0 }
 0x3d0   : > { %3374 = vst [vmem:[#allocation2 + $0x140] sm:$0xff] %v3310_v8  ;;  %v3313_v24 = vadd.f32 %v3243_v21, %v1997_v25  ;;  %v3314_v26 = vadd.f32 %v3019_v22, %v1998_v27  ;;  %v3245_v28 = vpop.f32.mrb[54].mxu1  ;;  %v3021_v29 = vpop.f32.mrb[55].mxu0  ;;  %v5673_v21 = vld [vmem:[#allocation12 + $0xc] ss:$16 sps:$4 sm:$0xff] (!%p4896_p11)  }
 0x3d1   : > { %3376 = vst [vmem:[#allocation2 + $0x150] sm:$0xff] %v3312_v39  ;;  %3375 = vst [vmem:[#allocation2 + $0x148] sm:$0xff] %v3311_v20  ;;  %v3316_v30 = vadd.f32 %v3245_v28, %v2000_v59  ;;  %v3315_v31 = vadd.f32 %v3021_v29, %v1999_v35  ;;  %v3247_v32 = vpop.f32.mrb[55].mxu1  ;;  %v5671_v20 = vld [vmem:[#allocation12 + $0x4] ss:$16 sps:$4 sm:$0xff] (!%p4896_p11)   ;;  %4259 = vmatprep.subr.bf16.mxu1 (!%p4896_p11), %v5673_v21 }
 0x3d2   : > { %3377 = vst [vmem:[#allocation2 + $0x158] sm:$0xff] %v3313_v24  ;;  %3378 = vst [vmem:[#allocation2 + $0x160] sm:$0xff] %v3314_v26  ;;  %v3317_v33 = vadd.f32 %v3247_v32, %v2001_v23  ;;  %4146 = vmatprep.subr.bf16.mxu0 (!%p4896_p11), %v5671_v20  ;;  %v5675_v22 = vld [vmem:[#allocation12] ss:$16 sps:$4 sm:$0xff] (!%p4896_p11)   ;;  %v5676_v23 = vld [vmem:[#allocation12 + $0x8] ss:$16 sps:$4 sm:$0xff] (!%p4896_p11)  }
 0x3d3   : > { %3380 = vst [vmem:[#allocation2 + $0x170] sm:$0xff] %v3316_v30  ;;  %3379 = vst [vmem:[#allocation2 + $0x168] sm:$0xff] %v3315_v31  ;;  %v5677_v24 = vld [vmem:[#allocation12 + $0x24] ss:$16 sps:$4 sm:$0xff] (!%p4896_p11)   ;;  %4147 = vmatpush1.bf16.msra.mxu0 (!%p4896_p11), %v5675_v22  ;;  %4260 = vmatpush1.bf16.msra.mxu1 (!%p4896_p11), %v5676_v23  ;;  %v5679_v26 = vld [vmem:[#allocation12 + $0x2c] ss:$16 sps:$4 sm:$0xff] (!%p4896_p11)  }
 0x3d4   : > { %3381 = vst [vmem:[#allocation2 + $0x178] sm:$0xff] %v3317_v33  ;;  %v5681_v28 = vld [vmem:[#allocation12 + $0x20] ss:$16 sps:$4 sm:$0xff] (!%p4896_p11)   ;;  %4148 = vmatprep.subr.bf16.mxu0 (!%p4896_p11), %v5677_v24  ;;  %v5682_v29 = vld [vmem:[#allocation12 + $0x28] ss:$16 sps:$4 sm:$0xff] (!%p4896_p11)   ;;  %4261 = vmatprep.subr.bf16.mxu1 (!%p4896_p11), %v5679_v26 }
 0x3d5   : > { %v3025_v47 = vpop.f32.mrb[56].mxu0  ;;  %v5683_v30 = vld [vmem:[#allocation12 + $0x44] ss:$16 sps:$4 sm:$0xff] (!%p4896_p11)   ;;  %v5685_v31 = vld [vmem:[#allocation12 + $0x4c] ss:$16 sps:$4 sm:$0xff] (!%p4896_p11)  }
 0x3d6   : > { %v3318_v50 = vadd.f32 %v3025_v47, %v2002_v34  ;;  %v3251_v52 = vpop.f32.mrb[56].mxu1  ;;  %v3027_v54 = vpop.f32.mrb[57].mxu0  ;;  %v5687_v32 = vld [vmem:[#allocation12 + $0x40] ss:$16 sps:$4 sm:$0xff] (!%p4896_p11)   ;;  %v5688_v33 = vld [vmem:[#allocation12 + $0x48] ss:$16 sps:$4 sm:$0xff] (!%p4896_p11)  }
 0x3d7   : > { %v3320_v58 = vadd.f32 %v3251_v52, %v2004_v36  ;;  %v3319_v60 = vadd.f32 %v3027_v54, %v2003_v46  ;;  %v3253_v61 = vpop.f32.mrb[57].mxu1  ;;  %v3029_v62 = vpop.f32.mrb[58].mxu0  ;;  %4149 = vmatpush1.bf16.msra.mxu0 (!%p4896_p11), %v5681_v28  ;;  %4262 = vmatpush1.bf16.msra.mxu1 (!%p4896_p11), %v5682_v29  ;;  %v5689_v34 = vld [vmem:[#allocation12 + $0x64] ss:$16 sps:$4 sm:$0xff] (!%p4896_p11)   ;;  %v5691_v36 = vld [vmem:[#allocation12 + $0x6c] ss:$16 sps:$4 sm:$0xff] (!%p4896_p11)  }
 0x3d8   : > { %3382 = vst [vmem:[#allocation2 + $0x180] sm:$0xff] %v3318_v50  ;;  %v3321_v0 = vadd.f32 %v3253_v61, %v2005_v48  ;;  %v3322_v1 = vadd.f32 %v3029_v62, %v2006_v49  ;;  %v3255_v2 = vpop.f32.mrb[58].mxu1  ;;  %v3031_v42 = vpop.f32.mrb[59].mxu0  ;;  %4150 = vmatprep.subr.bf16.mxu0 (!%p4896_p11), %v5683_v30  ;;  %4263 = vmatprep.subr.bf16.mxu1 (!%p4896_p11), %v5685_v31  ;;  %v5693_v46 = vld [vmem:[#allocation12 + $0x60] ss:$16 sps:$4 sm:$0xff] (!%p4896_p11)   ;;  %v3408_v20 = vld [vmem:[#allocation2 + $0x30] sm:$0xff] (!%p4896_p11) }
 0x3d9   : > { %3384 = vst [vmem:[#allocation2 + $0x190] sm:$0xff] %v3320_v58  ;;  %3383 = vst [vmem:[#allocation2 + $0x188] sm:$0xff] %v3319_v60  ;;  %v3324_v3 = vadd.f32 %v3255_v2, %v2008_v55  ;;  %v3323_v43 = vadd.f32 %v3031_v42, %v2007_v56  ;;  %v3257_v4 = vpop.f32.mrb[59].mxu1  ;;  %v5694_v47 = vld [vmem:[#allocation12 + $0x68] ss:$16 sps:$4 sm:$0xff] (!%p4896_p11)   ;;  %v3403_v22 = vld [vmem:[#allocation2 + $0x8] sm:$0xff] (!%p4896_p11) }
 0x3da   : > { %3385 = vst [vmem:[#allocation2 + $0x198] sm:$0xff] %v3321_v0  ;;  %3386 = vst [vmem:[#allocation2 + $0x1a0] sm:$0xff] %v3322_v1  ;;  %v3325_v5 = vadd.f32 %v3257_v4, %v2009_v63  ;;  %v5695_v48 = vld [vmem:[#allocation12 + $0x84] ss:$16 sps:$4 sm:$0xff] (!%p4896_p11)   ;;  %v5697_v49 = vld [vmem:[#allocation12 + $0x8c] ss:$16 sps:$4 sm:$0xff] (!%p4896_p11)  }
 0x3db   : > { %3388 = vst [vmem:[#allocation2 + $0x1b0] sm:$0xff] %v3324_v3  ;;  %3387 = vst [vmem:[#allocation2 + $0x1a8] sm:$0xff] %v3323_v43  ;;  %4151 = vmatpush1.bf16.msra.mxu0 (!%p4896_p11), %v5687_v32  ;;  %4264 = vmatpush1.bf16.msra.mxu1 (!%p4896_p11), %v5688_v33  ;;  %v5699_v50 = vld [vmem:[#allocation12 + $0x80] ss:$16 sps:$4 sm:$0xff] (!%p4896_p11)   ;;  %v5700_v52 = vld [vmem:[#allocation12 + $0x88] ss:$16 sps:$4 sm:$0xff] (!%p4896_p11)  }
 0x3dc   : > { %3389 = vst [vmem:[#allocation2 + $0x1b8] sm:$0xff] %v3325_v5  ;;  %4152 = vmatprep.subr.bf16.mxu0 (!%p4896_p11), %v5689_v34  ;;  %4265 = vmatprep.subr.bf16.mxu1 (!%p4896_p11), %v5691_v36  ;;  %v5701_v54 = vld [vmem:[#allocation12 + $0xa4] ss:$16 sps:$4 sm:$0xff] (!%p4896_p11)   ;;  %v5703_v55 = vld [vmem:[#allocation12 + $0xac] ss:$16 sps:$4 sm:$0xff] (!%p4896_p11)  }
 0x3dd   : > { %v3035_v10 = vpop.f32.mrb[60].mxu0  ;;  %v5705_v56 = vld [vmem:[#allocation12 + $0xa0] ss:$16 sps:$4 sm:$0xff] (!%p4896_p11)   ;;  %v5706_v58 = vld [vmem:[#allocation12 + $0xa8] ss:$16 sps:$4 sm:$0xff] (!%p4896_p11)  }
 0x3de   : > { %v3326_v14 = vadd.f32 %v3035_v10, %v2010_v44  ;;  %v3261_v15 = vpop.f32.mrb[60].mxu1  ;;  %v3037_v16 = vpop.f32.mrb[61].mxu0  ;;  %3401 = sbr.rel (%p4896_p11) target bundleno = 1316 (0x524), region = 92  ;;  %v5707_v60 = vld [vmem:[#allocation12 + $0xc4] ss:$16 sps:$4 sm:$0xff] (!%p4896_p11)   ;;  %v3413_v26 = vld [vmem:[#allocation2 + $0x58] sm:$0xff] (!%p4896_p11) }
 0x3df   : > { %v3328_v19 = vadd.f32 %v3261_v15, %v2012_v45  ;;  %v3327_v7 = vadd.f32 %v3037_v16, %v2011_v6  ;;  %v3263_v9 = vpop.f32.mrb[61].mxu1  ;;  %v3039_v51 = vpop.f32.mrb[62].mxu0  ;;  %4153 = vmatpush1.bf16.msra.mxu0 (!%p4896_p11), %v5693_v46  ;;  %4266 = vmatpush1.bf16.msra.mxu1 (!%p4896_p11), %v5694_v47  ;;  %v5709_v61 = vld [vmem:[#allocation12 + $0xcc] ss:$16 sps:$4 sm:$0xff] (!%p4896_p11)   ;;  %v5711_v62 = vld [vmem:[#allocation12 + $0xc0] ss:$16 sps:$4 sm:$0xff] (!%p4896_p11)  }
 0x3e0   : > { %3390 = vst [vmem:[#allocation2 + $0x1c0] sm:$0xff] %v3326_v14  ;;  %v3329_v25 = vadd.f32 %v3263_v9, %v2013_v12  ;;  %v3330_v27 = vadd.f32 %v3039_v51, %v2014_v13  ;;  %v3265_v8 = vpop.f32.mrb[62].mxu1  ;;  %v3041_v11 = vpop.f32.mrb[63].mxu0  ;;  %4154 = vmatprep.subr.bf16.mxu0 (!%p4896_p11), %v5695_v48  ;;  %4267 = vmatprep.subr.bf16.mxu1 (!%p4896_p11), %v5697_v49  ;;  %v5712_v63 = vld [vmem:[#allocation12 + $0xc8] ss:$16 sps:$4 sm:$0xff] (!%p4896_p11)   ;;  %v3405_v9 = vld [vmem:[#allocation2 + $0x18] sm:$0xff] (!%p4896_p11) }
 0x3e1   : > { %3392 = vst [vmem:[#allocation2 + $0x1d0] sm:$0xff] %v3328_v19  ;;  %3391 = vst [vmem:[#allocation2 + $0x1c8] sm:$0xff] %v3327_v7  ;;  %v3332_v57 = vadd.f32 %v3265_v8, %v2016_v17  ;;  %v3331_v59 = vadd.f32 %v3041_v11, %v2015_v18  ;;  %v3267_v35 = vpop.f32.mrb[63].mxu1  ;;  %v5713_v0 = vld [vmem:[#allocation12 + $0xe4] ss:$16 sps:$4 sm:$0xff] (!%p4896_p11)   ;;  %v3409_v51 = vld [vmem:[#allocation2 + $0x38] sm:$0xff] (!%p4896_p11) }
 0x3e2   : > { %3393 = vst [vmem:[#allocation2 + $0x1d8] sm:$0xff] %v3329_v25  ;;  %3394 = vst [vmem:[#allocation2 + $0x1e0] sm:$0xff] %v3330_v27  ;;  %v3333_v39 = vadd.f32 %v3267_v35, %v2017_v53  ;;  %v5715_v1 = vld [vmem:[#allocation12 + $0xec] ss:$16 sps:$4 sm:$0xff] (!%p4896_p11)   ;;  %v5717_v2 = vld [vmem:[#allocation12 + $0xe0] ss:$16 sps:$4 sm:$0xff] (!%p4896_p11)  }
 0x3e3   : > { %3396 = vst [vmem:[#allocation2 + $0x1f0] sm:$0xff] %v3332_v57  ;;  %3395 = vst [vmem:[#allocation2 + $0x1e8] sm:$0xff] %v3331_v59  ;;  %4155 = vmatpush1.bf16.msra.mxu0 (!%p4896_p11), %v5699_v50  ;;  %4268 = vmatpush1.bf16.msra.mxu1 (!%p4896_p11), %v5700_v52  ;;  %v5718_v42 = vld [vmem:[#allocation12 + $0xe8] ss:$16 sps:$4 sm:$0xff] (!%p4896_p11)   ;;  %v5719_v3 = vld [vmem:[#allocation12 + $0x104] ss:$16 sps:$4 sm:$0xff] (!%p4896_p11)  }
 0x3e4   : > { %3397 = vst [vmem:[#allocation2 + $0x1f8] sm:$0xff] %v3333_v39  ;;  %4156 = vmatprep.subr.bf16.mxu0 (!%p4896_p11), %v5701_v54  ;;  %4269 = vmatprep.subr.bf16.mxu1 (!%p4896_p11), %v5703_v55  ;;  %v5721_v43 = vld [vmem:[#allocation12 + $0x10c] ss:$16 sps:$4 sm:$0xff] (!%p4896_p11)   ;;  %v5723_v4 = vld [vmem:[#allocation12 + $0x100] ss:$16 sps:$4 sm:$0xff] (!%p4896_p11)   ;;  %v3404_v57 = vld [vmem:[#allocation2 + $0x10] sm:$0xff] (!%p4896_p11) }
 0x3e5   : > { %v5724_v5 = vld [vmem:[#allocation12 + $0x108] ss:$16 sps:$4 sm:$0xff]   ;;  %v5725_v44 = vld [vmem:[#allocation12 + $0x124] ss:$16 sps:$4 sm:$0xff]   ;;  %v5727_v45 = vld [vmem:[#allocation12 + $0x12c] ss:$16 sps:$4 sm:$0xff]  }
 0x3e6   : > { %v5729_v6 = vld [vmem:[#allocation12 + $0x120] ss:$16 sps:$4 sm:$0xff]   ;;  %v5730_v10 = vld [vmem:[#allocation12 + $0x128] ss:$16 sps:$4 sm:$0xff]   ;;  %v5731_v12 = vld [vmem:[#allocation12 + $0x144] ss:$16 sps:$4 sm:$0xff]  }
 0x3e7   : > { %4157 = vmatpush1.bf16.msra.mxu0 %v5705_v56  ;;  %4270 = vmatpush1.bf16.msra.mxu1 %v5706_v58  ;;  %v5733_v13 = vld [vmem:[#allocation12 + $0x14c] ss:$16 sps:$4 sm:$0xff]   ;;  %v5735_v14 = vld [vmem:[#allocation12 + $0x140] ss:$16 sps:$4 sm:$0xff]   ;;  %v5736_v15 = vld [vmem:[#allocation12 + $0x148] ss:$16 sps:$4 sm:$0xff]  }
 0x3e8   : > { %4158 = vmatprep.subr.bf16.mxu0 %v5707_v60  ;;  %4271 = vmatprep.subr.bf16.mxu1 %v5709_v61  ;;  %v5737_v16 = vld [vmem:[#allocation12 + $0x164] ss:$16 sps:$4 sm:$0xff]   ;;  %v5739_v17 = vld [vmem:[#allocation12 + $0x16c] ss:$16 sps:$4 sm:$0xff]   ;;  %v5741_v18 = vld [vmem:[#allocation12 + $0x160] ss:$16 sps:$4 sm:$0xff]  }
 0x3e9   : > { %v5742_v19 = vld [vmem:[#allocation12 + $0x168] ss:$16 sps:$4 sm:$0xff]   ;;  %v5743_v7 = vld [vmem:[#allocation12 + $0x184] ss:$16 sps:$4 sm:$0xff]   ;;  %v3466_v53 = vld [vmem:[#allocation11] sm:$0xf] }
 0x3ea   : > { %v5745_v25 = vld [vmem:[#allocation12 + $0x18c] ss:$16 sps:$4 sm:$0xff]   ;;  %v7028_v27 = vrot.slane %v3466_v53, %v6824_v38  ;;  %v7031_v8 = vrot.slane %v3466_v53, %v6830_v41  ;;  %v3616_v11 = vld [vmem:[#allocation15] sm:$0x3]  ;;  %v5747_v59 = vld [vmem:[#allocation12 + $0x180] ss:$16 sps:$4 sm:$0xff]   ;;  %v7034_v39 = vrot.slane %v3466_v53, %v6828_v40  ;;  %v7042_v32 = vrot.slane %v3466_v53, %v6822_v37 }
 0x3eb   : > { %4159 = vmatpush1.bf16.msra.mxu0 %v5711_v62  ;;  %4272 = vmatpush1.bf16.msra.mxu1 %v5712_v63  ;;  %v5748_v35 = vld [vmem:[#allocation12 + $0x188] ss:$16 sps:$4 sm:$0xff]   ;;  %v5749_v21 = vld [vmem:[#allocation12 + $0x1a4] ss:$16 sps:$4 sm:$0xff]   ;;  %v3417_v28 = vld [vmem:[#allocation2 + $0x78] sm:$0xff]  ;;  %v7039_v31 = vrot.slane %v3616_v11, %v6822_v37  ;;  %v7046_v47 = vrot.slane %v3616_v11, %v6828_v40 }
 0x3ec   : > { %4160 = vmatprep.subr.bf16.mxu0 %v5713_v0  ;;  %4273 = vmatprep.subr.bf16.mxu1 %v5715_v1  ;;  %v3491_v23 = vadd.f32 %v7031_v8, %v3405_v9  ;;  %v3495_v24 = vadd.f32 %v7031_v8, %v3409_v51  ;;  %v5751_v29 = vld [vmem:[#allocation12 + $0x1ac] ss:$16 sps:$4 sm:$0xff]   ;;  %v3490_v33 = vadd.f32 %v7028_v27, %v3404_v57  ;;  %v3412_v34 = vld [vmem:[#allocation2 + $0x50] sm:$0xff]  ;;  %v3402_v48 = vld [vmem:[#allocation2] sm:$0xff] }
 0x3ed   : > { %v3407_v30 = vld [vmem:[#allocation2 + $0x28] sm:$0xff]  ;;  %v3494_v49 = vadd.f32 %v7028_v27, %v3408_v20  ;;  %v5754_v52 = vld [vmem:[#allocation12 + $0x1a8] ss:$16 sps:$4 sm:$0xff]   ;;  %v7050_v54 = vadd.f32 %v7034_v39, %v3403_v22  ;;  %v3499_v58 = vadd.f32 %v7031_v8, %v3413_v26  ;;  %v3503_v60 = vadd.f32 %v7031_v8, %v3417_v28  ;;  %v5755_v62 = vld [vmem:[#allocation12 + $0x1c4] ss:$16 sps:$4 sm:$0xff]  }
 0x3ee   : > { %v3554_v36 = vmul.f32 1.442695, %v3491_v23  ;;  %v3558_v46 = vmul.f32 1.442695, %v3495_v24  ;;  %v5753_v50 = vld [vmem:[#allocation12 + $0x1a0] ss:$16 sps:$4 sm:$0xff]   ;;  %v7055_v63 = vadd.f32 %v7034_v39, %v3407_v30 }
 0x3ef   : > { %4161 = vmatpush1.bf16.msra.mxu0 %v5717_v2  ;;  %4274 = vmatpush1.bf16.msra.mxu1 %v5718_v42  ;;  %v3406_v55 = vld [vmem:[#allocation2 + $0x20] sm:$0xff]  ;;  %v3552_v56 = vmul.f32 1.442695, %v3490_v33  ;;  %v3416_v61 = vld [vmem:[#allocation2 + $0x70] sm:$0xff]  ;;  %v3556_v0 = vmul.f32 1.442695, %v3494_v49  ;;  %v3498_v2 = vadd.f32 %v7028_v27, %v3412_v34 }
 0x3f0   : > { %4162 = vmatprep.subr.bf16.mxu0 %v5719_v3  ;;  %4275 = vmatprep.subr.bf16.mxu1 %v5721_v43  ;;  %5767 = vpow2.f32 %v3554_v36  ;;  %v3411_v1 = vld [vmem:[#allocation2 + $0x48] sm:$0xff]  ;;  %v3421_v42 = vld [vmem:[#allocation2 + $0x98] sm:$0xff]  ;;  %v7059_v43 = vadd.f32 %v7042_v32, %v3402_v48  ;;  %v3424_v9 = vld [vmem:[#allocation2 + $0xb0] sm:$0xff] }
 0x3f1   : > { %v3425_v3 = vld [vmem:[#allocation2 + $0xb8] sm:$0xff]  ;;  %5769 = vpow2.f32 %v3558_v46  ;;  %v5761_v51 = vld [vmem:[#allocation12 + $0x1e4] ss:$16 sps:$4 sm:$0xff]   ;;  %v3419_v11 = vld [vmem:[#allocation2 + $0x88] sm:$0xff]  ;;  %v3510_v30 = vadd.f32 %v7028_v27, %v3424_v9 }
 0x3f2   : > { %5771 = vpow2.f32 %v3552_v56  ;;  %v3428_v24 = vld [vmem:[#allocation2 + $0xd0] sm:$0xff]  ;;  %v5763_v26 = vld [vmem:[#allocation12 + $0x1ec] ss:$16 sps:$4 sm:$0xff]   ;;  %v5765_v34 = vld [vmem:[#allocation12 + $0x1e0] ss:$16 sps:$4 sm:$0xff]   ;;  %v7082_v36 = vadd.f32 %v7034_v39, %v3419_v11 }
 0x3f3   : > { %4163 = vmatpush1.bf16.msra.mxu0 %v5723_v4  ;;  %4276 = vmatpush1.bf16.msra.mxu1 %v5724_v5  ;;  %v3415_v4 = vld [vmem:[#allocation2 + $0x68] sm:$0xff]  ;;  %v3562_v5 = vmul.f32 1.442695, %v3499_v58  ;;  %5773 = vpow2.f32 %v3556_v0  ;;  %v3422_v46 = vld [vmem:[#allocation2 + $0xa0] sm:$0xff]  ;;  %v3572_v56 = vmul.f32 1.442695, %v3510_v30 }
 0x3f4   : > { %4164 = vmatprep.subr.bf16.mxu0 %v5725_v44  ;;  %4277 = vmatprep.subr.bf16.mxu1 %v5727_v45  ;;  %v3566_v44 = vmul.f32 1.442695, %v3503_v60  ;;  %v3420_v45 = vld [vmem:[#allocation2 + $0x90] sm:$0xff]  ;;  %v7071_v53 = vadd.f32 %v7034_v39, %v3415_v4  ;;  %v3427_v58 = vld [vmem:[#allocation2 + $0xc8] sm:$0xff]  ;;  %v3514_v60 = vadd.f32 %v7028_v27, %v3428_v24  ;;  %v3426_v30 = vld [vmem:[#allocation2 + $0xc0] sm:$0xff] }
 0x3f5   : > { %5775 = vpow2.f32 %v3562_v5  ;;  %v3506_v57 = vadd.f32 %v7028_v27, %v3420_v45 }
 0x3f6   : > { %5777 = vpow2.f32 %v3566_v44  ;;  %v3576_v5 = vmul.f32 1.442695, %v3514_v60 }
 0x3f7   : > { %4165 = vmatpush1.bf16.msra.mxu0 %v5729_v6  ;;  %4278 = vmatpush1.bf16.msra.mxu1 %v5730_v10  ;;  %v5757_v6 = vld [vmem:[#allocation12 + $0x1cc] ss:$16 sps:$4 sm:$0xff]   ;;  %v7062_v10 = vadd.f32 %v7042_v32, %v3406_v55  ;;  %v3568_v33 = vmul.f32 1.442695, %v3506_v57 }
 0x3f8   : > { %4166 = vmatprep.subr.bf16.mxu0 %v5731_v12  ;;  %4279 = vmatprep.subr.bf16.mxu1 %v5733_v13  ;;  %v3410_v12 = vld [vmem:[#allocation2 + $0x40] sm:$0xff]  ;;  %v3502_v13 = vadd.f32 %v7028_v27, %v3416_v61  ;;  %v3437_v61 = vld [vmem:[#allocation2 + $0x118] sm:$0xff] }
 0x3f9   : > { %v7075_v20 = vadd.f32 %v7042_v32, %v3410_v12  ;;  %v3523_v12 = vadd.f32 %v7031_v8, %v3437_v61  ;;  %v3512_v61 = vadd.f32 %v7042_v32, %v3426_v30 }
 0x3fb   : > { %4167 = vmatpush1.bf16.msra.mxu0 %v5735_v14  ;;  %4280 = vmatpush1.bf16.msra.mxu1 %v5736_v15  ;;  %v3560_v14 = vmul.f32 1.442695, %v3498_v2  ;;  %v5759_v15 = vld [vmem:[#allocation12 + $0x1c0] ss:$16 sps:$4 sm:$0xff]  }
 0x3fc   : > { %4168 = vmatprep.subr.bf16.mxu0 %v5737_v16  ;;  %4281 = vmatprep.subr.bf16.mxu1 %v5739_v17  ;;  %v5760_v16 = vld [vmem:[#allocation12 + $0x1c8] ss:$16 sps:$4 sm:$0xff]   ;;  %v7066_v17 = vadd.f32 %v7034_v39, %v3411_v1  ;;  %v3441_v2 = vld [vmem:[#allocation2 + $0x138] sm:$0xff] }
 0x3fd   : > { %5779 = vpow2.f32 %v3560_v14 }
 0x3ff   : > { %4169 = vmatpush1.bf16.msra.mxu0 %v5741_v18  ;;  %4282 = vmatpush1.bf16.msra.mxu1 %v5742_v19  ;;  %v3414_v18 = vld [vmem:[#allocation2 + $0x60] sm:$0xff]  ;;  %v3507_v19 = vadd.f32 %v7031_v8, %v3421_v42  ;;  %v5768_v42 = vpop.eup %5767 }
 0x400   : > { %4170 = vmatprep.subr.bf16.mxu0 %v5743_v7  ;;  %4283 = vmatprep.subr.bf16.mxu1 %v5745_v25  ;;  %v3511_v7 = vadd.f32 %v7031_v8, %v3425_v3  ;;  %v3564_v25 = vmul.f32 1.442695, %v3502_v13  ;;  %v7078_v28 = vadd.f32 %v7042_v32, %v3414_v18  ;;  %v7094_v3 = vadd.f32 %v7042_v32, %v3422_v46  ;;  %v5770_v44 = vpop.eup %5769 }
 0x401   : > { %v3570_v22 = vmul.f32 1.442695, %v3507_v19  ;;  %v3629_v45 = vmul.f32 %v5768_v42, %v7046_v47  ;;  %v5772_v13 = vpop.eup %5771  ;;  %v3631_v14 = vmul.f32 %v5770_v44, %v7046_v47  ;;  %v3527_v18 = vadd.f32 %v7031_v8, %v3441_v2  ;;  %v3445_v44 = vld [vmem:[#allocation2 + $0x158] sm:$0xff] }
 0x402   : > { %v3574_v23 = vmul.f32 1.442695, %v3511_v7  ;;  %5781 = vpow2.f32 %v3564_v25  ;;  %v5774_v19 = vpop.eup %5773  ;;  %v3628_v9 = vmul.f32 %v5772_v13, %v7039_v31 }
 0x403   : > { %4171 = vmatpush1.bf16.msra.mxu0 %v5747_v59  ;;  %4284 = vmatpush1.bf16.msra.mxu1 %v5748_v35  ;;  %v3429_v59 = vld [vmem:[#allocation2 + $0xd8] sm:$0xff]  ;;  %5783 = vpow2.f32 %v3570_v22  ;;  %v3661_v7 = vadd.f32 %v3629_v45, %v7050_v54  ;;  %v5776_v25 = vpop.eup %5775  ;;  %v3663_v11 = vadd.f32 %v3631_v14, %v7055_v63  ;;  %v3630_v57 = vmul.f32 %v5774_v19, %v7039_v31 }
 0x404   : > { %4172 = vmatprep.subr.bf16.mxu0 %v5749_v21  ;;  %4285 = vmatprep.subr.bf16.mxu1 %v5751_v29  ;;  %v3433_v35 = vld [vmem:[#allocation2 + $0xf8] sm:$0xff]  ;;  %v3423_v21 = vld [vmem:[#allocation2 + $0xa8] sm:$0xff]  ;;  %v3418_v29 = vld [vmem:[#allocation2 + $0x80] sm:$0xff]  ;;  %v3515_v48 = vadd.f32 %v7031_v8, %v3429_v59  ;;  %5785 = vpow2.f32 %v3574_v23  ;;  %v3590_v59 = vmul.f32 1.442695, %v3527_v18  ;;  %v3660_v22 = vadd.f32 %v3628_v9, %v7059_v43 }
 0x405   : > { %v3519_v49 = vadd.f32 %v7031_v8, %v3433_v35  ;;  %v7087_v55 = vadd.f32 %v7034_v39, %v3423_v21  ;;  %5787 = vpow2.f32 %v3568_v33  ;;  %v3436_v35 = vld [vmem:[#allocation2 + $0x110] sm:$0xff]  ;;  %v5778_v21 = vpop.eup %5777  ;;  %3693 = vst [vmem:[#allocation18 + $0x8] sm:$0xff] %v3661_v7  ;;  %v3633_v23 = vmul.f32 %v5776_v25, %v7046_v47  ;;  %3695 = vst [vmem:[#allocation18 + $0x18] sm:$0xff] %v3663_v11  ;;  %v3449_v19 = vld [vmem:[#allocation2 + $0x178] sm:$0xff] }
 0x406   : > { %v3578_v0 = vmul.f32 1.442695, %v3515_v48  ;;  %5789 = vpow2.f32 %v3572_v56  ;;  %v3662_v63 = vadd.f32 %v3630_v57, %v7062_v10  ;;  %v3440_v33 = vld [vmem:[#allocation2 + $0x130] sm:$0xff]  ;;  %3692 = vst [vmem:[#allocation18] sm:$0xff] %v3660_v22  ;;  %v3522_v48 = vadd.f32 %v7028_v27, %v3436_v35  ;;  %v3430_v56 = vld [vmem:[#allocation2 + $0xe0] sm:$0xff] }
 0x407   : > { %4173 = vmatpush1.bf16.msra.mxu0 %v5753_v50  ;;  %4286 = vmatpush1.bf16.msra.mxu1 %v5754_v52  ;;  %v3432_v50 = vld [vmem:[#allocation2 + $0xf0] sm:$0xff]  ;;  %v3582_v1 = vmul.f32 1.442695, %v3519_v49  ;;  %v5780_v24 = vpop.eup %5779  ;;  %v3665_v43 = vadd.f32 %v3633_v23, %v7066_v17  ;;  %v3516_v13 = vadd.f32 %v7042_v32, %v3430_v56  ;;  %v3531_v25 = vadd.f32 %v7031_v8, %v3445_v44 }
 0x408   : > { %4174 = vmatprep.subr.bf16.mxu0 %v5755_v62  ;;  %4287 = vmatprep.subr.bf16.mxu1 %v5757_v6  ;;  %v5766_v52 = vld [vmem:[#allocation12 + $0x1e8] ss:$16 sps:$4 sm:$0xff]   ;;  %v7091_v62 = vadd.f32 %v7042_v32, %v3418_v29  ;;  %v3518_v4 = vadd.f32 %v7028_v27, %v3432_v50  ;;  %v7099_v6 = vadd.f32 %v7034_v39, %v3427_v58  ;;  %5791 = vpow2.f32 %v3578_v0  ;;  %v3435_v0 = vld [vmem:[#allocation2 + $0x108] sm:$0xff] }
 0x409   : > { %5793 = vpow2.f32 %v3582_v1  ;;  %v3635_v29 = vmul.f32 %v5778_v21, %v7046_v47  ;;  %v3632_v46 = vmul.f32 %v5780_v24, %v7039_v31  ;;  %3694 = vst [vmem:[#allocation18 + $0x10] sm:$0xff] %v3662_v63  ;;  %v3724_v50 = vpack.c.bf16 %v3662_v63, %v3660_v22  ;;  %3697 = vst [vmem:[#allocation18 + $0x28] sm:$0xff] %v3665_v43 }
 0x40a   : > { %5795 = vpow2.f32 %v3576_v5  ;;  %v3526_v1 = vadd.f32 %v7028_v27, %v3440_v33  ;;  %v3584_v5 = vmul.f32 1.442695, %v3522_v48  ;;  %v3521_v18 = vadd.f32 %v7034_v39, %v3435_v0  ;;  %v3448_v48 = vld [vmem:[#allocation2 + $0x170] sm:$0xff] }
 0x40b   : > { %4175 = vmatpush1.bf16.msra.mxu0 %v5759_v15  ;;  %4288 = vmatpush1.bf16.msra.mxu1 %v5760_v16  ;;  %v3431_v15 = vld [vmem:[#allocation2 + $0xe8] sm:$0xff]  ;;  %v3580_v16 = vmul.f32 1.442695, %v3518_v4  ;;  %v3667_v10 = vadd.f32 %v3635_v29, %v7071_v53  ;;  %v3664_v60 = vadd.f32 %v3632_v46, %v7075_v20  ;;  %v3535_v23 = vadd.f32 %v7031_v8, %v3449_v19 }
 0x40c   : > { %4176 = vmatprep.subr.bf16.mxu0 %v5761_v51  ;;  %4289 = vmatprep.subr.bf16.mxu1 %v5763_v26  ;;  %v3586_v51 = vmul.f32 1.442695, %v3523_v12  ;;  %v7111_v54 = vadd.f32 %v7034_v39, %v3431_v15  ;;  %v3725_v26 = vpack.c.bf16 %v3663_v11, %v3661_v7  ;;  %v3588_v14 = vmul.f32 1.442695, %v3526_v1 }
 0x40d   : > { %5797 = vpow2.f32 %v3580_v16  ;;  %3699 = vst [vmem:[#allocation18 + $0x38] sm:$0xff] %v3667_v10  ;;  %v3727_v42 = vpack.c.bf16 %v3667_v10, %v3665_v43  ;;  %3696 = vst [vmem:[#allocation18 + $0x20] sm:$0xff] %v3664_v60  ;;  %v3594_v24 = vmul.f32 1.442695, %v3531_v25  ;;  %v3434_v43 = vld [vmem:[#allocation2 + $0x100] sm:$0xff]  ;;  %v3453_v10 = vld [vmem:[#allocation2 + $0x198] sm:$0xff]  ;;  %v3534_v0 = vadd.f32 %v7028_v27, %v3448_v48 }
 0x40e   : > { %5799 = vpow2.f32 %v3586_v51  ;;  %4178 = vmatprep.mubr.bf16.mxu0 %v3725_v26  ;;  %4291 = vmatprep.mubr.bf16.mxu1 %v3725_v26  ;;  %v3439_v51 = vld [vmem:[#allocation2 + $0x128] sm:$0xff]  ;;  %v3598_v46 = vmul.f32 1.442695, %v3535_v23 }
 0x40f   : > { %4177 = vmatpush1.bf16.msra.mxu0 %v5765_v34  ;;  %4290 = vmatpush1.bf16.msra.mxu1 %v5766_v52  ;;  %v5782_v34 = vpop.eup %5781  ;;  %5801 = vpow2.f32 %v3590_v59  ;;  %v3525_v30 = vadd.f32 %v7034_v39, %v3439_v51  ;;  %v3447_v51 = vld [vmem:[#allocation2 + $0x168] sm:$0xff] }
 0x410   : > { %v5784_v49 = vpop.eup %5783  ;;  %v3634_v52 = vmul.f32 %v5782_v34, %v7039_v31  ;;  %5803 = vpow2.f32 %v3584_v5  ;;  %v3533_v23 = vadd.f32 %v7034_v39, %v3447_v51 }
 0x411   : > { %v5786_v58 = vpop.eup %5785  ;;  %v3637_v17 = vmul.f32 %v5784_v49, %v7046_v47  ;;  %5805 = vpow2.f32 %v3588_v14 }
 0x412   : > { %v5788_v2 = vpop.eup %5787  ;;  %4179 = vmatmul.mubr.bf16.vlgmr.msra.gmra.mrb[0].mxu0 %v3724_v50  ;;  %4292 = vmatmul.mubr.bf16.vlgmr.msra.gmra.mrb[0].mxu1 %v3724_v50  ;;  %v3666_v53 = vadd.f32 %v3634_v52, %v7078_v28  ;;  %v3639_v4 = vmul.f32 %v5786_v58, %v7046_v47  ;;  %5807 = vpow2.f32 %v3594_v24  ;;  %v3438_v50 = vld [vmem:[#allocation2 + $0x120] sm:$0xff]  ;;  %v3457_v52 = vld [vmem:[#allocation2 + $0x1b8] sm:$0xff] }
 0x413   : > { %v5790_v45 = vpop.eup %5789  ;;  %v3669_v20 = vadd.f32 %v3637_v17, %v7082_v36  ;;  %v3636_v12 = vmul.f32 %v5788_v2, %v7039_v31  ;;  %4188 = vmatprep.mubr.bf16.mxu0 %v3727_v42  ;;  %4301 = vmatprep.mubr.bf16.mxu1 %v3727_v42  ;;  %5809 = vpow2.f32 %v3598_v46  ;;  %v3524_v1 = vadd.f32 %v7042_v32, %v3438_v50  ;;  %v3446_v46 = vld [vmem:[#allocation2 + $0x160] sm:$0xff] }
 0x414   : > { %v5792_v15 = vpop.eup %5791  ;;  %3698 = vst [vmem:[#allocation18 + $0x30] sm:$0xff] %v3666_v53  ;;  %v3671_v16 = vadd.f32 %v3639_v4, %v7087_v55  ;;  %v3638_v28 = vmul.f32 %v5790_v45, %v7039_v31  ;;  %v3726_v57 = vpack.c.bf16 %v3666_v53, %v3664_v60  ;;  %v3452_v60 = vld [vmem:[#allocation2 + $0x190] sm:$0xff]  ;;  %v3539_v42 = vadd.f32 %v7031_v8, %v3453_v10 }
 0x415   : > { %v5794_v7 = vpop.eup %5793  ;;  %3701 = vst [vmem:[#allocation18 + $0x48] sm:$0xff] %v3669_v20  ;;  %v3668_v36 = vadd.f32 %v3636_v12, %v7091_v62  ;;  %v3641_v9 = vmul.f32 %v5792_v15, %v7046_v47  ;;  %v3543_v53 = vadd.f32 %v7031_v8, %v3457_v52  ;;  %v3456_v4 = vld [vmem:[#allocation2 + $0x1b0] sm:$0xff]  ;;  %v3596_v12 = vmul.f32 1.442695, %v3534_v0  ;;  %v3454_v0 = vld [vmem:[#allocation2 + $0x1a0] sm:$0xff] }
 0x416   : > { %v5796_v11 = vpop.eup %5795  ;;  %3703 = vst [vmem:[#allocation18 + $0x58] sm:$0xff] %v3671_v16  ;;  %v3729_v55 = vpack.c.bf16 %v3671_v16, %v3669_v20  ;;  %v3670_v59 = vadd.f32 %v3638_v28, %v7094_v3  ;;  %v3643_v35 = vmul.f32 %v5794_v7, %v7046_v47  ;;  %v3444_v3 = vld [vmem:[#allocation2 + $0x150] sm:$0xff]  ;;  %v3443_v20 = vld [vmem:[#allocation2 + $0x148] sm:$0xff]  ;;  %v3602_v16 = vmul.f32 1.442695, %v3539_v42 }
 0x417   : > { %v5798_v21 = vpop.eup %5797  ;;  %3700 = vst [vmem:[#allocation18 + $0x40] sm:$0xff] %v3668_v36  ;;  %v3673_v22 = vadd.f32 %v3641_v9, %v7099_v6  ;;  %v3640_v62 = vmul.f32 %v5796_v11, %v7039_v31  ;;  %v3530_v58 = vadd.f32 %v7028_v27, %v3444_v3  ;;  %v3606_v28 = vmul.f32 1.442695, %v3543_v53  ;;  %v3465_v9 = vld [vmem:[#allocation2 + $0x1f8] sm:$0xff] }
 0x418   : > { %v5800_v26 = vpop.eup %5799  ;;  %3702 = vst [vmem:[#allocation18 + $0x50] sm:$0xff] %v3670_v59  ;;  %v3675_v63 = vadd.f32 %v3643_v35, %v7111_v54  ;;  %v3642_v29 = vmul.f32 %v5798_v21, %v7039_v31  ;;  %v3728_v44 = vpack.c.bf16 %v3670_v59, %v3668_v36  ;;  %v3542_v7 = vadd.f32 %v7028_v27, %v3456_v4  ;;  %v3460_v35 = vld [vmem:[#allocation2 + $0x1d0] sm:$0xff] }
 0x419   : > { %v5802_v33 = vpop.eup %5801  ;;  %3705 = vst [vmem:[#allocation18 + $0x68] sm:$0xff] %v3673_v22  ;;  %v7143_v34 = vadd.f32 %v3640_v62, %v3512_v61  ;;  %v3645_v6 = vmul.f32 %v5800_v26, %v7046_v47  ;;  %v3520_v61 = vadd.f32 %v7042_v32, %v3434_v43  ;;  %v3592_v2 = vmul.f32 1.442695, %v3530_v58  ;;  %v3464_v21 = vld [vmem:[#allocation2 + $0x1f0] sm:$0xff] }
 0x41a   : > { %4189 = vmatmul.mubr.bf16.gmra.mrb[4].mxu0 %v3726_v57  ;;  %4302 = vmatmul.mubr.bf16.gmra.mrb[4].mxu1 %v3726_v57  ;;  %3707 = vst [vmem:[#allocation18 + $0x78] sm:$0xff] %v3675_v63  ;;  %v7146_v49 = vadd.f32 %v3642_v29, %v3516_v13  ;;  %v3647_v54 = vmul.f32 %v5802_v33, %v7046_v47  ;;  %v5804_v5 = vpop.eup %5803  ;;  %v3442_v29 = vld [vmem:[#allocation2 + $0x140] sm:$0xff] }
 0x41b   : > { %4198 = vmatprep.mubr.bf16.mxu0 %v3729_v55  ;;  %4311 = vmatprep.mubr.bf16.mxu1 %v3729_v55  ;;  %3704 = vst [vmem:[#allocation18 + $0x60] sm:$0xff] %v7143_v34  ;;  %v7150_v56 = vadd.f32 %v3645_v6, %v3521_v18  ;;  %v3731_v45 = vpack.c.bf16 %v3675_v63, %v3673_v22  ;;  %v5806_v14 = vpop.eup %5805  ;;  %5811 = vpow2.f32 %v3592_v2  ;;  %v3461_v18 = vld [vmem:[#allocation2 + $0x1d8] sm:$0xff]  ;;  %v3604_v55 = vmul.f32 1.442695, %v3542_v7 }
 0x41c   : > { %3706 = vst [vmem:[#allocation18 + $0x70] sm:$0xff] %v7146_v49  ;;  %v3679_v17 = vadd.f32 %v3647_v54, %v3525_v30  ;;  %v3538_v13 = vadd.f32 %v7028_v27, %v3452_v60  ;;  %v3644_v15 = vmul.f32 %v5804_v5, %v7039_v31  ;;  %v3646_v19 = vmul.f32 %v5806_v14, %v7039_v31  ;;  %v5808_v22 = vpop.eup %5807  ;;  %v3451_v54 = vld [vmem:[#allocation2 + $0x188] sm:$0xff] }
 0x41d   : > { %3709 = vst [vmem:[#allocation18 + $0x88] sm:$0xff] %v7150_v56  ;;  %5813 = vpow2.f32 %v3596_v12  ;;  %v3529_v25 = vadd.f32 %v7034_v39, %v3443_v20  ;;  %v3547_v59 = vadd.f32 %v7031_v8, %v3461_v18  ;;  %v3551_v62 = vadd.f32 %v7031_v8, %v3465_v9  ;;  %v5810_v63 = vpop.eup %5809  ;;  %v3455_v60 = vld [vmem:[#allocation2 + $0x1a8] sm:$0xff] }
 0x41e   : > { %3711 = vst [vmem:[#allocation18 + $0x98] sm:$0xff] %v3679_v17  ;;  %v7164_v36 = vadd.f32 %v3644_v15, %v3520_v61  ;;  %5815 = vpow2.f32 %v3602_v16  ;;  %v3600_v11 = vmul.f32 1.442695, %v3538_v13  ;;  %v7167_v57 = vadd.f32 %v3646_v19, %v3524_v1  ;;  %v3463_v15 = vld [vmem:[#allocation2 + $0x1e8] sm:$0xff] }
 0x41f   : > { %5817 = vpow2.f32 %v3606_v28  ;;  %v3649_v24 = vmul.f32 %v5808_v22, %v7046_v47  ;;  %v3610_v26 = vmul.f32 1.442695, %v3547_v59  ;;  %v3614_v30 = vmul.f32 1.442695, %v3551_v62 }
 0x420   : > { %3708 = vst [vmem:[#allocation18 + $0x80] sm:$0xff] %v7164_v36  ;;  %5819 = vpow2.f32 %v3600_v11  ;;  %3710 = vst [vmem:[#allocation18 + $0x90] sm:$0xff] %v7167_v57  ;;  %v3546_v3 = vadd.f32 %v7028_v27, %v3460_v35  ;;  %v3550_v33 = vadd.f32 %v7028_v27, %v3464_v21  ;;  %v3730_v6 = vpack.c.bf16 %v7146_v49, %v7143_v34  ;;  %v3450_v34 = vld [vmem:[#allocation2 + $0x180] sm:$0xff] }
 0x421   : > { %5821 = vpow2.f32 %v3604_v55  ;;  %v3651_v8 = vmul.f32 %v5810_v63, %v7046_v47  ;;  %v3681_v43 = vadd.f32 %v3649_v24, %v3529_v25  ;;  %v3733_v48 = vpack.c.bf16 %v3679_v17, %v7150_v56  ;;  %v3458_v11 = vld [vmem:[#allocation2 + $0x1c0] sm:$0xff] }
 0x422   : > { %4199 = vmatmul.mubr.bf16.gmra.mrb[8].mxu0 %v3728_v44  ;;  %4312 = vmatmul.mubr.bf16.gmra.mrb[8].mxu1 %v3728_v44  ;;  %5823 = vpow2.f32 %v3610_v26  ;;  %v3608_v50 = vmul.f32 1.442695, %v3546_v3  ;;  %v3612_v10 = vmul.f32 1.442695, %v3550_v33  ;;  %v3528_v58 = vadd.f32 %v7042_v32, %v3442_v29  ;;  %v3462_v21 = vld [vmem:[#allocation2 + $0x1e0] sm:$0xff] }
 0x423   : > { %4208 = vmatprep.mubr.bf16.mxu0 %v3731_v45  ;;  %4321 = vmatprep.mubr.bf16.mxu1 %v3731_v45  ;;  %5825 = vpow2.f32 %v3614_v30  ;;  %v3683_v52 = vadd.f32 %v3651_v8, %v3533_v23  ;;  %3713 = vst [vmem:[#allocation18 + $0xa8] sm:$0xff] %v3681_v43  ;;  %v3532_v61 = vadd.f32 %v7042_v32, %v3446_v46  ;;  %v3459_v45 = vld [vmem:[#allocation2 + $0x1c8] sm:$0xff] }
 0x424   : > { %5827 = vpow2.f32 %v3608_v50  ;;  %v3537_v17 = vadd.f32 %v7034_v39, %v3451_v54  ;;  %v3541_v42 = vadd.f32 %v7034_v39, %v3455_v60  ;;  %v3536_v44 = vadd.f32 %v7042_v32, %v3450_v34 }
 0x425   : > { %v5812_v27 = vpop.eup %5811  ;;  %3715 = vst [vmem:[#allocation18 + $0xb8] sm:$0xff] %v3683_v52  ;;  %5829 = vpow2.f32 %v3612_v10  ;;  %v3540_v14 = vadd.f32 %v7042_v32, %v3454_v0  ;;  %v3732_v28 = vpack.c.bf16 %v7167_v57, %v7164_v36  ;;  %v3735_v7 = vpack.c.bf16 %v3683_v52, %v3681_v43 }
 0x426   : > { %v3648_v56 = vmul.f32 %v5812_v27, %v7039_v31  ;;  %v3545_v25 = vadd.f32 %v7034_v39, %v3459_v45  ;;  %v3549_v35 = vadd.f32 %v7034_v39, %v3463_v15  ;;  %v3544_v23 = vadd.f32 %v7042_v32, %v3458_v11 }
 0x427   : > { %v5814_v49 = vpop.eup %5813  ;;  %v3548_v39 = vadd.f32 %v7042_v32, %v3462_v21 }
 0x428   : > { %v5816_v1 = vpop.eup %5815  ;;  %v3650_v2 = vmul.f32 %v5814_v49, %v7039_v31  ;;  %v3680_v4 = vadd.f32 %v3648_v56, %v3528_v58 }
 0x429   : > { %v5818_v53 = vpop.eup %5817  ;;  %v3653_v5 = vmul.f32 %v5816_v1, %v7046_v47 }
 0x42a   : > { %4209 = vmatmul.mubr.bf16.gmra.mrb[12].mxu0 %v3730_v6  ;;  %4322 = vmatmul.mubr.bf16.gmra.mrb[12].mxu1 %v3730_v6  ;;  %v5820_v20 = vpop.eup %5819  ;;  %v3682_v12 = vadd.f32 %v3650_v2, %v3532_v61  ;;  %v3655_v13 = vmul.f32 %v5818_v53, %v7046_v47  ;;  %3712 = vst [vmem:[#allocation18 + $0xa0] sm:$0xff] %v3680_v4 }
 0x42b   : > { %4218 = vmatprep.mubr.bf16.mxu0 %v3733_v48  ;;  %4331 = vmatprep.mubr.bf16.mxu1 %v3733_v48  ;;  %v5822_v16 = vpop.eup %5821  ;;  %v3685_v18 = vadd.f32 %v3653_v5, %v3537_v17  ;;  %v3652_v19 = vmul.f32 %v5820_v20, %v7039_v31 }
 0x42c   : > { %3714 = vst [vmem:[#allocation18 + $0xb0] sm:$0xff] %v3682_v12  ;;  %v3687_v9 = vadd.f32 %v3655_v13, %v3541_v42  ;;  %v3654_v51 = vmul.f32 %v5822_v16, %v7039_v31  ;;  %v5824_v55 = vpop.eup %5823  ;;  %v3734_v33 = vpack.c.bf16 %v3682_v12, %v3680_v4 }
 0x42d   : > { %3717 = vst [vmem:[#allocation18 + $0xc8] sm:$0xff] %v3685_v18  ;;  %v3684_v59 = vadd.f32 %v3652_v19, %v3536_v44  ;;  %v5826_v22 = vpop.eup %5825  ;;  %v3657_v57 = vmul.f32 %v5824_v55, %v7046_v47 }
 0x42e   : > { %3719 = vst [vmem:[#allocation18 + $0xd8] sm:$0xff] %v3687_v9  ;;  %v3686_v36 = vadd.f32 %v3654_v51, %v3540_v14  ;;  %v3659_v62 = vmul.f32 %v5826_v22, %v7046_v47  ;;  %v5828_v24 = vpop.eup %5827  ;;  %v3737_v47 = vpack.c.bf16 %v3687_v9, %v3685_v18 }
 0x42f   : > { %3716 = vst [vmem:[#allocation18 + $0xc0] sm:$0xff] %v3684_v59  ;;  %v3689_v26 = vadd.f32 %v3657_v57, %v3545_v25  ;;  %v5830_v63 = vpop.eup %5829  ;;  %v3656_v30 = vmul.f32 %v5828_v24, %v7039_v31 }
 0x430   : > { %3718 = vst [vmem:[#allocation18 + $0xd0] sm:$0xff] %v3686_v36  ;;  %v3691_v29 = vadd.f32 %v3659_v62, %v3549_v35  ;;  %v3658_v3 = vmul.f32 %v5830_v63, %v7039_v31  ;;  %v3736_v43 = vpack.c.bf16 %v3686_v36, %v3684_v59  ;;  %v3804_v31 = vld [vmem:[#allocation14] sm:$0xf] }
 0x431   : > { %3721 = vst [vmem:[#allocation18 + $0xe8] sm:$0xff] %v3689_v26  ;;  %v3688_v6 = vadd.f32 %v3656_v30, %v3544_v23  ;;  %v7204_v48 = vrot.slane %v3804_v31, %v6822_v37  ;;  %v7207_v54 = vrot.slane %v3804_v31, %v6824_v38  ;;  %v7210_v50 = vrot.slane %v3804_v31, %v6828_v40 }
 0x432   : > { %4219 = vmatmul.mubr.bf16.gmra.mrb[16].mxu0 %v3732_v28  ;;  %4332 = vmatmul.mubr.bf16.gmra.mrb[16].mxu1 %v3732_v28  ;;  %3723 = vst [vmem:[#allocation18 + $0xf8] sm:$0xff] %v3691_v29  ;;  %v3690_v8 = vadd.f32 %v3658_v3, %v3548_v39  ;;  %v3739_v32 = vpack.c.bf16 %v3691_v29, %v3689_v26 }
 0x433   : > { %4228 = vmatprep.mubr.bf16.mxu0 %v3735_v7  ;;  %4341 = vmatprep.mubr.bf16.mxu1 %v3735_v7  ;;  %3720 = vst [vmem:[#allocation18 + $0xe0] sm:$0xff] %v3688_v6  ;;  %v7213_v10 = vrot.slane %v3804_v31, %v6830_v41 }
 0x434   : > { %3722 = vst [vmem:[#allocation18 + $0xf0] sm:$0xff] %v3690_v8  ;;  %v3738_v46 = vpack.c.bf16 %v3690_v8, %v3688_v6 }
 0x43a   : > { %4229 = vmatmul.mubr.bf16.gmra.mrb[20].mxu0 %v3734_v33  ;;  %4342 = vmatmul.mubr.bf16.gmra.mrb[20].mxu1 %v3734_v33 }
 0x43b   : > { %4238 = vmatprep.mubr.bf16.mxu0 %v3737_v47  ;;  %4351 = vmatprep.mubr.bf16.mxu1 %v3737_v47 }
 0x442   : > { %4239 = vmatmul.mubr.bf16.gmra.mrb[24].mxu0 %v3736_v43  ;;  %4352 = vmatmul.mubr.bf16.gmra.mrb[24].mxu1 %v3736_v43 }
 0x443   : > { %4248 = vmatprep.mubr.bf16.mxu0 %v3739_v32  ;;  %4361 = vmatprep.mubr.bf16.mxu1 %v3739_v32 }
 0x44a   : > { %4249 = vmatmul.mubr.bf16.gmra.mrb[28].mxu0 %v3738_v46  ;;  %4362 = vmatmul.mubr.bf16.gmra.mrb[28].mxu1 %v3738_v46 }
 0x4e5   : > { %v4180_v52 = vpop.f32.mrb[0].mxu0  ;;  %v4293_v58 = vpop.f32.mrb[0].mxu1 }
 0x4e6   : > { %v4181_v60 = vadd.f32 %v4180_v52, %v7204_v48  ;;  %v4294_v27 = vadd.f32 %v4293_v58, %v7207_v54  ;;  %v4182_v61 = vpop.f32.mrb[1].mxu0  ;;  %v4295_v34 = vpop.f32.mrb[1].mxu1 }
 0x4e7   : > { %v4183_v37 = vadd.f32 %v4182_v61, %v7210_v50  ;;  %v4296_v49 = vadd.f32 %v4295_v34, %v7213_v10  ;;  %v4184_v38 = vpop.f32.mrb[2].mxu0  ;;  %v4297_v56 = vpop.f32.mrb[2].mxu1 }
 0x4e8   : > { %4372 = vst [vmem:[#allocation17] sm:$0xff] %v4181_v60  ;;  %4374 = vst [vmem:[#allocation17 + $0x10] sm:$0xff] %v4294_v27  ;;  %v4185_v40 = vadd.f32 %v4184_v38, %v7204_v48  ;;  %v4298_v41 = vadd.f32 %v4297_v56, %v7207_v54  ;;  %v4186_v17 = vpop.f32.mrb[3].mxu0  ;;  %v4299_v0 = vpop.f32.mrb[3].mxu1 }
 0x4e9   : > { %4373 = vst [vmem:[#allocation17 + $0x8] sm:$0xff] %v4183_v37  ;;  %4375 = vst [vmem:[#allocation17 + $0x18] sm:$0xff] %v4296_v49  ;;  %v4187_v1 = vadd.f32 %v4186_v17, %v7210_v50  ;;  %v4300_v2 = vadd.f32 %v4299_v0, %v7213_v10 }
 0x4ea   : > { %4376 = vst [vmem:[#allocation17 + $0x20] sm:$0xff] %v4185_v40  ;;  %4378 = vst [vmem:[#allocation17 + $0x30] sm:$0xff] %v4298_v41 }
 0x4eb   : > { %4377 = vst [vmem:[#allocation17 + $0x28] sm:$0xff] %v4187_v1  ;;  %4379 = vst [vmem:[#allocation17 + $0x38] sm:$0xff] %v4300_v2 }
 0x4ed   : > { %v4190_v42 = vpop.f32.mrb[4].mxu0  ;;  %v4303_v53 = vpop.f32.mrb[4].mxu1 }
 0x4ee   : > { %v4191_v4 = vadd.f32 %v4190_v42, %v7204_v48  ;;  %v4304_v5 = vadd.f32 %v4303_v53, %v7207_v54  ;;  %v4192_v44 = vpop.f32.mrb[5].mxu0  ;;  %v4305_v45 = vpop.f32.mrb[5].mxu1 }
 0x4ef   : > { %v4193_v20 = vadd.f32 %v4192_v44, %v7210_v50  ;;  %v4306_v12 = vadd.f32 %v4305_v45, %v7213_v10  ;;  %v4194_v13 = vpop.f32.mrb[6].mxu0  ;;  %v4307_v14 = vpop.f32.mrb[6].mxu1 }
 0x4f0   : > { %4380 = vst [vmem:[#allocation17 + $0x40] sm:$0xff] %v4191_v4  ;;  %4382 = vst [vmem:[#allocation17 + $0x50] sm:$0xff] %v4304_v5  ;;  %v4195_v15 = vadd.f32 %v4194_v13, %v7204_v48  ;;  %v4308_v16 = vadd.f32 %v4307_v14, %v7207_v54  ;;  %v4196_v28 = vpop.f32.mrb[7].mxu0  ;;  %v4309_v18 = vpop.f32.mrb[7].mxu1 }
 0x4f1   : > { %4381 = vst [vmem:[#allocation17 + $0x48] sm:$0xff] %v4193_v20  ;;  %4383 = vst [vmem:[#allocation17 + $0x58] sm:$0xff] %v4306_v12  ;;  %v4197_v19 = vadd.f32 %v4196_v28, %v7210_v50  ;;  %v4310_v7 = vadd.f32 %v4309_v18, %v7213_v10 }
 0x4f2   : > { %4384 = vst [vmem:[#allocation17 + $0x60] sm:$0xff] %v4195_v15  ;;  %4386 = vst [vmem:[#allocation17 + $0x70] sm:$0xff] %v4308_v16 }
 0x4f3   : > { %4385 = vst [vmem:[#allocation17 + $0x68] sm:$0xff] %v4197_v19  ;;  %4387 = vst [vmem:[#allocation17 + $0x78] sm:$0xff] %v4310_v7 }
 0x4f5   : > { %v4200_v9 = vpop.f32.mrb[8].mxu0  ;;  %v4313_v51 = vpop.f32.mrb[8].mxu1 }
 0x4f6   : > { %v4201_v25 = vadd.f32 %v4200_v9, %v7204_v48  ;;  %v4314_v11 = vadd.f32 %v4313_v51, %v7207_v54  ;;  %v4202_v55 = vpop.f32.mrb[9].mxu0  ;;  %v4315_v59 = vpop.f32.mrb[9].mxu1 }
 0x4f7   : > { %v4203_v35 = vadd.f32 %v4202_v55, %v7210_v50  ;;  %v4316_v21 = vadd.f32 %v4315_v59, %v7213_v10  ;;  %v4204_v22 = vpop.f32.mrb[10].mxu0  ;;  %v4317_v36 = vpop.f32.mrb[10].mxu1 }
 0x4f8   : > { %4388 = vst [vmem:[#allocation17 + $0x80] sm:$0xff] %v4201_v25  ;;  %4390 = vst [vmem:[#allocation17 + $0x90] sm:$0xff] %v4314_v11  ;;  %v4205_v57 = vadd.f32 %v4204_v22, %v7204_v48  ;;  %v4318_v62 = vadd.f32 %v4317_v36, %v7207_v54  ;;  %v4206_v23 = vpop.f32.mrb[11].mxu0  ;;  %v4319_v24 = vpop.f32.mrb[11].mxu1 }
 0x4f9   : > { %4389 = vst [vmem:[#allocation17 + $0x88] sm:$0xff] %v4203_v35  ;;  %4391 = vst [vmem:[#allocation17 + $0x98] sm:$0xff] %v4316_v21  ;;  %v4207_v26 = vadd.f32 %v4206_v23, %v7210_v50  ;;  %v4320_v39 = vadd.f32 %v4319_v24, %v7213_v10 }
 0x4fa   : > { %4392 = vst [vmem:[#allocation17 + $0xa0] sm:$0xff] %v4205_v57  ;;  %4394 = vst [vmem:[#allocation17 + $0xb0] sm:$0xff] %v4318_v62 }
 0x4fb   : > { %4393 = vst [vmem:[#allocation17 + $0xa8] sm:$0xff] %v4207_v26  ;;  %4395 = vst [vmem:[#allocation17 + $0xb8] sm:$0xff] %v4320_v39 }
 0x4fd   : > { %v4210_v63 = vpop.f32.mrb[12].mxu0  ;;  %v4323_v29 = vpop.f32.mrb[12].mxu1 }
 0x4fe   : > { %v4211_v30 = vadd.f32 %v4210_v63, %v7204_v48  ;;  %v4324_v3 = vadd.f32 %v4323_v29, %v7207_v54  ;;  %v4212_v33 = vpop.f32.mrb[13].mxu0  ;;  %v4325_v6 = vpop.f32.mrb[13].mxu1 }
 0x4ff   : > { %v4213_v47 = vadd.f32 %v4212_v33, %v7210_v50  ;;  %v4326_v8 = vadd.f32 %v4325_v6, %v7213_v10  ;;  %v4214_v43 = vpop.f32.mrb[14].mxu0  ;;  %v4327_v32 = vpop.f32.mrb[14].mxu1 }
 0x500   : > { %4396 = vst [vmem:[#allocation17 + $0xc0] sm:$0xff] %v4211_v30  ;;  %4398 = vst [vmem:[#allocation17 + $0xd0] sm:$0xff] %v4324_v3  ;;  %v4215_v46 = vadd.f32 %v4214_v43, %v7204_v48  ;;  %v4328_v31 = vadd.f32 %v4327_v32, %v7207_v54  ;;  %v4216_v52 = vpop.f32.mrb[15].mxu0  ;;  %v4329_v58 = vpop.f32.mrb[15].mxu1 }
 0x501   : > { %4397 = vst [vmem:[#allocation17 + $0xc8] sm:$0xff] %v4213_v47  ;;  %4399 = vst [vmem:[#allocation17 + $0xd8] sm:$0xff] %v4326_v8  ;;  %v4217_v60 = vadd.f32 %v4216_v52, %v7210_v50  ;;  %v4330_v27 = vadd.f32 %v4329_v58, %v7213_v10 }
 0x502   : > { %4400 = vst [vmem:[#allocation17 + $0xe0] sm:$0xff] %v4215_v46  ;;  %4402 = vst [vmem:[#allocation17 + $0xf0] sm:$0xff] %v4328_v31 }
 0x503   : > { %4401 = vst [vmem:[#allocation17 + $0xe8] sm:$0xff] %v4217_v60  ;;  %4403 = vst [vmem:[#allocation17 + $0xf8] sm:$0xff] %v4330_v27 }
 0x505   : > { %v4220_v61 = vpop.f32.mrb[16].mxu0  ;;  %v4333_v34 = vpop.f32.mrb[16].mxu1 }
 0x506   : > { %v4221_v37 = vadd.f32 %v4220_v61, %v7204_v48  ;;  %v4334_v49 = vadd.f32 %v4333_v34, %v7207_v54  ;;  %v4222_v38 = vpop.f32.mrb[17].mxu0  ;;  %v4335_v56 = vpop.f32.mrb[17].mxu1 }
 0x507   : > { %v4223_v40 = vadd.f32 %v4222_v38, %v7210_v50  ;;  %v4336_v41 = vadd.f32 %v4335_v56, %v7213_v10  ;;  %v4224_v17 = vpop.f32.mrb[18].mxu0  ;;  %v4337_v0 = vpop.f32.mrb[18].mxu1 }
 0x508   : > { %4404 = vst [vmem:[#allocation17 + $0x100] sm:$0xff] %v4221_v37  ;;  %4406 = vst [vmem:[#allocation17 + $0x110] sm:$0xff] %v4334_v49  ;;  %v4225_v1 = vadd.f32 %v4224_v17, %v7204_v48  ;;  %v4338_v2 = vadd.f32 %v4337_v0, %v7207_v54  ;;  %v4226_v42 = vpop.f32.mrb[19].mxu0  ;;  %v4339_v53 = vpop.f32.mrb[19].mxu1 }
 0x509   : > { %4405 = vst [vmem:[#allocation17 + $0x108] sm:$0xff] %v4223_v40  ;;  %4407 = vst [vmem:[#allocation17 + $0x118] sm:$0xff] %v4336_v41  ;;  %v4227_v4 = vadd.f32 %v4226_v42, %v7210_v50  ;;  %v4340_v5 = vadd.f32 %v4339_v53, %v7213_v10 }
 0x50a   : > { %4408 = vst [vmem:[#allocation17 + $0x120] sm:$0xff] %v4225_v1  ;;  %4410 = vst [vmem:[#allocation17 + $0x130] sm:$0xff] %v4338_v2 }
 0x50b   : > { %4409 = vst [vmem:[#allocation17 + $0x128] sm:$0xff] %v4227_v4  ;;  %4411 = vst [vmem:[#allocation17 + $0x138] sm:$0xff] %v4340_v5 }
 0x50d   : > { %v4230_v44 = vpop.f32.mrb[20].mxu0  ;;  %v4343_v45 = vpop.f32.mrb[20].mxu1 }
 0x50e   : > { %v4231_v20 = vadd.f32 %v4230_v44, %v7204_v48  ;;  %v4344_v12 = vadd.f32 %v4343_v45, %v7207_v54  ;;  %v4232_v13 = vpop.f32.mrb[21].mxu0  ;;  %v4345_v14 = vpop.f32.mrb[21].mxu1 }
 0x50f   : > { %v4233_v15 = vadd.f32 %v4232_v13, %v7210_v50  ;;  %v4346_v16 = vadd.f32 %v4345_v14, %v7213_v10  ;;  %v4234_v28 = vpop.f32.mrb[22].mxu0  ;;  %v4347_v18 = vpop.f32.mrb[22].mxu1 }
 0x510   : > { %4412 = vst [vmem:[#allocation17 + $0x140] sm:$0xff] %v4231_v20  ;;  %4414 = vst [vmem:[#allocation17 + $0x150] sm:$0xff] %v4344_v12  ;;  %v4235_v19 = vadd.f32 %v4234_v28, %v7204_v48  ;;  %v4348_v7 = vadd.f32 %v4347_v18, %v7207_v54  ;;  %v4236_v9 = vpop.f32.mrb[23].mxu0  ;;  %v4349_v51 = vpop.f32.mrb[23].mxu1 }
 0x511   : > { %4413 = vst [vmem:[#allocation17 + $0x148] sm:$0xff] %v4233_v15  ;;  %4415 = vst [vmem:[#allocation17 + $0x158] sm:$0xff] %v4346_v16  ;;  %v4237_v25 = vadd.f32 %v4236_v9, %v7210_v50  ;;  %v4350_v11 = vadd.f32 %v4349_v51, %v7213_v10 }
 0x512   : > { %4416 = vst [vmem:[#allocation17 + $0x160] sm:$0xff] %v4235_v19  ;;  %4418 = vst [vmem:[#allocation17 + $0x170] sm:$0xff] %v4348_v7 }
 0x513   : > { %4417 = vst [vmem:[#allocation17 + $0x168] sm:$0xff] %v4237_v25  ;;  %4419 = vst [vmem:[#allocation17 + $0x178] sm:$0xff] %v4350_v11 }
 0x515   : > { %v4240_v55 = vpop.f32.mrb[24].mxu0  ;;  %v4353_v59 = vpop.f32.mrb[24].mxu1 }
 0x516   : > { %v4241_v35 = vadd.f32 %v4240_v55, %v7204_v48  ;;  %v4354_v21 = vadd.f32 %v4353_v59, %v7207_v54  ;;  %v4242_v22 = vpop.f32.mrb[25].mxu0  ;;  %v4355_v36 = vpop.f32.mrb[25].mxu1 }
 0x517   : > { %v4243_v57 = vadd.f32 %v4242_v22, %v7210_v50  ;;  %v4356_v62 = vadd.f32 %v4355_v36, %v7213_v10  ;;  %v4244_v23 = vpop.f32.mrb[26].mxu0  ;;  %v4357_v24 = vpop.f32.mrb[26].mxu1 }
 0x518   : > { %4420 = vst [vmem:[#allocation17 + $0x180] sm:$0xff] %v4241_v35  ;;  %4422 = vst [vmem:[#allocation17 + $0x190] sm:$0xff] %v4354_v21  ;;  %v4245_v26 = vadd.f32 %v4244_v23, %v7204_v48  ;;  %v4358_v39 = vadd.f32 %v4357_v24, %v7207_v54  ;;  %v4246_v63 = vpop.f32.mrb[27].mxu0  ;;  %v4359_v29 = vpop.f32.mrb[27].mxu1 }
 0x519   : > { %4421 = vst [vmem:[#allocation17 + $0x188] sm:$0xff] %v4243_v57  ;;  %4423 = vst [vmem:[#allocation17 + $0x198] sm:$0xff] %v4356_v62  ;;  %v4247_v30 = vadd.f32 %v4246_v63, %v7210_v50  ;;  %v4360_v3 = vadd.f32 %v4359_v29, %v7213_v10 }
 0x51a   : > { %4424 = vst [vmem:[#allocation17 + $0x1a0] sm:$0xff] %v4245_v26  ;;  %4426 = vst [vmem:[#allocation17 + $0x1b0] sm:$0xff] %v4358_v39 }
 0x51b   : > { %4425 = vst [vmem:[#allocation17 + $0x1a8] sm:$0xff] %v4247_v30  ;;  %4427 = vst [vmem:[#allocation17 + $0x1b8] sm:$0xff] %v4360_v3 }
 0x51d   : > { %v4250_v33 = vpop.f32.mrb[28].mxu0  ;;  %v4363_v6 = vpop.f32.mrb[28].mxu1 }
 0x51e   : > { %v4251_v47 = vadd.f32 %v4250_v33, %v7204_v48  ;;  %v4364_v8 = vadd.f32 %v4363_v6, %v7207_v54  ;;  %v4252_v43 = vpop.f32.mrb[29].mxu0  ;;  %v4365_v32 = vpop.f32.mrb[29].mxu1 }
 0x51f   : > { %v4253_v46 = vadd.f32 %v4252_v43, %v7210_v50  ;;  %v4366_v31 = vadd.f32 %v4365_v32, %v7213_v10  ;;  %v4254_v52 = vpop.f32.mrb[30].mxu0  ;;  %v4367_v58 = vpop.f32.mrb[30].mxu1 }
 0x520   : > { %4428 = vst [vmem:[#allocation17 + $0x1c0] sm:$0xff] %v4251_v47  ;;  %4430 = vst [vmem:[#allocation17 + $0x1d0] sm:$0xff] %v4364_v8  ;;  %v4255_v60 = vadd.f32 %v4254_v52, %v7204_v48  ;;  %v4368_v27 = vadd.f32 %v4367_v58, %v7207_v54  ;;  %v4256_v61 = vpop.f32.mrb[31].mxu0  ;;  %v4369_v34 = vpop.f32.mrb[31].mxu1 }
 0x521   : > { %4429 = vst [vmem:[#allocation17 + $0x1c8] sm:$0xff] %v4253_v46  ;;  %4431 = vst [vmem:[#allocation17 + $0x1d8] sm:$0xff] %v4366_v31  ;;  %v4257_v37 = vadd.f32 %v4256_v61, %v7210_v50  ;;  %v4370_v49 = vadd.f32 %v4369_v34, %v7213_v10 }
 0x522   : > { %4432 = vst [vmem:[#allocation17 + $0x1e0] sm:$0xff] %v4255_v60  ;;  %4434 = vst [vmem:[#allocation17 + $0x1f0] sm:$0xff] %v4368_v27 }
 0x523   : > { %4433 = vst [vmem:[#allocation17 + $0x1e8] sm:$0xff] %v4257_v37  ;;  %4435 = vst [vmem:[#allocation17 + $0x1f8] sm:$0xff] %v4370_v49 }
 0x524 PF: > { %s7419_s18 = sld [smem:[#allocation29_spill]]  ;;  %s6191_s23 = smov [#allocation17]  }
 0x525   : > { %s4442_s25 = sshll.u32 %s6191_s23, 4  ;;  %s4443_s25 = int_to_ptr.vmem [resolvable:$true] %s4442_s25 }
 0x526   : > { %s6061_s26 = scalar_lea.vmem %s4443_s25, 8192  ;;  %p6068_p12 = scmp.lt.s32.totalorder %s4443_s25, %s4443_s25 }
 0x527   : > { %p6062_p5 = scmp.ne.s32.totalorder %s4443_s25, %s6061_s26  ;;  %p6069_p0 = scmp.lt.s32.totalorder %s6061_s26, %s6061_s26 }
 0x529   : > { %p6070_p9 = por %p6069_p0, %p6068_p12 }
 0x52a   : > { %p5234_p4 = scmp.eq.s32.totalorder %s7419_s18, 3 }
 0x52c   : > { %p6063_p6 = pnand %p6062_p5, %p5234_p4 }
 0x52e   : > { %p6064_p1 = pneg %p6063_p6 }
 0x530   : > { %p6071_p3 = pnand %p6070_p9, %p6064_p1 }
 0x532   : > { %6074 = shalt.err (!%p6071_p3)
}
 0x533   : > { %s7420_s9 = sld [smem:[#allocation37_spill]] }
 0x539   : > { %s6075_s12 = scalar_lea.hbm %s7420_s9, 8192 }
 0x53a   : > { %p6076_p7 = scmp.ne.s32.totalorder %s7420_s9, %s6075_s12  ;;  %p6081_p8 = scmp.lt.u32.totalorder %s6075_s12, %s7420_s9 }
 0x53c   : > { %p6077_p10 = pnand %p6076_p7, %p5234_p4 }
 0x53e   : > { %p6078_p13 = pneg %p6077_p10 }
 0x540   : > { %p6083_p2 = pnand %p6081_p8, %p6078_p13 }
 0x542   : > { %6086 = shalt.err (!%p6083_p2)
}
 0x543   : > { %s6192_s29 = smov 512   ;;  %s6193_s30 = smov 32  }
 0x544   : > { %5190 = dma.vmem_to_hbm [thread:$0]  (%p5234_p4), %s4443_s25, 8192, %s7420_s9, [#allocation5], %s6192_s29, %s6192_s29, %s6193_s30  }
 0x545   : > { %s6194_s4 = smov [#allocation18]  }
 0x546   : > { %s4455_s28 = sshll.u32 %s6194_s4, 4  ;;  %s4456_s28 = int_to_ptr.vmem [resolvable:$true] %s4455_s28 }
 0x547   : > { %s6087_s24 = scalar_lea.vmem %s4456_s28, 4096  ;;  %p6094_p1 = scmp.lt.s32.totalorder %s4456_s28, %s4456_s28 }
 0x548   : > { %p6088_p11 = scmp.ne.s32.totalorder %s4456_s28, %s6087_s24  ;;  %p6095_p12 = scmp.lt.s32.totalorder %s6087_s24, %s6087_s24 }
 0x54a   : > { %p6089_p5 = pnand %p6088_p11, %p5234_p4  ;;  %p6096_p0 = por %p6095_p12, %p6094_p1 }
 0x54c   : > { %p6090_p6 = pneg %p6089_p5 }
 0x54e   : > { %p6097_p9 = pnand %p6096_p0, %p6090_p6 }
 0x550   : > { %6100 = shalt.err (!%p6097_p9)
}
 0x551   : > { %s7421_s21 = sld [smem:[#allocation38_spill]] }
 0x557   : > { %s6101_s10 = scalar_lea.hbm %s7421_s21, 4096 }
 0x558   : > { %p6102_p3 = scmp.ne.s32.totalorder %s7421_s21, %s6101_s10  ;;  %p6107_p13 = scmp.lt.u32.totalorder %s6101_s10, %s7421_s21 }
 0x55a   : > { %p6103_p7 = pnand %p6102_p3, %p5234_p4 }
 0x55c   : > { %p6104_p10 = pneg %p6103_p7 }
 0x55e   : > { %p6109_p8 = pnand %p6107_p13, %p6104_p10 }
 0x560   : > { %6112 = shalt.err (!%p6109_p8)
}
 0x561   : > { %s6195_s26 = smov 256   ;;  %s6196_s1 = smov 16  }
 0x562   : > { %5192 = dma.vmem_to_hbm [thread:$0]  (%p5234_p4), %s4456_s28, 4096, %s7421_s21, [#allocation19], %s6195_s26, %s6195_s26, %s6196_s1  }
 0x563   : > { %6154 = dma.done.wait (%p5234_p4), [#allocation5], 8192  }
 0x564   : > { %6156 = vsyncadd (%p5234_p4), [#allocation5], 4294959104 }
 0x565   : > { %6158 = dma.done.wait (%p5234_p4), [#allocation19], 4096  }
 0x566   : > { %6160 = vsyncadd (%p5234_p4), [#allocation19], 4294963200 }
 0x567 PF: > { %s7422_s12 = sld [smem:[#allocation32_spill]]  ;;  %s7423_s30 = sld [smem:[#allocation28_spill]] }
 0x568   : > { %s7424_s17 = sld [smem:[#allocation33_spill]]  ;;  %s7425_s10 = smov %s6171_s11 }
 0x56d   : > { %p28_p2 = scmp.ge.s32.totalorder %s7422_s12, 6  }
 0x56e   : > { %s7426_s11 = smov %s7424_s17 }
 0x56f   :  { %30 = sbr.rel (!%p28_p2) target bundleno = 16 (0x10), region = 150 }
 0x576   :  { %4475 = vsyncpa [#allocation4], 1 }
 0x577   :  { %4477 = vsyncpa [#allocation4 + $0x1], 1 }
 0x578   :  { %4478 = vsyncpa [#allocation7], 1 }
 0x579   :  { %4480 = vsyncpa [#allocation7 + $0x1], 1 }
 0x57a   :  { %4481 = vsyncpa [#allocation10], 1 }
 0x57b   :  { %4483 = vsyncpa [#allocation10 + $0x1], 1 }
 0x57c   :  { %4484 = vsyncpa [#allocation13], 1 }
 0x57d   :  { %4485 = vsyncpa [#allocation16], 1 }
 0x57e   :  { %4486 = vsyncpa [#allocation5], 1 }
 0x57f   :  { %4488 = vsyncpa [#allocation5 + $0x1], 1 }
 0x580   :  { %4489 = vsyncpa [#allocation19], 1 }

</bundles_post_ra>
